<compile_context>
chip_gen: v6e
topology: v6e:2x2x1
jax: 0.10.0
libtpu: 0.0.40
codegen_flags: <defaults>
</compile_context>

<pallas_src>
import jax
import jax.numpy as jnp
from jax.experimental import pallas as pl
from jax.experimental.pallas import tpu as pltpu

# ---- small, PPI-like (scaled-down) dimensions -------------------------------
N_NODES = 32          # number of graph nodes
N_EDGES = 96          # number of random edges
F_IN = 16             # train_dataset.num_features (scaled down from 50)
C1 = 32               # per-head channels of conv1/conv2 (scaled down from 256)
H1 = 4                # heads of conv1/conv2
HIDDEN = H1 * C1      # 4 * 256 analogue -> 128
NUM_CLASSES = 8       # train_dataset.num_classes (scaled down from 121)
H3 = 6                # heads of conv3 (concat=False -> mean over heads)

_NEG = -1e30          # additive mask value for non-edges
SLAB_W = 256          # lane width of the packed parameter slab (2 vregs)
OUT_W = 128           # lane-dense output width (classes live in lanes 0..7)

# --------------------------- parameter slab layout ----------------------------
# Each block starts at an 8-row-aligned offset, lane 0, inside [SLAB_ROWS, 256].
_LAYOUT = [
    # name    rows               cols
    ("W1",    F_IN,              H1 * C1),            # conv1 projection  [16,128]
    ("WL1",   F_IN,              HIDDEN),             # lin1 weight       [16,128]
    ("W2",    HIDDEN,            H1 * C1),            # conv2 projection  [128,128]
    ("WL2",   HIDDEN,            HIDDEN),             # lin2 weight       [128,128]
    ("W3",    HIDDEN,            H3 * NUM_CLASSES),   # conv3 projection  [128,48]
    ("WL3",   HIDDEN,            OUT_W),              # lin3 weight (lane-padded)
    ("AE1",   H1 * C1,           H1 * N_NODES),       # att_dst expand L1 [128,128]
    ("AE2",   H1 * C1,           H1 * N_NODES),       # att_dst expand L2 [128,128]
    ("AE3",   H3 * NUM_CLASSES,  H3 * N_NODES),       # att_dst expand L3 [48,192]
    ("AS1",   H1,                H1 * C1),            # att_src block-diag [4,128]
    ("AS2",   H1,                H1 * C1),            # [4,128]
    ("AS3",   H3,                H3 * NUM_CLASSES),   # [6,48]
    ("BD12",  H1 * N_NODES,      H1 * C1),            # block-diag 0/1 mask [128,128]
    ("BD3",   H3 * N_NODES,      H3 * NUM_CLASSES),   # [192,48]
    ("COL3",  H3 * NUM_CLASSES,  OUT_W),              # mean-over-heads collapse [48,128]
    ("B1",    1,                 HIDDEN),             # conv1.bias + lin1.bias
    ("B2",    1,                 HIDDEN),             # conv2.bias + lin2.bias
    ("B3",    1,                 OUT_W),              # conv3.bias + lin3.bias (padded)
]


def _round8(r):
    return (r + 7) // 8 * 8


_OFFSETS = {}
_row = 0
for _name, _r, _c in _LAYOUT:
    _OFFSETS[_name] = (_row, _r, _c)
    _row += _round8(_r)
SLAB_ROWS = _row


def _ld(p_ref, name):
    """Static slice-load of one parameter block from the slab ref."""
    off, r, c = _OFFSETS[name]
    return p_ref[off:off + r, 0:c]


# ----------------------------- fused Pallas kernel ----------------------------
def _net_kernel(x_ref, adjb_ref, p_ref, o_ref):
    n = N_NODES
    x = x_ref[...]                          # [N, F_IN]
    adjb6 = adjb_ref[...]                   # [N, H3*N] additive mask (0 / -1e30)
    adjb4 = adjb6[:, :H1 * n]               # first 4 head-blocks, layers 1-2

    def gat_layer(h_in, w, ae, asrc, bd, heads, adj_bias):
        # projection (lane-dense [N, H*C]) -- one MXU op
        xp = jnp.dot(h_in, w, preferred_element_type=jnp.float32)
        # destination scores expanded to the packed layout:
        #   dst[i, h*N+j] = <xp[i, h*C:(h+1)*C], att_dst[h]>   (one MXU op)
        dst = jnp.dot(xp, ae, preferred_element_type=jnp.float32)
        # source scores per head: a_src_t[h, j] = <xp[j, h*C:], att_src[h]>  -> [H, N]
        a_src_t = jax.lax.dot_general(asrc, xp, (((1,), (1,)), ((), ())),
                                      preferred_element_type=jnp.float32)
        # broadcast source scores into the packed [N, H*N] lane layout (cheap copies)
        src = jnp.concatenate(
            [jnp.broadcast_to(a_src_t[h:h + 1, :], (n, n)) for h in range(heads)],
            axis=-1)
        # full-width elementwise chain on [N, H*N] vregs
        e = dst + src
        e = jnp.where(e > 0.0, e, 0.2 * e)           # LeakyReLU(0.2)
        e = e + adj_bias                             # mask non-edges (additive -1e30)
        # per-(row, head) max, broadcast back over each head's lane block
        m = jnp.concatenate(
            [jnp.broadcast_to(
                jnp.max(e[:, h * n:(h + 1) * n], axis=-1, keepdims=True), (n, n))
             for h in range(heads)], axis=-1)
        p = jnp.exp(e - m)                           # masked entries underflow to 0
        # per-(row, head) softmax denominator, exact reciprocal
        inv = jnp.concatenate(
            [jnp.broadcast_to(
                1.0 / jnp.sum(p[:, h * n:(h + 1) * n], axis=-1, keepdims=True), (n, n))
             for h in range(heads)], axis=-1)
        alpha = p * inv                              # [N, H*N]
        # single MXU op against block-diagonal xp -> lane-dense per-head concat output
        xp_bd = jnp.concatenate([xp] * heads, axis=0) * bd    # [H*N, H*C]
        return jnp.dot(alpha, xp_bd, preferred_element_type=jnp.float32)

    def elu(v):
        # exp only on the clamped negative branch (never inf), exact near 0 enough here
        return jnp.where(v > 0.0, v, jnp.exp(jnp.minimum(v, 0.0)) - 1.0)

    # ---- layer 1: x = F.elu(conv1(x) + lin1(x)) ----
    g1 = gat_layer(x, _ld(p_ref, "W1"), _ld(p_ref, "AE1"), _ld(p_ref, "AS1"),
                   _ld(p_ref, "BD12"), H1, adjb4)
    l1 = jnp.dot(x, _ld(p_ref, "WL1"), preferred_element_type=jnp.float32)
    h1 = elu(g1 + l1 + _ld(p_ref, "B1"))

    # ---- layer 2: x = F.elu(conv2(x) + lin2(x)) ----
    g2 = gat_layer(h1, _ld(p_ref, "W2"), _ld(p_ref, "AE2"), _ld(p_ref, "AS2"),
                   _ld(p_ref, "BD12"), H1, adjb4)
    l2 = jnp.dot(h1, _ld(p_ref, "WL2"), preferred_element_type=jnp.float32)
    h2 = elu(g2 + l2 + _ld(p_ref, "B2"))

    # ---- layer 3: conv3 (concat=False -> mean over heads) + lin3 ----
    g3b = gat_layer(h2, _ld(p_ref, "W3"), _ld(p_ref, "AE3"), _ld(p_ref, "AS3"),
                    _ld(p_ref, "BD3"), H3, adjb6)                  # [N, H3*C3]
    g3 = jnp.dot(g3b, _ld(p_ref, "COL3"), preferred_element_type=jnp.float32)
    l3 = jnp.dot(h2, _ld(p_ref, "WL3"), preferred_element_type=jnp.float32)
    o_ref[...] = g3 + l3 + _ld(p_ref, "B3")                        # [N, 128] lane-dense


# -------------------- trace-time parameter preprocessing ----------------------
def _adst_expand(att, n):
    """[H, C] -> [H*C, H*N]: value att[h, c] at (h*C+c, h*N+j) for all j."""
    h, c = att.shape
    eye = jnp.eye(h, dtype=jnp.float32)
    blk = (eye[:, None, :, None] * att[:, :, None, None]
           * jnp.ones((1, 1, 1, n), jnp.float32))                  # [H, C, H, N]
    return blk.reshape(h * c, h * n)


def _asrc_mat(att):
    """[H, C] -> [H, H*C]: row h holds att[h] at columns h*C:(h+1)*C."""
    h, c = att.shape
    eye = jnp.eye(h, dtype=jnp.float32)
    return (eye[:, :, None] * att[None, :, :]).reshape(h, h * c)


def _bd_mask(heads, n, c):
    """Block-diagonal 0/1 mask [H*N, H*C] (1 where the row/col head indices match)."""
    eye = jnp.eye(heads, dtype=jnp.float32)
    return (eye[:, None, :, None] * jnp.ones((1, n, 1, c), jnp.float32)
            ).reshape(heads * n, heads * c)


def _collapse_mean(heads, c, width):
    """[H*C, width]: stacked (1/H)*I_C in the first C lanes -> mean over heads."""
    blk = jnp.concatenate([jnp.eye(c, dtype=jnp.float32)] * heads, axis=0) / heads
    return jnp.pad(blk, ((0, 0), (0, width - c)))


def _build_slab(parts):
    blocks = []
    for name, r, c in _LAYOUT:
        a = parts[name].astype(jnp.float32)
        assert a.shape == (r, c), (name, a.shape, (r, c))
        blocks.append(jnp.pad(a, ((0, _round8(r) - r), (0, SLAB_W - c))))
    return jnp.concatenate(blocks, axis=0)          # [SLAB_ROWS, 256]


# --------------------------------- forward ------------------------------------
@jax.jit
def net_forward(x, adj, params):
    assert x.shape == (N_NODES, F_IN) and adj.shape == (N_NODES, N_NODES)
    w1, as1, ad1, b1 = params["conv1"]
    wl1, bl1 = params["lin1"]
    w2, as2, ad2, b2 = params["conv2"]
    wl2, bl2 = params["lin2"]
    w3, as3, ad3, b3 = params["conv3"]
    wl3, bl3 = params["lin3"]
    n = N_NODES
    pad_c = OUT_W - NUM_CLASSES

    parts = {
        "W1": w1, "WL1": wl1, "W2": w2, "WL2": wl2, "W3": w3,
        "WL3": jnp.pad(wl3, ((0, 0), (0, pad_c))),
        "AE1": _adst_expand(ad1, n), "AE2": _adst_expand(ad2, n),
        "AE3": _adst_expand(ad3, n),
        "AS1": _asrc_mat(as1), "AS2": _asrc_mat(as2), "AS3": _asrc_mat(as3),
        "BD12": _bd_mask(H1, n, C1), "BD3": _bd_mask(H3, n, NUM_CLASSES),
        "COL3": _collapse_mean(H3, NUM_CLASSES, OUT_W),
        "B1": b1.reshape(1, -1) + bl1,
        "B2": b2.reshape(1, -1) + bl2,
        "B3": jnp.pad(b3.reshape(1, -1) + bl3, ((0, 0), (0, pad_c))),
    }
    slab = _build_slab(parts)

    # additive adjacency bias (0 on edges, -1e30 elsewhere), tiled across the
    # 6-head lane packing; layers 1-2 reuse the first 4*N lanes.
    adj_bias = jnp.tile(jnp.where(adj > 0.0, 0.0, _NEG).astype(jnp.float32), (1, H3))

    out = pl.pallas_call(
        _net_kernel,
        out_shape=jax.ShapeDtypeStruct((n, OUT_W), jnp.float32),
        in_specs=[pl.BlockSpec(memory_space=pltpu.MemorySpace.VMEM)] * 3,
        out_specs=pl.BlockSpec(memory_space=pltpu.MemorySpace.VMEM),
    )(x, adj_bias, slab)
    return out[:, :NUM_CLASSES]


# ------------------------------ pure-JAX reference -----------------------------
def _gat_ref(x, adj, w, att_src, att_dst, bias, heads, out_ch, concat):
    n = x.shape[0]
    xp = (x @ w).reshape(n, heads, out_ch)                      # [N, H, C]
    a_src = jnp.einsum('nhc,hc->hn', xp, att_src)               # [H, N] (source j)
    a_dst = jnp.einsum('nhc,hc->hn', xp, att_dst)               # [H, N] (dest i)
    e = a_dst[:, :, None] + a_src[:, None, :]                   # e[h, i, j]
    e = jnp.where(e > 0, e, 0.2 * e)
    e = jnp.where(adj[None] > 0, e, -1e30)
    e = e - jnp.max(e, axis=-1, keepdims=True)
    p = jnp.exp(e)
    alpha = p / jnp.sum(p, axis=-1, keepdims=True)
    out = jnp.einsum('hij,jhc->ihc', alpha, xp)                 # [N, H, C]
    out = out.reshape(n, heads * out_ch) if concat else out.mean(axis=1)
    return out + bias


def net_forward_ref(x, adj, params):
    w1, as1, ad1, b1 = params["conv1"]; wl1, bl1 = params["lin1"]
    w2, as2, ad2, b2 = params["conv2"]; wl2, bl2 = params["lin2"]
    w3, as3, ad3, b3 = params["conv3"]; wl3, bl3 = params["lin3"]
    h = _gat_ref(x, adj, w1, as1, ad1, b1, H1, C1, True) + x @ wl1 + bl1
    h = jnp.where(h > 0, h, jnp.exp(h) - 1.0)
    h2 = _gat_ref(h, adj, w2, as2, ad2, b2, H1, C1, True) + h @ wl2 + bl2
    h2 = jnp.where(h2 > 0, h2, jnp.exp(h2) - 1.0)
    return (_gat_ref(h2, adj, w3, as3, ad3, b3, H3, NUM_CLASSES, False)
            + h2 @ wl3 + bl3)


# ------------------------------- parameters -----------------------------------
def _glorot(key, shape):
    fan_in, fan_out = shape[0], shape[-1]
    lim = jnp.sqrt(6.0 / (fan_in + fan_out))
    return jax.random.uniform(key, shape, jnp.float32, -lim, lim)


def init_params(key):
    ks = jax.random.split(key, 16)
    return {
        # GATConv(F_IN, C1, heads=H1)
        "conv1": (_glorot(ks[0], (F_IN, H1 * C1)),
                  _glorot(ks[1], (H1, C1)),
                  _glorot(ks[2], (H1, C1)),
                  jnp.zeros((H1 * C1,), jnp.float32)),
        # Linear(F_IN, HIDDEN)
        "lin1": (_glorot(ks[3], (F_IN, HIDDEN)),
                 0.01 * jnp.ones((1, HIDDEN), jnp.float32)),
        # GATConv(HIDDEN, C1, heads=H1)
        "conv2": (_glorot(ks[4], (HIDDEN, H1 * C1)),
                  _glorot(ks[5], (H1, C1)),
                  _glorot(ks[6], (H1, C1)),
                  jnp.zeros((H1 * C1,), jnp.float32)),
        # Linear(HIDDEN, HIDDEN)
        "lin2": (_glorot(ks[7], (HIDDEN, HIDDEN)),
                 0.01 * jnp.ones((1, HIDDEN), jnp.float32)),
        # GATConv(HIDDEN, NUM_CLASSES, heads=H3, concat=False)
        "conv3": (_glorot(ks[8], (HIDDEN, H3 * NUM_CLASSES)),
                  _glorot(ks[9], (H3, NUM_CLASSES)),
                  _glorot(ks[10], (H3, NUM_CLASSES)),
                  jnp.zeros((NUM_CLASSES,), jnp.float32)),
        # Linear(HIDDEN, NUM_CLASSES)
        "lin3": (_glorot(ks[11], (HIDDEN, NUM_CLASSES)),
                 0.01 * jnp.ones((1, NUM_CLASSES), jnp.float32)),
    }


if __name__ == "__main__":
    key = jax.random.PRNGKey(0)
    kx, ks, kd, kp = jax.random.split(key, 4)

    # node features
    x = jax.random.normal(kx, (N_NODES, F_IN), jnp.float32)

    # random edge_index [2, E]; densified into adjacency adj[i, j] = edge j -> i
    src = jax.random.randint(ks, (N_EDGES,), 0, N_NODES)
    dst = jax.random.randint(kd, (N_EDGES,), 0, N_NODES)
    adj = jnp.zeros((N_NODES, N_NODES), jnp.float32).at[dst, src].set(1.0)
    adj = adj.at[jnp.arange(N_NODES), jnp.arange(N_NODES)].set(1.0)  # self-loops

    params = init_params(kp)

    out = net_forward(x, adj, params)
    jax.block_until_ready(out)
    assert out.shape == (N_NODES, NUM_CLASSES)
    assert bool(jnp.all(jnp.isfinite(out)))

    # correctness vs. pure-JAX reference (exact softmax reciprocal -> tight tol)
    ref = net_forward_ref(x, adj, params)
    err = float(jnp.max(jnp.abs(out - ref)))
    assert err < 1e-2, f"max abs error vs reference: {err}"

    print("KERNEL_OK")
</pallas_src>

<mosaic_0001>
module attributes {stable_mosaic.version = 11 : i64} {
  func.func @_net_kernel(%arg0: memref<32x16xf32, #tpu.memory_space<vmem>>, %arg1: memref<32x192xf32, #tpu.memory_space<vmem>>, %arg2: memref<1264x256xf32, #tpu.memory_space<vmem>>, %arg3: memref<32x128xf32, #tpu.memory_space<vmem>>) attributes {dimension_semantics = [], scalar_prefetch = 0 : i64, scratch_operands = 0 : i64, tpu.core_type = #tpu.core_type<tc>} {
    %c0 = arith.constant 0 : index
    %c0_0 = arith.constant 0 : index
    %0 = vector.load %arg0[%c0, %c0_0] : memref<32x16xf32, #tpu.memory_space<vmem>>, vector<32x16xf32>
    %c0_1 = arith.constant 0 : index
    %c0_2 = arith.constant 0 : index
    %1 = vector.load %arg1[%c0_1, %c0_2] : memref<32x192xf32, #tpu.memory_space<vmem>>, vector<32x192xf32>
    %2 = vector.extract_strided_slice %1 {offsets = [0, 0], sizes = [32, 128], strides = [1, 1]} : vector<32x192xf32> to vector<32x128xf32>
    %c0_3 = arith.constant 0 : index
    %c0_4 = arith.constant 0 : index
    %3 = vector.load %arg2[%c0_3, %c0_4] : memref<1264x256xf32, #tpu.memory_space<vmem>>, vector<16x128xf32>
    %c544 = arith.constant 544 : index
    %c0_5 = arith.constant 0 : index
    %4 = vector.load %arg2[%c544, %c0_5] : memref<1264x256xf32, #tpu.memory_space<vmem>>, vector<128x128xf32>
    %c848 = arith.constant 848 : index
    %c0_6 = arith.constant 0 : index
    %5 = vector.load %arg2[%c848, %c0_6] : memref<1264x256xf32, #tpu.memory_space<vmem>>, vector<4x128xf32>
    %c872 = arith.constant 872 : index
    %c0_7 = arith.constant 0 : index
    %6 = vector.load %arg2[%c872, %c0_7] : memref<1264x256xf32, #tpu.memory_space<vmem>>, vector<128x128xf32>
    %cst = arith.constant dense<0.000000e+00> : vector<32x128xf32>
    %7 = tpu.matmul %0, %3, %cst {dimension_numbers = #tpu.dot_dimension_numbers<[1], [0], [0], [1], [0, 0, 1, 1], [], []>} : vector<32x16xf32>, vector<16x128xf32>, vector<32x128xf32> -> vector<32x128xf32>
    %cst_8 = arith.constant dense<0.000000e+00> : vector<32x128xf32>
    %8 = tpu.matmul %7, %4, %cst_8 {dimension_numbers = #tpu.dot_dimension_numbers<[1], [0], [0], [1], [0, 0, 1, 1], [], []>} : vector<32x128xf32>, vector<128x128xf32>, vector<32x128xf32> -> vector<32x128xf32>
    %cst_9 = arith.constant dense<0.000000e+00> : vector<4x32xf32>
    %9 = tpu.matmul %5, %7, %cst_9 {dimension_numbers = #tpu.dot_dimension_numbers<[1], [1], [0], [0], [0, 0, 1, 0], [], []>} : vector<4x128xf32>, vector<32x128xf32>, vector<4x32xf32> -> vector<4x32xf32>
    %10 = vector.extract_strided_slice %9 {offsets = [0, 0], sizes = [1, 32], strides = [1, 1]} : vector<4x32xf32> to vector<1x32xf32>
    %11 = vector.shape_cast %10 : vector<1x32xf32> to vector<1x32xf32>
    %12 = vector.broadcast %11 : vector<1x32xf32> to vector<32x32xf32>
    %13 = vector.extract_strided_slice %9 {offsets = [1, 0], sizes = [1, 32], strides = [1, 1]} : vector<4x32xf32> to vector<1x32xf32>
    %14 = vector.shape_cast %13 : vector<1x32xf32> to vector<1x32xf32>
    %15 = vector.broadcast %14 : vector<1x32xf32> to vector<32x32xf32>
    %16 = vector.extract_strided_slice %9 {offsets = [2, 0], sizes = [1, 32], strides = [1, 1]} : vector<4x32xf32> to vector<1x32xf32>
    %17 = vector.shape_cast %16 : vector<1x32xf32> to vector<1x32xf32>
    %18 = vector.broadcast %17 : vector<1x32xf32> to vector<32x32xf32>
    %19 = vector.extract_strided_slice %9 {offsets = [3, 0], sizes = [1, 32], strides = [1, 1]} : vector<4x32xf32> to vector<1x32xf32>
    %20 = vector.shape_cast %19 : vector<1x32xf32> to vector<1x32xf32>
    %21 = vector.broadcast %20 : vector<1x32xf32> to vector<32x32xf32>
    %22 = tpu.concatenate %12, %15, %18, %21 in 1 : vector<32x32xf32>, vector<32x32xf32>, vector<32x32xf32>, vector<32x32xf32> -> vector<32x128xf32>
    %23 = arith.addf %8, %22 : vector<32x128xf32>
    %cst_10 = arith.constant 0.000000e+00 : f32
    %24 = vector.broadcast %cst_10 : f32 to vector<32x128xf32>
    %25 = arith.cmpf ogt, %23, %24 : vector<32x128xf32>
    %cst_11 = arith.constant 2.000000e-01 : f32
    %26 = vector.broadcast %cst_11 : f32 to vector<32x128xf32>
    %27 = arith.mulf %26, %23 : vector<32x128xf32>
    %28 = arith.select %25, %23, %27 : vector<32x128xi1>, vector<32x128xf32>
    %29 = arith.addf %28, %2 : vector<32x128xf32>
    %30 = vector.extract_strided_slice %29 {offsets = [0, 0], sizes = [32, 32], strides = [1, 1]} : vector<32x128xf32> to vector<32x32xf32>
    %cst_12 = arith.constant dense<0xFF800000> : vector<32xf32>
    %31 = vector.multi_reduction <maximumf>, %30, %cst_12 [1] : vector<32x32xf32> to vector<32xf32>
    %32 = vector.shape_cast %31 : vector<32xf32> to vector<32x1xf32>
    %33 = vector.shape_cast %32 : vector<32x1xf32> to vector<32x1xf32>
    %34 = vector.broadcast %33 : vector<32x1xf32> to vector<32x32xf32>
    %35 = vector.extract_strided_slice %29 {offsets = [0, 32], sizes = [32, 32], strides = [1, 1]} : vector<32x128xf32> to vector<32x32xf32>
    %cst_13 = arith.constant dense<0xFF800000> : vector<32xf32>
    %36 = vector.multi_reduction <maximumf>, %35, %cst_13 [1] : vector<32x32xf32> to vector<32xf32>
    %37 = vector.shape_cast %36 : vector<32xf32> to vector<32x1xf32>
    %38 = vector.shape_cast %37 : vector<32x1xf32> to vector<32x1xf32>
    %39 = vector.broadcast %38 : vector<32x1xf32> to vector<32x32xf32>
    %40 = vector.extract_strided_slice %29 {offsets = [0, 64], sizes = [32, 32], strides = [1, 1]} : vector<32x128xf32> to vector<32x32xf32>
    %cst_14 = arith.constant dense<0xFF800000> : vector<32xf32>
    %41 = vector.multi_reduction <maximumf>, %40, %cst_14 [1] : vector<32x32xf32> to vector<32xf32>
    %42 = vector.shape_cast %41 : vector<32xf32> to vector<32x1xf32>
    %43 = vector.shape_cast %42 : vector<32x1xf32> to vector<32x1xf32>
    %44 = vector.broadcast %43 : vector<32x1xf32> to vector<32x32xf32>
    %45 = vector.extract_strided_slice %29 {offsets = [0, 96], sizes = [32, 32], strides = [1, 1]} : vector<32x128xf32> to vector<32x32xf32>
    %cst_15 = arith.constant dense<0xFF800000> : vector<32xf32>
    %46 = vector.multi_reduction <maximumf>, %45, %cst_15 [1] : vector<32x32xf32> to vector<32xf32>
    %47 = vector.shape_cast %46 : vector<32xf32> to vector<32x1xf32>
    %48 = vector.shape_cast %47 : vector<32x1xf32> to vector<32x1xf32>
    %49 = vector.broadcast %48 : vector<32x1xf32> to vector<32x32xf32>
    %50 = tpu.concatenate %34, %39, %44, %49 in 1 : vector<32x32xf32>, vector<32x32xf32>, vector<32x32xf32>, vector<32x32xf32> -> vector<32x128xf32>
    %51 = arith.subf %29, %50 : vector<32x128xf32>
    %52 = math.exp %51 : vector<32x128xf32>
    %53 = vector.extract_strided_slice %52 {offsets = [0, 0], sizes = [32, 32], strides = [1, 1]} : vector<32x128xf32> to vector<32x32xf32>
    %cst_16 = arith.constant dense<0.000000e+00> : vector<32xf32>
    %54 = vector.multi_reduction <add>, %53, %cst_16 [1] : vector<32x32xf32> to vector<32xf32>
    %55 = vector.shape_cast %54 : vector<32xf32> to vector<32x1xf32>
    %cst_17 = arith.constant 1.000000e+00 : f32
    %56 = vector.broadcast %cst_17 : f32 to vector<32x1xf32>
    %57 = arith.divf %56, %55 : vector<32x1xf32>
    %58 = vector.shape_cast %57 : vector<32x1xf32> to vector<32x1xf32>
    %59 = vector.broadcast %58 : vector<32x1xf32> to vector<32x32xf32>
    %60 = vector.extract_strided_slice %52 {offsets = [0, 32], sizes = [32, 32], strides = [1, 1]} : vector<32x128xf32> to vector<32x32xf32>
    %cst_18 = arith.constant dense<0.000000e+00> : vector<32xf32>
    %61 = vector.multi_reduction <add>, %60, %cst_18 [1] : vector<32x32xf32> to vector<32xf32>
    %62 = vector.shape_cast %61 : vector<32xf32> to vector<32x1xf32>
    %cst_19 = arith.constant 1.000000e+00 : f32
    %63 = vector.broadcast %cst_19 : f32 to vector<32x1xf32>
    %64 = arith.divf %63, %62 : vector<32x1xf32>
    %65 = vector.shape_cast %64 : vector<32x1xf32> to vector<32x1xf32>
    %66 = vector.broadcast %65 : vector<32x1xf32> to vector<32x32xf32>
    %67 = vector.extract_strided_slice %52 {offsets = [0, 64], sizes = [32, 32], strides = [1, 1]} : vector<32x128xf32> to vector<32x32xf32>
    %cst_20 = arith.constant dense<0.000000e+00> : vector<32xf32>
    %68 = vector.multi_reduction <add>, %67, %cst_20 [1] : vector<32x32xf32> to vector<32xf32>
    %69 = vector.shape_cast %68 : vector<32xf32> to vector<32x1xf32>
    %cst_21 = arith.constant 1.000000e+00 : f32
    %70 = vector.broadcast %cst_21 : f32 to vector<32x1xf32>
    %71 = arith.divf %70, %69 : vector<32x1xf32>
    %72 = vector.shape_cast %71 : vector<32x1xf32> to vector<32x1xf32>
    %73 = vector.broadcast %72 : vector<32x1xf32> to vector<32x32xf32>
    %74 = vector.extract_strided_slice %52 {offsets = [0, 96], sizes = [32, 32], strides = [1, 1]} : vector<32x128xf32> to vector<32x32xf32>
    %cst_22 = arith.constant dense<0.000000e+00> : vector<32xf32>
    %75 = vector.multi_reduction <add>, %74, %cst_22 [1] : vector<32x32xf32> to vector<32xf32>
    %76 = vector.shape_cast %75 : vector<32xf32> to vector<32x1xf32>
    %cst_23 = arith.constant 1.000000e+00 : f32
    %77 = vector.broadcast %cst_23 : f32 to vector<32x1xf32>
    %78 = arith.divf %77, %76 : vector<32x1xf32>
    %79 = vector.shape_cast %78 : vector<32x1xf32> to vector<32x1xf32>
    %80 = vector.broadcast %79 : vector<32x1xf32> to vector<32x32xf32>
    %81 = tpu.concatenate %59, %66, %73, %80 in 1 : vector<32x32xf32>, vector<32x32xf32>, vector<32x32xf32>, vector<32x32xf32> -> vector<32x128xf32>
    %82 = arith.mulf %52, %81 : vector<32x128xf32>
    %83 = tpu.concatenate %7, %7, %7, %7 in 0 : vector<32x128xf32>, vector<32x128xf32>, vector<32x128xf32>, vector<32x128xf32> -> vector<128x128xf32>
    %84 = arith.mulf %83, %6 : vector<128x128xf32>
    %cst_24 = arith.constant dense<0.000000e+00> : vector<32x128xf32>
    %85 = tpu.matmul %82, %84, %cst_24 {dimension_numbers = #tpu.dot_dimension_numbers<[1], [0], [0], [1], [0, 0, 1, 1], [], []>} : vector<32x128xf32>, vector<128x128xf32>, vector<32x128xf32> -> vector<32x128xf32>
    %c16 = arith.constant 16 : index
    %c0_25 = arith.constant 0 : index
    %86 = vector.load %arg2[%c16, %c0_25] : memref<1264x256xf32, #tpu.memory_space<vmem>>, vector<16x128xf32>
    %cst_26 = arith.constant dense<0.000000e+00> : vector<32x128xf32>
    %87 = tpu.matmul %0, %86, %cst_26 {dimension_numbers = #tpu.dot_dimension_numbers<[1], [0], [0], [1], [0, 0, 1, 1], [], []>} : vector<32x16xf32>, vector<16x128xf32>, vector<32x128xf32> -> vector<32x128xf32>
    %88 = arith.addf %85, %87 : vector<32x128xf32>
    %c1240 = arith.constant 1240 : index
    %c0_27 = arith.constant 0 : index
    %89 = vector.load %arg2[%c1240, %c0_27] : memref<1264x256xf32, #tpu.memory_space<vmem>>, vector<1x128xf32>
    %90 = vector.broadcast %89 : vector<1x128xf32> to vector<32x128xf32>
    %91 = arith.addf %88, %90 : vector<32x128xf32>
    %cst_28 = arith.constant 0.000000e+00 : f32
    %92 = vector.broadcast %cst_28 : f32 to vector<32x128xf32>
    %93 = arith.cmpf ogt, %91, %92 : vector<32x128xf32>
    %cst_29 = arith.constant 0.000000e+00 : f32
    %94 = vector.broadcast %cst_29 : f32 to vector<32x128xf32>
    %95 = arith.minimumf %91, %94 : vector<32x128xf32>
    %96 = math.exp %95 : vector<32x128xf32>
    %cst_30 = arith.constant 1.000000e+00 : f32
    %97 = vector.broadcast %cst_30 : f32 to vector<32x128xf32>
    %98 = arith.subf %96, %97 : vector<32x128xf32>
    %99 = arith.select %93, %91, %98 : vector<32x128xi1>, vector<32x128xf32>
    %c32 = arith.constant 32 : index
    %c0_31 = arith.constant 0 : index
    %100 = vector.load %arg2[%c32, %c0_31] : memref<1264x256xf32, #tpu.memory_space<vmem>>, vector<128x128xf32>
    %c672 = arith.constant 672 : index
    %c0_32 = arith.constant 0 : index
    %101 = vector.load %arg2[%c672, %c0_32] : memref<1264x256xf32, #tpu.memory_space<vmem>>, vector<128x128xf32>
    %c856 = arith.constant 856 : index
    %c0_33 = arith.constant 0 : index
    %102 = vector.load %arg2[%c856, %c0_33] : memref<1264x256xf32, #tpu.memory_space<vmem>>, vector<4x128xf32>
    %c872_34 = arith.constant 872 : index
    %c0_35 = arith.constant 0 : index
    %103 = vector.load %arg2[%c872_34, %c0_35] : memref<1264x256xf32, #tpu.memory_space<vmem>>, vector<128x128xf32>
    %cst_36 = arith.constant dense<0.000000e+00> : vector<32x128xf32>
    %104 = tpu.matmul %99, %100, %cst_36 {dimension_numbers = #tpu.dot_dimension_numbers<[1], [0], [0], [1], [0, 0, 1, 1], [], []>} : vector<32x128xf32>, vector<128x128xf32>, vector<32x128xf32> -> vector<32x128xf32>
    %cst_37 = arith.constant dense<0.000000e+00> : vector<32x128xf32>
    %105 = tpu.matmul %104, %101, %cst_37 {dimension_numbers = #tpu.dot_dimension_numbers<[1], [0], [0], [1], [0, 0, 1, 1], [], []>} : vector<32x128xf32>, vector<128x128xf32>, vector<32x128xf32> -> vector<32x128xf32>
    %cst_38 = arith.constant dense<0.000000e+00> : vector<4x32xf32>
    %106 = tpu.matmul %102, %104, %cst_38 {dimension_numbers = #tpu.dot_dimension_numbers<[1], [1], [0], [0], [0, 0, 1, 0], [], []>} : vector<4x128xf32>, vector<32x128xf32>, vector<4x32xf32> -> vector<4x32xf32>
    %107 = vector.extract_strided_slice %106 {offsets = [0, 0], sizes = [1, 32], strides = [1, 1]} : vector<4x32xf32> to vector<1x32xf32>
    %108 = vector.shape_cast %107 : vector<1x32xf32> to vector<1x32xf32>
    %109 = vector.broadcast %108 : vector<1x32xf32> to vector<32x32xf32>
    %110 = vector.extract_strided_slice %106 {offsets = [1, 0], sizes = [1, 32], strides = [1, 1]} : vector<4x32xf32> to vector<1x32xf32>
    %111 = vector.shape_cast %110 : vector<1x32xf32> to vector<1x32xf32>
    %112 = vector.broadcast %111 : vector<1x32xf32> to vector<32x32xf32>
    %113 = vector.extract_strided_slice %106 {offsets = [2, 0], sizes = [1, 32], strides = [1, 1]} : vector<4x32xf32> to vector<1x32xf32>
    %114 = vector.shape_cast %113 : vector<1x32xf32> to vector<1x32xf32>
    %115 = vector.broadcast %114 : vector<1x32xf32> to vector<32x32xf32>
    %116 = vector.extract_strided_slice %106 {offsets = [3, 0], sizes = [1, 32], strides = [1, 1]} : vector<4x32xf32> to vector<1x32xf32>
    %117 = vector.shape_cast %116 : vector<1x32xf32> to vector<1x32xf32>
    %118 = vector.broadcast %117 : vector<1x32xf32> to vector<32x32xf32>
    %119 = tpu.concatenate %109, %112, %115, %118 in 1 : vector<32x32xf32>, vector<32x32xf32>, vector<32x32xf32>, vector<32x32xf32> -> vector<32x128xf32>
    %120 = arith.addf %105, %119 : vector<32x128xf32>
    %cst_39 = arith.constant 0.000000e+00 : f32
    %121 = vector.broadcast %cst_39 : f32 to vector<32x128xf32>
    %122 = arith.cmpf ogt, %120, %121 : vector<32x128xf32>
    %cst_40 = arith.constant 2.000000e-01 : f32
    %123 = vector.broadcast %cst_40 : f32 to vector<32x128xf32>
    %124 = arith.mulf %123, %120 : vector<32x128xf32>
    %125 = arith.select %122, %120, %124 : vector<32x128xi1>, vector<32x128xf32>
    %126 = arith.addf %125, %2 : vector<32x128xf32>
    %127 = vector.extract_strided_slice %126 {offsets = [0, 0], sizes = [32, 32], strides = [1, 1]} : vector<32x128xf32> to vector<32x32xf32>
    %cst_41 = arith.constant dense<0xFF800000> : vector<32xf32>
    %128 = vector.multi_reduction <maximumf>, %127, %cst_41 [1] : vector<32x32xf32> to vector<32xf32>
    %129 = vector.shape_cast %128 : vector<32xf32> to vector<32x1xf32>
    %130 = vector.shape_cast %129 : vector<32x1xf32> to vector<32x1xf32>
    %131 = vector.broadcast %130 : vector<32x1xf32> to vector<32x32xf32>
    %132 = vector.extract_strided_slice %126 {offsets = [0, 32], sizes = [32, 32], strides = [1, 1]} : vector<32x128xf32> to vector<32x32xf32>
    %cst_42 = arith.constant dense<0xFF800000> : vector<32xf32>
    %133 = vector.multi_reduction <maximumf>, %132, %cst_42 [1] : vector<32x32xf32> to vector<32xf32>
    %134 = vector.shape_cast %133 : vector<32xf32> to vector<32x1xf32>
    %135 = vector.shape_cast %134 : vector<32x1xf32> to vector<32x1xf32>
    %136 = vector.broadcast %135 : vector<32x1xf32> to vector<32x32xf32>
    %137 = vector.extract_strided_slice %126 {offsets = [0, 64], sizes = [32, 32], strides = [1, 1]} : vector<32x128xf32> to vector<32x32xf32>
    %cst_43 = arith.constant dense<0xFF800000> : vector<32xf32>
    %138 = vector.multi_reduction <maximumf>, %137, %cst_43 [1] : vector<32x32xf32> to vector<32xf32>
    %139 = vector.shape_cast %138 : vector<32xf32> to vector<32x1xf32>
    %140 = vector.shape_cast %139 : vector<32x1xf32> to vector<32x1xf32>
    %141 = vector.broadcast %140 : vector<32x1xf32> to vector<32x32xf32>
    %142 = vector.extract_strided_slice %126 {offsets = [0, 96], sizes = [32, 32], strides = [1, 1]} : vector<32x128xf32> to vector<32x32xf32>
    %cst_44 = arith.constant dense<0xFF800000> : vector<32xf32>
    %143 = vector.multi_reduction <maximumf>, %142, %cst_44 [1] : vector<32x32xf32> to vector<32xf32>
    %144 = vector.shape_cast %143 : vector<32xf32> to vector<32x1xf32>
    %145 = vector.shape_cast %144 : vector<32x1xf32> to vector<32x1xf32>
    %146 = vector.broadcast %145 : vector<32x1xf32> to vector<32x32xf32>
    %147 = tpu.concatenate %131, %136, %141, %146 in 1 : vector<32x32xf32>, vector<32x32xf32>, vector<32x32xf32>, vector<32x32xf32> -> vector<32x128xf32>
    %148 = arith.subf %126, %147 : vector<32x128xf32>
    %149 = math.exp %148 : vector<32x128xf32>
    %150 = vector.extract_strided_slice %149 {offsets = [0, 0], sizes = [32, 32], strides = [1, 1]} : vector<32x128xf32> to vector<32x32xf32>
    %cst_45 = arith.constant dense<0.000000e+00> : vector<32xf32>
    %151 = vector.multi_reduction <add>, %150, %cst_45 [1] : vector<32x32xf32> to vector<32xf32>
    %152 = vector.shape_cast %151 : vector<32xf32> to vector<32x1xf32>
    %cst_46 = arith.constant 1.000000e+00 : f32
    %153 = vector.broadcast %cst_46 : f32 to vector<32x1xf32>
    %154 = arith.divf %153, %152 : vector<32x1xf32>
    %155 = vector.shape_cast %154 : vector<32x1xf32> to vector<32x1xf32>
    %156 = vector.broadcast %155 : vector<32x1xf32> to vector<32x32xf32>
    %157 = vector.extract_strided_slice %149 {offsets = [0, 32], sizes = [32, 32], strides = [1, 1]} : vector<32x128xf32> to vector<32x32xf32>
    %cst_47 = arith.constant dense<0.000000e+00> : vector<32xf32>
    %158 = vector.multi_reduction <add>, %157, %cst_47 [1] : vector<32x32xf32> to vector<32xf32>
    %159 = vector.shape_cast %158 : vector<32xf32> to vector<32x1xf32>
    %cst_48 = arith.constant 1.000000e+00 : f32
    %160 = vector.broadcast %cst_48 : f32 to vector<32x1xf32>
    %161 = arith.divf %160, %159 : vector<32x1xf32>
    %162 = vector.shape_cast %161 : vector<32x1xf32> to vector<32x1xf32>
    %163 = vector.broadcast %162 : vector<32x1xf32> to vector<32x32xf32>
    %164 = vector.extract_strided_slice %149 {offsets = [0, 64], sizes = [32, 32], strides = [1, 1]} : vector<32x128xf32> to vector<32x32xf32>
    %cst_49 = arith.constant dense<0.000000e+00> : vector<32xf32>
    %165 = vector.multi_reduction <add>, %164, %cst_49 [1] : vector<32x32xf32> to vector<32xf32>
    %166 = vector.shape_cast %165 : vector<32xf32> to vector<32x1xf32>
    %cst_50 = arith.constant 1.000000e+00 : f32
    %167 = vector.broadcast %cst_50 : f32 to vector<32x1xf32>
    %168 = arith.divf %167, %166 : vector<32x1xf32>
    %169 = vector.shape_cast %168 : vector<32x1xf32> to vector<32x1xf32>
    %170 = vector.broadcast %169 : vector<32x1xf32> to vector<32x32xf32>
    %171 = vector.extract_strided_slice %149 {offsets = [0, 96], sizes = [32, 32], strides = [1, 1]} : vector<32x128xf32> to vector<32x32xf32>
    %cst_51 = arith.constant dense<0.000000e+00> : vector<32xf32>
    %172 = vector.multi_reduction <add>, %171, %cst_51 [1] : vector<32x32xf32> to vector<32xf32>
    %173 = vector.shape_cast %172 : vector<32xf32> to vector<32x1xf32>
    %cst_52 = arith.constant 1.000000e+00 : f32
    %174 = vector.broadcast %cst_52 : f32 to vector<32x1xf32>
    %175 = arith.divf %174, %173 : vector<32x1xf32>
    %176 = vector.shape_cast %175 : vector<32x1xf32> to vector<32x1xf32>
    %177 = vector.broadcast %176 : vector<32x1xf32> to vector<32x32xf32>
    %178 = tpu.concatenate %156, %163, %170, %177 in 1 : vector<32x32xf32>, vector<32x32xf32>, vector<32x32xf32>, vector<32x32xf32> -> vector<32x128xf32>
    %179 = arith.mulf %149, %178 : vector<32x128xf32>
    %180 = tpu.concatenate %104, %104, %104, %104 in 0 : vector<32x128xf32>, vector<32x128xf32>, vector<32x128xf32>, vector<32x128xf32> -> vector<128x128xf32>
    %181 = arith.mulf %180, %103 : vector<128x128xf32>
    %cst_53 = arith.constant dense<0.000000e+00> : vector<32x128xf32>
    %182 = tpu.matmul %179, %181, %cst_53 {dimension_numbers = #tpu.dot_dimension_numbers<[1], [0], [0], [1], [0, 0, 1, 1], [], []>} : vector<32x128xf32>, vector<128x128xf32>, vector<32x128xf32> -> vector<32x128xf32>
    %c160 = arith.constant 160 : index
    %c0_54 = arith.constant 0 : index
    %183 = vector.load %arg2[%c160, %c0_54] : memref<1264x256xf32, #tpu.memory_space<vmem>>, vector<128x128xf32>
    %cst_55 = arith.constant dense<0.000000e+00> : vector<32x128xf32>
    %184 = tpu.matmul %99, %183, %cst_55 {dimension_numbers = #tpu.dot_dimension_numbers<[1], [0], [0], [1], [0, 0, 1, 1], [], []>} : vector<32x128xf32>, vector<128x128xf32>, vector<32x128xf32> -> vector<32x128xf32>
    %185 = arith.addf %182, %184 : vector<32x128xf32>
    %c1248 = arith.constant 1248 : index
    %c0_56 = arith.constant 0 : index
    %186 = vector.load %arg2[%c1248, %c0_56] : memref<1264x256xf32, #tpu.memory_space<vmem>>, vector<1x128xf32>
    %187 = vector.broadcast %186 : vector<1x128xf32> to vector<32x128xf32>
    %188 = arith.addf %185, %187 : vector<32x128xf32>
    %cst_57 = arith.constant 0.000000e+00 : f32
    %189 = vector.broadcast %cst_57 : f32 to vector<32x128xf32>
    %190 = arith.cmpf ogt, %188, %189 : vector<32x128xf32>
    %cst_58 = arith.constant 0.000000e+00 : f32
    %191 = vector.broadcast %cst_58 : f32 to vector<32x128xf32>
    %192 = arith.minimumf %188, %191 : vector<32x128xf32>
    %193 = math.exp %192 : vector<32x128xf32>
    %cst_59 = arith.constant 1.000000e+00 : f32
    %194 = vector.broadcast %cst_59 : f32 to vector<32x128xf32>
    %195 = arith.subf %193, %194 : vector<32x128xf32>
    %196 = arith.select %190, %188, %195 : vector<32x128xi1>, vector<32x128xf32>
    %c288 = arith.constant 288 : index
    %c0_60 = arith.constant 0 : index
    %197 = vector.load %arg2[%c288, %c0_60] : memref<1264x256xf32, #tpu.memory_space<vmem>>, vector<128x48xf32>
    %c800 = arith.constant 800 : index
    %c0_61 = arith.constant 0 : index
    %198 = vector.load %arg2[%c800, %c0_61] : memref<1264x256xf32, #tpu.memory_space<vmem>>, vector<48x192xf32>
    %c864 = arith.constant 864 : index
    %c0_62 = arith.constant 0 : index
    %199 = vector.load %arg2[%c864, %c0_62] : memref<1264x256xf32, #tpu.memory_space<vmem>>, vector<6x48xf32>
    %c1000 = arith.constant 1000 : index
    %c0_63 = arith.constant 0 : index
    %200 = vector.load %arg2[%c1000, %c0_63] : memref<1264x256xf32, #tpu.memory_space<vmem>>, vector<192x48xf32>
    %cst_64 = arith.constant dense<0.000000e+00> : vector<32x48xf32>
    %201 = tpu.matmul %196, %197, %cst_64 {dimension_numbers = #tpu.dot_dimension_numbers<[1], [0], [0], [1], [0, 0, 1, 1], [], []>} : vector<32x128xf32>, vector<128x48xf32>, vector<32x48xf32> -> vector<32x48xf32>
    %cst_65 = arith.constant dense<0.000000e+00> : vector<32x192xf32>
    %202 = tpu.matmul %201, %198, %cst_65 {dimension_numbers = #tpu.dot_dimension_numbers<[1], [0], [0], [1], [0, 0, 1, 1], [], []>} : vector<32x48xf32>, vector<48x192xf32>, vector<32x192xf32> -> vector<32x192xf32>
    %cst_66 = arith.constant dense<0.000000e+00> : vector<6x32xf32>
    %203 = tpu.matmul %199, %201, %cst_66 {dimension_numbers = #tpu.dot_dimension_numbers<[1], [1], [0], [0], [0, 0, 1, 0], [], []>} : vector<6x48xf32>, vector<32x48xf32>, vector<6x32xf32> -> vector<6x32xf32>
    %204 = vector.extract_strided_slice %203 {offsets = [0, 0], sizes = [1, 32], strides = [1, 1]} : vector<6x32xf32> to vector<1x32xf32>
    %205 = vector.shape_cast %204 : vector<1x32xf32> to vector<1x32xf32>
    %206 = vector.broadcast %205 : vector<1x32xf32> to vector<32x32xf32>
    %207 = vector.extract_strided_slice %203 {offsets = [1, 0], sizes = [1, 32], strides = [1, 1]} : vector<6x32xf32> to vector<1x32xf32>
    %208 = vector.shape_cast %207 : vector<1x32xf32> to vector<1x32xf32>
    %209 = vector.broadcast %208 : vector<1x32xf32> to vector<32x32xf32>
    %210 = vector.extract_strided_slice %203 {offsets = [2, 0], sizes = [1, 32], strides = [1, 1]} : vector<6x32xf32> to vector<1x32xf32>
    %211 = vector.shape_cast %210 : vector<1x32xf32> to vector<1x32xf32>
    %212 = vector.broadcast %211 : vector<1x32xf32> to vector<32x32xf32>
    %213 = vector.extract_strided_slice %203 {offsets = [3, 0], sizes = [1, 32], strides = [1, 1]} : vector<6x32xf32> to vector<1x32xf32>
    %214 = vector.shape_cast %213 : vector<1x32xf32> to vector<1x32xf32>
    %215 = vector.broadcast %214 : vector<1x32xf32> to vector<32x32xf32>
    %216 = vector.extract_strided_slice %203 {offsets = [4, 0], sizes = [1, 32], strides = [1, 1]} : vector<6x32xf32> to vector<1x32xf32>
    %217 = vector.shape_cast %216 : vector<1x32xf32> to vector<1x32xf32>
    %218 = vector.broadcast %217 : vector<1x32xf32> to vector<32x32xf32>
    %219 = vector.extract_strided_slice %203 {offsets = [5, 0], sizes = [1, 32], strides = [1, 1]} : vector<6x32xf32> to vector<1x32xf32>
    %220 = vector.shape_cast %219 : vector<1x32xf32> to vector<1x32xf32>
    %221 = vector.broadcast %220 : vector<1x32xf32> to vector<32x32xf32>
    %222 = tpu.concatenate %206, %209, %212, %215, %218, %221 in 1 : vector<32x32xf32>, vector<32x32xf32>, vector<32x32xf32>, vector<32x32xf32>, vector<32x32xf32>, vector<32x32xf32> -> vector<32x192xf32>
    %223 = arith.addf %202, %222 : vector<32x192xf32>
    %cst_67 = arith.constant 0.000000e+00 : f32
    %224 = vector.broadcast %cst_67 : f32 to vector<32x192xf32>
    %225 = arith.cmpf ogt, %223, %224 : vector<32x192xf32>
    %cst_68 = arith.constant 2.000000e-01 : f32
    %226 = vector.broadcast %cst_68 : f32 to vector<32x192xf32>
    %227 = arith.mulf %226, %223 : vector<32x192xf32>
    %228 = arith.select %225, %223, %227 : vector<32x192xi1>, vector<32x192xf32>
    %229 = arith.addf %228, %1 : vector<32x192xf32>
    %230 = vector.extract_strided_slice %229 {offsets = [0, 0], sizes = [32, 32], strides = [1, 1]} : vector<32x192xf32> to vector<32x32xf32>
    %cst_69 = arith.constant dense<0xFF800000> : vector<32xf32>
    %231 = vector.multi_reduction <maximumf>, %230, %cst_69 [1] : vector<32x32xf32> to vector<32xf32>
    %232 = vector.shape_cast %231 : vector<32xf32> to vector<32x1xf32>
    %233 = vector.shape_cast %232 : vector<32x1xf32> to vector<32x1xf32>
    %234 = vector.broadcast %233 : vector<32x1xf32> to vector<32x32xf32>
    %235 = vector.extract_strided_slice %229 {offsets = [0, 32], sizes = [32, 32], strides = [1, 1]} : vector<32x192xf32> to vector<32x32xf32>
    %cst_70 = arith.constant dense<0xFF800000> : vector<32xf32>
    %236 = vector.multi_reduction <maximumf>, %235, %cst_70 [1] : vector<32x32xf32> to vector<32xf32>
    %237 = vector.shape_cast %236 : vector<32xf32> to vector<32x1xf32>
    %238 = vector.shape_cast %237 : vector<32x1xf32> to vector<32x1xf32>
    %239 = vector.broadcast %238 : vector<32x1xf32> to vector<32x32xf32>
    %240 = vector.extract_strided_slice %229 {offsets = [0, 64], sizes = [32, 32], strides = [1, 1]} : vector<32x192xf32> to vector<32x32xf32>
    %cst_71 = arith.constant dense<0xFF800000> : vector<32xf32>
    %241 = vector.multi_reduction <maximumf>, %240, %cst_71 [1] : vector<32x32xf32> to vector<32xf32>
    %242 = vector.shape_cast %241 : vector<32xf32> to vector<32x1xf32>
    %243 = vector.shape_cast %242 : vector<32x1xf32> to vector<32x1xf32>
    %244 = vector.broadcast %243 : vector<32x1xf32> to vector<32x32xf32>
    %245 = vector.extract_strided_slice %229 {offsets = [0, 96], sizes = [32, 32], strides = [1, 1]} : vector<32x192xf32> to vector<32x32xf32>
    %cst_72 = arith.constant dense<0xFF800000> : vector<32xf32>
    %246 = vector.multi_reduction <maximumf>, %245, %cst_72 [1] : vector<32x32xf32> to vector<32xf32>
    %247 = vector.shape_cast %246 : vector<32xf32> to vector<32x1xf32>
    %248 = vector.shape_cast %247 : vector<32x1xf32> to vector<32x1xf32>
    %249 = vector.broadcast %248 : vector<32x1xf32> to vector<32x32xf32>
    %250 = vector.extract_strided_slice %229 {offsets = [0, 128], sizes = [32, 32], strides = [1, 1]} : vector<32x192xf32> to vector<32x32xf32>
    %cst_73 = arith.constant dense<0xFF800000> : vector<32xf32>
    %251 = vector.multi_reduction <maximumf>, %250, %cst_73 [1] : vector<32x32xf32> to vector<32xf32>
    %252 = vector.shape_cast %251 : vector<32xf32> to vector<32x1xf32>
    %253 = vector.shape_cast %252 : vector<32x1xf32> to vector<32x1xf32>
    %254 = vector.broadcast %253 : vector<32x1xf32> to vector<32x32xf32>
    %255 = vector.extract_strided_slice %229 {offsets = [0, 160], sizes = [32, 32], strides = [1, 1]} : vector<32x192xf32> to vector<32x32xf32>
    %cst_74 = arith.constant dense<0xFF800000> : vector<32xf32>
    %256 = vector.multi_reduction <maximumf>, %255, %cst_74 [1] : vector<32x32xf32> to vector<32xf32>
    %257 = vector.shape_cast %256 : vector<32xf32> to vector<32x1xf32>
    %258 = vector.shape_cast %257 : vector<32x1xf32> to vector<32x1xf32>
    %259 = vector.broadcast %258 : vector<32x1xf32> to vector<32x32xf32>
    %260 = tpu.concatenate %234, %239, %244, %249, %254, %259 in 1 : vector<32x32xf32>, vector<32x32xf32>, vector<32x32xf32>, vector<32x32xf32>, vector<32x32xf32>, vector<32x32xf32> -> vector<32x192xf32>
    %261 = arith.subf %229, %260 : vector<32x192xf32>
    %262 = math.exp %261 : vector<32x192xf32>
    %263 = vector.extract_strided_slice %262 {offsets = [0, 0], sizes = [32, 32], strides = [1, 1]} : vector<32x192xf32> to vector<32x32xf32>
    %cst_75 = arith.constant dense<0.000000e+00> : vector<32xf32>
    %264 = vector.multi_reduction <add>, %263, %cst_75 [1] : vector<32x32xf32> to vector<32xf32>
    %265 = vector.shape_cast %264 : vector<32xf32> to vector<32x1xf32>
    %cst_76 = arith.constant 1.000000e+00 : f32
    %266 = vector.broadcast %cst_76 : f32 to vector<32x1xf32>
    %267 = arith.divf %266, %265 : vector<32x1xf32>
    %268 = vector.shape_cast %267 : vector<32x1xf32> to vector<32x1xf32>
    %269 = vector.broadcast %268 : vector<32x1xf32> to vector<32x32xf32>
    %270 = vector.extract_strided_slice %262 {offsets = [0, 32], sizes = [32, 32], strides = [1, 1]} : vector<32x192xf32> to vector<32x32xf32>
    %cst_77 = arith.constant dense<0.000000e+00> : vector<32xf32>
    %271 = vector.multi_reduction <add>, %270, %cst_77 [1] : vector<32x32xf32> to vector<32xf32>
    %272 = vector.shape_cast %271 : vector<32xf32> to vector<32x1xf32>
    %cst_78 = arith.constant 1.000000e+00 : f32
    %273 = vector.broadcast %cst_78 : f32 to vector<32x1xf32>
    %274 = arith.divf %273, %272 : vector<32x1xf32>
    %275 = vector.shape_cast %274 : vector<32x1xf32> to vector<32x1xf32>
    %276 = vector.broadcast %275 : vector<32x1xf32> to vector<32x32xf32>
    %277 = vector.extract_strided_slice %262 {offsets = [0, 64], sizes = [32, 32], strides = [1, 1]} : vector<32x192xf32> to vector<32x32xf32>
    %cst_79 = arith.constant dense<0.000000e+00> : vector<32xf32>
    %278 = vector.multi_reduction <add>, %277, %cst_79 [1] : vector<32x32xf32> to vector<32xf32>
    %279 = vector.shape_cast %278 : vector<32xf32> to vector<32x1xf32>
    %cst_80 = arith.constant 1.000000e+00 : f32
    %280 = vector.broadcast %cst_80 : f32 to vector<32x1xf32>
    %281 = arith.divf %280, %279 : vector<32x1xf32>
    %282 = vector.shape_cast %281 : vector<32x1xf32> to vector<32x1xf32>
    %283 = vector.broadcast %282 : vector<32x1xf32> to vector<32x32xf32>
    %284 = vector.extract_strided_slice %262 {offsets = [0, 96], sizes = [32, 32], strides = [1, 1]} : vector<32x192xf32> to vector<32x32xf32>
    %cst_81 = arith.constant dense<0.000000e+00> : vector<32xf32>
    %285 = vector.multi_reduction <add>, %284, %cst_81 [1] : vector<32x32xf32> to vector<32xf32>
    %286 = vector.shape_cast %285 : vector<32xf32> to vector<32x1xf32>
    %cst_82 = arith.constant 1.000000e+00 : f32
    %287 = vector.broadcast %cst_82 : f32 to vector<32x1xf32>
    %288 = arith.divf %287, %286 : vector<32x1xf32>
    %289 = vector.shape_cast %288 : vector<32x1xf32> to vector<32x1xf32>
    %290 = vector.broadcast %289 : vector<32x1xf32> to vector<32x32xf32>
    %291 = vector.extract_strided_slice %262 {offsets = [0, 128], sizes = [32, 32], strides = [1, 1]} : vector<32x192xf32> to vector<32x32xf32>
    %cst_83 = arith.constant dense<0.000000e+00> : vector<32xf32>
    %292 = vector.multi_reduction <add>, %291, %cst_83 [1] : vector<32x32xf32> to vector<32xf32>
    %293 = vector.shape_cast %292 : vector<32xf32> to vector<32x1xf32>
    %cst_84 = arith.constant 1.000000e+00 : f32
    %294 = vector.broadcast %cst_84 : f32 to vector<32x1xf32>
    %295 = arith.divf %294, %293 : vector<32x1xf32>
    %296 = vector.shape_cast %295 : vector<32x1xf32> to vector<32x1xf32>
    %297 = vector.broadcast %296 : vector<32x1xf32> to vector<32x32xf32>
    %298 = vector.extract_strided_slice %262 {offsets = [0, 160], sizes = [32, 32], strides = [1, 1]} : vector<32x192xf32> to vector<32x32xf32>
    %cst_85 = arith.constant dense<0.000000e+00> : vector<32xf32>
    %299 = vector.multi_reduction <add>, %298, %cst_85 [1] : vector<32x32xf32> to vector<32xf32>
    %300 = vector.shape_cast %299 : vector<32xf32> to vector<32x1xf32>
    %cst_86 = arith.constant 1.000000e+00 : f32
    %301 = vector.broadcast %cst_86 : f32 to vector<32x1xf32>
    %302 = arith.divf %301, %300 : vector<32x1xf32>
    %303 = vector.shape_cast %302 : vector<32x1xf32> to vector<32x1xf32>
    %304 = vector.broadcast %303 : vector<32x1xf32> to vector<32x32xf32>
    %305 = tpu.concatenate %269, %276, %283, %290, %297, %304 in 1 : vector<32x32xf32>, vector<32x32xf32>, vector<32x32xf32>, vector<32x32xf32>, vector<32x32xf32>, vector<32x32xf32> -> vector<32x192xf32>
    %306 = arith.mulf %262, %305 : vector<32x192xf32>
    %307 = tpu.concatenate %201, %201, %201, %201, %201, %201 in 0 : vector<32x48xf32>, vector<32x48xf32>, vector<32x48xf32>, vector<32x48xf32>, vector<32x48xf32>, vector<32x48xf32> -> vector<192x48xf32>
    %308 = arith.mulf %307, %200 : vector<192x48xf32>
    %cst_87 = arith.constant dense<0.000000e+00> : vector<32x48xf32>
    %309 = tpu.matmul %306, %308, %cst_87 {dimension_numbers = #tpu.dot_dimension_numbers<[1], [0], [0], [1], [0, 0, 1, 1], [], []>} : vector<32x192xf32>, vector<192x48xf32>, vector<32x48xf32> -> vector<32x48xf32>
    %c1192 = arith.constant 1192 : index
    %c0_88 = arith.constant 0 : index
    %310 = vector.load %arg2[%c1192, %c0_88] : memref<1264x256xf32, #tpu.memory_space<vmem>>, vector<48x128xf32>
    %cst_89 = arith.constant dense<0.000000e+00> : vector<32x128xf32>
    %311 = tpu.matmul %309, %310, %cst_89 {dimension_numbers = #tpu.dot_dimension_numbers<[1], [0], [0], [1], [0, 0, 1, 1], [], []>} : vector<32x48xf32>, vector<48x128xf32>, vector<32x128xf32> -> vector<32x128xf32>
    %c416 = arith.constant 416 : index
    %c0_90 = arith.constant 0 : index
    %312 = vector.load %arg2[%c416, %c0_90] : memref<1264x256xf32, #tpu.memory_space<vmem>>, vector<128x128xf32>
    %cst_91 = arith.constant dense<0.000000e+00> : vector<32x128xf32>
    %313 = tpu.matmul %196, %312, %cst_91 {dimension_numbers = #tpu.dot_dimension_numbers<[1], [0], [0], [1], [0, 0, 1, 1], [], []>} : vector<32x128xf32>, vector<128x128xf32>, vector<32x128xf32> -> vector<32x128xf32>
    %314 = arith.addf %311, %313 : vector<32x128xf32>
    %c1256 = arith.constant 1256 : index
    %c0_92 = arith.constant 0 : index
    %315 = vector.load %arg2[%c1256, %c0_92] : memref<1264x256xf32, #tpu.memory_space<vmem>>, vector<1x128xf32>
    %316 = vector.broadcast %315 : vector<1x128xf32> to vector<32x128xf32>
    %317 = arith.addf %314, %316 : vector<32x128xf32>
    %c0_93 = arith.constant 0 : index
    %c0_94 = arith.constant 0 : index
    %318 = vector.load %arg3[%c0_93, %c0_94] : memref<32x128xf32, #tpu.memory_space<vmem>>, vector<32x128xf32>
    tpu.vector_store %arg3[%c0_93, %c0_94], %317 {strides = array<i32>} : memref<32x128xf32, #tpu.memory_space<vmem>>, vector<32x128xf32>,
    return
  }
}

</mosaic_0001>

<bundles_post_ra>
// kernel: tile.9
= control target key start
LH: loop header
LB: loop body
LE: loop exit
PB: predicated region body
PF: predicated region fallthrough
CT: control target
= control target key end

     0   :  { %vm92_vm0 = vcmask 1047556   ;;  %s347_s14 = smov 96   ;;  %vm3_vm1 = vcmask 261120   ;;  %s348_s20 = smov 64   ;;  %vm96_vm2 = vcmask 1048320   ;;  %vm139_vm3 = vcmask 785920   ;;  %s688_s0 = inlined_call_operand.vmem [shape: f32[32,6,32], index: 0, kind: input, shape index: {}]   ;;  %s689_s1 = inlined_call_operand.vmem [shape: f32[32,192], index: 1, kind: output, shape index: {}]  }
   0x1   :  { %v304_v0 = vld [vmem:[%s688_s0 + $0x43] ss:$8 sm:$0xf]   ;;  %v312_v12 = vld [vmem:[%s688_s0 + $0x82] ss:$8 sm:$0xf]  }
   0x2   :  { %v305_v1 = vld [vmem:[%s688_s0 + $0x43] ss:$8 sm:$0xf0]   ;;  %v313_v13 = vld [vmem:[%s688_s0 + $0x82] ss:$8 sm:$0xf0]  }
   0x3   :  { %v114_v2 = vsel %vm92_vm0, %v305_v1, %v304_v0  ;;  %v299_v3 = vld [vmem:[%s688_s0 + $0x3] ss:$8 sm:$0xf]   ;;  %v310_v14 = vld [vmem:[%s688_s0 + $0x2] ss:$8 sm:$0xf]   ;;  %v146_v16 = vsel %vm92_vm0, %v313_v13, %v312_v12 }
   0x4   :  { %v300_v4 = vld [vmem:[%s688_s0 + $0x3] ss:$8 sm:$0xf0]   ;;  %115 = vrot.lane.b32.xlu1 %v114_v2, %s347_s14  ;;  %v311_v15 = vld [vmem:[%s688_s0 + $0x2] ss:$8 sm:$0xf0]  }
   0x5   :  { %v93_v5 = vsel %vm92_vm0, %v300_v4, %v299_v3  ;;  %v307_v6 = vld [vmem:[%s688_s0 + $0xc3] ss:$8 sm:$0xf]   ;;  %v318_v17 = vld [vmem:[%s688_s0 + $0xc2] ss:$8 sm:$0xf]   ;;  %v136_v18 = vsel %vm92_vm0, %v311_v15, %v310_v14 }
   0x6   :  { %v308_v7 = vld [vmem:[%s688_s0 + $0xc3] ss:$8 sm:$0xf0]   ;;  %94 = vrot.lane.b32.xlu0 %v93_v5, %s347_s14  ;;  %v319_v19 = vld [vmem:[%s688_s0 + $0xc2] ss:$8 sm:$0xf0]  }
   0x7   :  { %v125_v8 = vsel %vm92_vm0, %v308_v7, %v307_v6  ;;  %v301_v9 = vld [vmem:[%s688_s0 + $0x83] ss:$8 sm:$0xf]   ;;  %v279_v20 = vld [vmem:[%s688_s0 + $0x80] ss:$4 sm:$0xff]   ;;  %v168_v23 = vsel %vm92_vm0, %v319_v19, %v318_v17  ;;  %s349_s24 = smov 32  }
   0x8   :  { %v302_v10 = vld [vmem:[%s688_s0 + $0x83] ss:$8 sm:$0xf0]   ;;  %126 = vrot.lane.b32.xlu1 %v125_v8, %s347_s14  ;;  %v315_v21 = vld [vmem:[%s688_s0 + $0x42] ss:$8 sm:$0xf]  }
   0x9   :  { %v103_v11 = vsel %vm92_vm0, %v302_v10, %v301_v9  ;;  %v316_v22 = vld [vmem:[%s688_s0 + $0x42] ss:$8 sm:$0xf0]   ;;  %280 = vst.msk [vmem:[%s689_s1 + $0x20] ss:$8 sm:$0x3] %vm3_vm1, %v279_v20  }
   0xa   :  { %104 = vrot.lane.b32.xlu0 %v103_v11, %s347_s14  ;;  %281 = vst.msk [vmem:[%s689_s1 + $0x11] ss:$8 sm:$0xc] %vm3_vm1, %v279_v20   ;;  %282 = vst.msk [vmem:[%s689_s1 + $0x2] ss:$8 sm:$0x30] %vm3_vm1, %v279_v20   ;;  %v157_v24 = vsel %vm92_vm0, %v316_v22, %v315_v21 }
   0xb   :  { %283 = vst.msk [vmem:[%s689_s1 - $0xd] ss:$8 sm:$0xc0] %vm3_vm1, %v279_v20   ;;  %v323_v25 = vld [vmem:[%s688_s0 + $0x81] ss:$8 sm:$0xf]  }
   0xc   :  { %147 = vrot.lane.b32.xlu1 %v146_v16, %s348_s20  ;;  %v324_v26 = vld [vmem:[%s688_s0 + $0x81] ss:$8 sm:$0xf0]   ;;  %v329_v29 = vld [vmem:[%s688_s0 + $0x85] ss:$8 sm:$0xf]  }
   0xd   :  { %v321_v27 = vld [vmem:[%s688_s0 + $0x1] ss:$8 sm:$0xf]   ;;  %v189_v30 = vsel %vm92_vm0, %v324_v26, %v323_v25  ;;  %v330_v31 = vld [vmem:[%s688_s0 + $0x85] ss:$8 sm:$0xf0]  }
   0xe   :  { %137 = vrot.lane.b32.xlu0 %v136_v18, %s348_s20  ;;  %v322_v28 = vld [vmem:[%s688_s0 + $0x1] ss:$8 sm:$0xf0]   ;;  %v326_v32 = vld [vmem:[%s688_s0 + $0x5] ss:$8 sm:$0xf]   ;;  %v211_v42 = vsel %vm92_vm0, %v330_v31, %v329_v29 }
   0xf   :  { %v179_v33 = vsel %vm92_vm0, %v322_v28, %v321_v27  ;;  %v327_v34 = vld [vmem:[%s688_s0 + $0x5] ss:$8 sm:$0xf0]   ;;  %v284_v35 = vld [vmem:[%s688_s0 + $0xa0] ss:$4 sm:$0xff]   ;;  %vm182_vm4 = vcmask 523520  }
  0x10   :  { %169 = vrot.lane.b32.xlu1 %v168_v23, %s348_s20  ;;  %285 = vst.msk [vmem:[%s689_s1 + $0x24] ss:$8 sm:$0x3] %vm3_vm1, %v284_v35   ;;  %286 = vst.msk [vmem:[%s689_s1 + $0x15] ss:$8 sm:$0xc] %vm3_vm1, %v284_v35   ;;  %v200_v43 = vsel %vm92_vm0, %v327_v34, %v326_v32 }
  0x11   :  { %287 = vst.msk [vmem:[%s689_s1 + $0x6] ss:$8 sm:$0x30] %vm3_vm1, %v284_v35   ;;  %288 = vst.msk [vmem:[%s689_s1 - $0x9] ss:$8 sm:$0xc0] %vm3_vm1, %v284_v35  }
  0x12   :  { %158 = vrot.lane.b32.xlu0 %v157_v24, %s348_s20  ;;  %v2_v36 = vld [vmem:[%s688_s0] ss:$4 sm:$0xff]   ;;  %v335_v44 = vld [vmem:[%s688_s0 + $0xc1] ss:$8 sm:$0xf]  }
  0x13   :  { %v264_v37 = vld [vmem:[%s688_s0 + $0x20] ss:$4 sm:$0xff]   ;;  %4 = vst.msk [vmem:[%s689_s1] ss:$8 sm:$0x3] %vm3_vm1, %v2_v36  }
  0x14   :  { %v289_v38 = vld [vmem:[%s688_s0 + $0xc0] ss:$4 sm:$0xff]   ;;  %190 = vrot.lane.b32.xlu1 %v189_v30, %s349_s24  ;;  %261 = vst.msk [vmem:[%s689_s1 - $0xf] ss:$8 sm:$0xc] %vm3_vm1, %v2_v36  }
  0x15   :  { %262 = vst.msk [vmem:[%s689_s1 - $0x1e] ss:$8 sm:$0x30] %vm3_vm1, %v2_v36   ;;  %263 = vst.msk [vmem:[%s689_s1 - $0x2d] ss:$8 sm:$0xc0] %vm3_vm1, %v2_v36  }
  0x16   :  { %265 = vst.msk [vmem:[%s689_s1 + $0x4] ss:$8 sm:$0x3] %vm3_vm1, %v264_v37   ;;  %266 = vst.msk [vmem:[%s689_s1 - $0xb] ss:$8 sm:$0xc] %vm3_vm1, %v264_v37   ;;  %180 = vrot.lane.b32.xlu0 %v179_v33, %s349_s24 }
  0x17   :  { %267 = vst.msk [vmem:[%s689_s1 - $0x1a] ss:$8 sm:$0x30] %vm3_vm1, %v264_v37   ;;  %268 = vst.msk [vmem:[%s689_s1 - $0x29] ss:$8 sm:$0xc0] %vm3_vm1, %v264_v37  }
  0x18   :  { %290 = vst.msk [vmem:[%s689_s1 + $0x30] ss:$8 sm:$0x3] %vm3_vm1, %v289_v38   ;;  %291 = vst.msk [vmem:[%s689_s1 + $0x21] ss:$8 sm:$0xc] %vm3_vm1, %v289_v38   ;;  %212 = vrot.lane.b32.xlu1 %v211_v42, %s349_s24 }
  0x19   :  { %292 = vst.msk [vmem:[%s689_s1 + $0x12] ss:$8 sm:$0x30] %vm3_vm1, %v289_v38   ;;  %293 = vst.msk [vmem:[%s689_s1 + $0x3] ss:$8 sm:$0xc0] %vm3_vm1, %v289_v38  }
  0x1a   :  { %v294_v39 = vld [vmem:[%s688_s0 + $0xe0] ss:$4 sm:$0xff]   ;;  %v336_v45 = vld [vmem:[%s688_s0 + $0xc1] ss:$8 sm:$0xf0]   ;;  %201 = vrot.lane.b32.xlu0 %v200_v43, %s349_s24 }
  0x1b   :  { %v269_v40 = vld [vmem:[%s688_s0 + $0x40] ss:$4 sm:$0xff]   ;;  %295 = vst.msk [vmem:[%s689_s1 + $0x34] ss:$8 sm:$0x3] %vm3_vm1, %v294_v39   ;;  %v233_v48 = vsel %vm92_vm0, %v336_v45, %v335_v44 }
  0x1c   :  { %v274_v41 = vld [vmem:[%s688_s0 + $0x60] ss:$4 sm:$0xff]   ;;  %296 = vst.msk [vmem:[%s689_s1 + $0x25] ss:$8 sm:$0xc] %vm3_vm1, %v294_v39   ;;  %234 = vrot.lane.b32.xlu1 %v233_v48, %s349_s24 }
  0x1d   :  { %297 = vst.msk [vmem:[%s689_s1 + $0x16] ss:$8 sm:$0x30] %vm3_vm1, %v294_v39   ;;  %298 = vst.msk [vmem:[%s689_s1 + $0x7] ss:$8 sm:$0xc0] %vm3_vm1, %v294_v39  }
  0x1e   :  { %270 = vst.msk [vmem:[%s689_s1 + $0x10] ss:$8 sm:$0x3] %vm3_vm1, %v269_v40   ;;  %271 = vst.msk [vmem:[%s689_s1 + $0x1] ss:$8 sm:$0xc] %vm3_vm1, %v269_v40  }
  0x1f   :  { %272 = vst.msk [vmem:[%s689_s1 - $0xe] ss:$8 sm:$0x30] %vm3_vm1, %v269_v40   ;;  %273 = vst.msk [vmem:[%s689_s1 - $0x1d] ss:$8 sm:$0xc0] %vm3_vm1, %v269_v40  }
  0x20   :  { %275 = vst.msk [vmem:[%s689_s1 + $0x14] ss:$8 sm:$0x3] %vm3_vm1, %v274_v41   ;;  %276 = vst.msk [vmem:[%s689_s1 + $0x5] ss:$8 sm:$0xc] %vm3_vm1, %v274_v41  }
  0x21   :  { %277 = vst.msk [vmem:[%s689_s1 - $0xa] ss:$8 sm:$0x30] %vm3_vm1, %v274_v41   ;;  %278 = vst.msk [vmem:[%s689_s1 - $0x19] ss:$8 sm:$0xc0] %vm3_vm1, %v274_v41  }
  0x22   :  { %v332_v46 = vld [vmem:[%s688_s0 + $0x41] ss:$8 sm:$0xf]   ;;  %v341_v50 = vld [vmem:[%s688_s0 + $0xc5] ss:$8 sm:$0xf]  }
  0x23   :  { %v333_v47 = vld [vmem:[%s688_s0 + $0x41] ss:$8 sm:$0xf0]   ;;  %v342_v51 = vld [vmem:[%s688_s0 + $0xc5] ss:$8 sm:$0xf0]  }
  0x24   :  { %v222_v49 = vsel %vm92_vm0, %v333_v47, %v332_v46  ;;  %v338_v52 = vld [vmem:[%s688_s0 + $0x45] ss:$8 sm:$0xf]   ;;  %v255_v54 = vsel %vm92_vm0, %v342_v51, %v341_v50 }
  0x25   :  { %v339_v53 = vld [vmem:[%s688_s0 + $0x45] ss:$8 sm:$0xf0]   ;;  %223 = vrot.lane.b32.xlu0 %v222_v49, %s349_s24  ;;  %256 = vrot.lane.b32.xlu1 %v255_v54, %s349_s24 }
  0x26   :  { %v244_v55 = vsel %vm92_vm0, %v339_v53, %v338_v52 }
  0x29   :  { %245 = vrot.lane.b32.xlu0 %v244_v55, %s349_s24 }
  0x76   :  { %v116_v56 = vpop.permute.xlu1 %115  }
  0x77   :  { %306 = vst.msk [vmem:[%s689_s1 + $0x10] sm:$0xff] %vm96_vm2, %v116_v56  }
  0x78   :  { %v95_v57 = vpop.permute.xlu0 %94  }
  0x79   :  { %97 = vst.msk [vmem:[%s689_s1] sm:$0xff] %vm96_vm2, %v95_v57  }
  0x7a   :  { %v127_v58 = vpop.permute.xlu1 %126  }
  0x7b   :  { %309 = vst.msk [vmem:[%s689_s1 + $0x30] sm:$0xff] %vm96_vm2, %v127_v58  }
  0x7c   :  { %v105_v59 = vpop.permute.xlu0 %104  }
  0x7d   :  { %303 = vst.msk [vmem:[%s689_s1 + $0x20] sm:$0xff] %vm96_vm2, %v105_v59  }
  0x7e   :  { %v148_v60 = vpop.permute.xlu1 %147  }
  0x7f   :  { %314 = vst.msk [vmem:[%s689_s1 + $0x20] sm:$0xff] %vm139_vm3, %v148_v60  }
  0x80   :  { %v138_v61 = vpop.permute.xlu0 %137  }
  0x81   :  { %140 = vst.msk [vmem:[%s689_s1] sm:$0xff] %vm139_vm3, %v138_v61  }
  0x82   :  { %v170_v62 = vpop.permute.xlu1 %169  }
  0x83   :  { %320 = vst.msk [vmem:[%s689_s1 + $0x30] sm:$0xff] %vm139_vm3, %v170_v62  }
  0x84   :  { %v159_v63 = vpop.permute.xlu0 %158  }
  0x85   :  { %317 = vst.msk [vmem:[%s689_s1 + $0x10] sm:$0xff] %vm139_vm3, %v159_v63  }
  0x86   :  { %v191_v0 = vpop.permute.xlu1 %190  }
  0x87   :  { %325 = vst.msk [vmem:[%s689_s1 + $0x20] sm:$0xff] %vm182_vm4, %v191_v0  }
  0x88   :  { %v181_v1 = vpop.permute.xlu0 %180  }
  0x89   :  { %183 = vst.msk [vmem:[%s689_s1] sm:$0xff] %vm182_vm4, %v181_v1  }
  0x8a   :  { %v213_v2 = vpop.permute.xlu1 %212  }
  0x8b   :  { %331 = vst.msk [vmem:[%s689_s1 + $0x28] sm:$0xff] %vm182_vm4, %v213_v2  }
  0x8c   :  { %v202_v3 = vpop.permute.xlu0 %201  }
  0x8d   :  { %328 = vst.msk [vmem:[%s689_s1 + $0x8] sm:$0xff] %vm182_vm4, %v202_v3  }
  0x8e   :  { %v235_v4 = vpop.permute.xlu1 %234  }
  0x8f   :  { %337 = vst.msk [vmem:[%s689_s1 + $0x30] sm:$0xff] %vm182_vm4, %v235_v4  }
  0x97   :  { %v224_v5 = vpop.permute.xlu0 %223   ;;  %v257_v6 = vpop.permute.xlu1 %256  }
  0x98   :  { %334 = vst.msk [vmem:[%s689_s1 + $0x10] sm:$0xff] %vm182_vm4, %v224_v5   ;;  %343 = vst.msk [vmem:[%s689_s1 + $0x38] sm:$0xff] %vm182_vm4, %v257_v6  }
  0x9b   :  { %v246_v7 = vpop.permute.xlu0 %245  }
  0x9c   :  { %340 = vst.msk [vmem:[%s689_s1 + $0x18] sm:$0xff] %vm182_vm4, %v246_v7  }

// kernel: mul.66
= control target key start
LH: loop header
LB: loop body
LE: loop exit
PB: predicated region body
PF: predicated region fallthrough
CT: control target
= control target key end

     0   :  { %s2140_s0 = inlined_call_operand.vmem [shape: f32[4,32,4], index: 0, kind: input, shape index: {}]   ;;  %s2141_s1 = inlined_call_operand.vmem [shape: f32[4,32,4,32], index: 1, kind: output, shape index: {}]  }
   0x1   :  { %v1110_v0 = vld [vmem:[%s2140_s0 + $0x40] ss:$0 sm:$0xff]  ;;  %v1116_v4 = vld [vmem:[%s2140_s0 + $0x21] ss:$0 sm:$0xff]  ;;  %v1124_v8 = vld [vmem:[%s2140_s0 + $0x22] ss:$0 sm:$0xff] }
   0x2   :  { %v4_v1 = vld [vmem:[%s2140_s0] ss:$0 sm:$0xff]  ;;  %19 = vbcast.lane.b32.xlu1 %v1110_v0, 256  ;;  %v1114_v5 = vld [vmem:[%s2140_s0 + $0x1] ss:$0 sm:$0xff] }
   0x3   :  { %6 = vbcast.lane.b32.xlu0 %v4_v1, 256  ;;  %v1112_v2 = vld [vmem:[%s2140_s0 + $0x60] ss:$0 sm:$0xff]  ;;  %v1120_v6 = vld [vmem:[%s2140_s0 + $0x61] ss:$0 sm:$0xff] }
   0x4   :  { %v1108_v3 = vld [vmem:[%s2140_s0 + $0x20] ss:$0 sm:$0xff]  ;;  %v1118_v7 = vld [vmem:[%s2140_s0 + $0x41] ss:$0 sm:$0xff]  ;;  %v1122_v9 = vld [vmem:[%s2140_s0 + $0x2] ss:$0 sm:$0xff] }
   0x5   :  { %v1128_v10 = vld [vmem:[%s2140_s0 + $0x62] ss:$0 sm:$0xff]  ;;  %v1132_v12 = vld [vmem:[%s2140_s0 + $0x23] ss:$0 sm:$0xff]  ;;  %v1140_v16 = vld [vmem:[%s2140_s0 + $0x24] ss:$0 sm:$0xff] }
   0x6   :  { %26 = vbcast.lane.b32.xlu1 %v1112_v2, 256  ;;  %v1126_v11 = vld [vmem:[%s2140_s0 + $0x42] ss:$0 sm:$0xff]  ;;  %v1130_v13 = vld [vmem:[%s2140_s0 + $0x3] ss:$0 sm:$0xff] }
   0x7   :  { %12 = vbcast.lane.b32.xlu0 %v1108_v3, 256  ;;  %v1136_v14 = vld [vmem:[%s2140_s0 + $0x63] ss:$0 sm:$0xff]  ;;  %v1138_v17 = vld [vmem:[%s2140_s0 + $0x4] ss:$0 sm:$0xff] }
   0x8   :  { %v1134_v15 = vld [vmem:[%s2140_s0 + $0x43] ss:$0 sm:$0xff]  ;;  %v1144_v18 = vld [vmem:[%s2140_s0 + $0x64] ss:$0 sm:$0xff]  ;;  %v1148_v20 = vld [vmem:[%s2140_s0 + $0x25] ss:$0 sm:$0xff] }
   0x9   :  { %v1142_v19 = vld [vmem:[%s2140_s0 + $0x44] ss:$0 sm:$0xff]  ;;  %v1146_v21 = vld [vmem:[%s2140_s0 + $0x5] ss:$0 sm:$0xff]  ;;  %v1156_v24 = vld [vmem:[%s2140_s0 + $0x26] ss:$0 sm:$0xff] }
   0xa   :  { %41 = vbcast.lane.b32.xlu1 %v1116_v4, 256  ;;  %v1152_v22 = vld [vmem:[%s2140_s0 + $0x65] ss:$0 sm:$0xff]  ;;  %v1154_v25 = vld [vmem:[%s2140_s0 + $0x6] ss:$0 sm:$0xff] }
   0xb   :  { %33 = vbcast.lane.b32.xlu0 %v1114_v5, 256  ;;  %v1150_v23 = vld [vmem:[%s2140_s0 + $0x45] ss:$0 sm:$0xff]  ;;  %v1160_v26 = vld [vmem:[%s2140_s0 + $0x66] ss:$0 sm:$0xff] }
   0xc   :  { %v1158_v27 = vld [vmem:[%s2140_s0 + $0x46] ss:$0 sm:$0xff]  ;;  %v1164_v28 = vld [vmem:[%s2140_s0 + $0x27] ss:$0 sm:$0xff]  ;;  %v1172_v32 = vld [vmem:[%s2140_s0 + $0x28] ss:$0 sm:$0xff] }
   0xd   :  { %v1162_v29 = vld [vmem:[%s2140_s0 + $0x7] ss:$0 sm:$0xff]  ;;  %v1170_v33 = vld [vmem:[%s2140_s0 + $0x8] ss:$0 sm:$0xff]  ;;  %v1180_v36 = vld [vmem:[%s2140_s0 + $0x29] ss:$0 sm:$0xff] }
   0xe   :  { %57 = vbcast.lane.b32.xlu1 %v1120_v6, 256  ;;  %v1168_v30 = vld [vmem:[%s2140_s0 + $0x67] ss:$0 sm:$0xff]  ;;  %v1176_v34 = vld [vmem:[%s2140_s0 + $0x68] ss:$0 sm:$0xff] }
   0xf   :  { %49 = vbcast.lane.b32.xlu0 %v1118_v7, 256  ;;  %v1166_v31 = vld [vmem:[%s2140_s0 + $0x47] ss:$0 sm:$0xff]  ;;  %v1174_v35 = vld [vmem:[%s2140_s0 + $0x48] ss:$0 sm:$0xff] }
  0x10   :  { %v1178_v37 = vld [vmem:[%s2140_s0 + $0x9] ss:$0 sm:$0xff]  ;;  %v1188_v40 = vld [vmem:[%s2140_s0 + $0x2a] ss:$0 sm:$0xff]  ;;  %v1196_v44 = vld [vmem:[%s2140_s0 + $0x2b] ss:$0 sm:$0xff] }
  0x11   :  { %v1184_v38 = vld [vmem:[%s2140_s0 + $0x69] ss:$0 sm:$0xff]  ;;  %v1186_v41 = vld [vmem:[%s2140_s0 + $0xa] ss:$0 sm:$0xff]  ;;  %v1194_v45 = vld [vmem:[%s2140_s0 + $0xb] ss:$0 sm:$0xff] }
  0x12   :  { %72 = vbcast.lane.b32.xlu1 %v1124_v8, 256  ;;  %v1182_v39 = vld [vmem:[%s2140_s0 + $0x49] ss:$0 sm:$0xff]  ;;  %v1192_v42 = vld [vmem:[%s2140_s0 + $0x6a] ss:$0 sm:$0xff] }
  0x13   :  { %64 = vbcast.lane.b32.xlu0 %v1122_v9, 256  ;;  %v1190_v43 = vld [vmem:[%s2140_s0 + $0x4a] ss:$0 sm:$0xff]  ;;  %v1200_v46 = vld [vmem:[%s2140_s0 + $0x6b] ss:$0 sm:$0xff] }
  0x14   :  { %v1198_v47 = vld [vmem:[%s2140_s0 + $0x4b] ss:$0 sm:$0xff]  ;;  %v1204_v48 = vld [vmem:[%s2140_s0 + $0x2c] ss:$0 sm:$0xff]  ;;  %v1212_v52 = vld [vmem:[%s2140_s0 + $0x2d] ss:$0 sm:$0xff] }
  0x15   :  { %v1202_v49 = vld [vmem:[%s2140_s0 + $0xc] ss:$0 sm:$0xff]  ;;  %v1210_v53 = vld [vmem:[%s2140_s0 + $0xd] ss:$0 sm:$0xff]  ;;  %v1220_v56 = vld [vmem:[%s2140_s0 + $0x2e] ss:$0 sm:$0xff] }
  0x16   :  { %88 = vbcast.lane.b32.xlu1 %v1128_v10, 256  ;;  %v1208_v50 = vld [vmem:[%s2140_s0 + $0x6c] ss:$0 sm:$0xff]  ;;  %v1216_v54 = vld [vmem:[%s2140_s0 + $0x6d] ss:$0 sm:$0xff] }
  0x17   :  { %80 = vbcast.lane.b32.xlu0 %v1126_v11, 256  ;;  %v1206_v51 = vld [vmem:[%s2140_s0 + $0x4c] ss:$0 sm:$0xff]  ;;  %v1214_v55 = vld [vmem:[%s2140_s0 + $0x4d] ss:$0 sm:$0xff] }
  0x18   :  { %v1218_v57 = vld [vmem:[%s2140_s0 + $0xe] ss:$0 sm:$0xff]  ;;  %v1228_v62 = vld [vmem:[%s2140_s0 + $0x2f] ss:$0 sm:$0xff]  ;;  %v1236_v6 = vld [vmem:[%s2140_s0 + $0x30] ss:$0 sm:$0xff] }
  0x19   :  { %v1224_v58 = vld [vmem:[%s2140_s0 + $0x6e] ss:$0 sm:$0xff]  ;;  %v1226_v63 = vld [vmem:[%s2140_s0 + $0xf] ss:$0 sm:$0xff]  ;;  %v1234_v7 = vld [vmem:[%s2140_s0 + $0x10] ss:$0 sm:$0xff] }
  0x1a   :  { %103 = vbcast.lane.b32.xlu1 %v1132_v12, 256  ;;  %v1222_v59 = vld [vmem:[%s2140_s0 + $0x4e] ss:$0 sm:$0xff]  ;;  %v1232_v2 = vld [vmem:[%s2140_s0 + $0x6f] ss:$0 sm:$0xff] }
  0x1b   :  { %95 = vbcast.lane.b32.xlu0 %v1130_v13, 256  ;;  %v1230_v3 = vld [vmem:[%s2140_s0 + $0x4f] ss:$0 sm:$0xff]  ;;  %v1240_v10 = vld [vmem:[%s2140_s0 + $0x70] ss:$0 sm:$0xff] }
  0x1c   :  { %v1238_v11 = vld [vmem:[%s2140_s0 + $0x50] ss:$0 sm:$0xff] }
  0x1e   :  { %119 = vbcast.lane.b32.xlu1 %v1136_v14, 256  ;;  %v1244_v14 = vld [vmem:[%s2140_s0 + $0x31] ss:$0 sm:$0xff] }
  0x1f   :  { %111 = vbcast.lane.b32.xlu0 %v1134_v15, 256  ;;  %v1242_v15 = vld [vmem:[%s2140_s0 + $0x11] ss:$0 sm:$0xff] }
  0x22   :  { %134 = vbcast.lane.b32.xlu1 %v1140_v16, 256 }
  0x23   :  { %126 = vbcast.lane.b32.xlu0 %v1138_v17, 256 }
  0x26   :  { %150 = vbcast.lane.b32.xlu1 %v1144_v18, 256  ;;  %v1248_v18 = vld [vmem:[%s2140_s0 + $0x71] ss:$0 sm:$0xff] }
  0x27   :  { %142 = vbcast.lane.b32.xlu0 %v1142_v19, 256  ;;  %v1246_v19 = vld [vmem:[%s2140_s0 + $0x51] ss:$0 sm:$0xff] }
  0x2a   :  { %165 = vbcast.lane.b32.xlu1 %v1148_v20, 256 }
  0x2b   :  { %157 = vbcast.lane.b32.xlu0 %v1146_v21, 256 }
  0x2e   :  { %181 = vbcast.lane.b32.xlu1 %v1152_v22, 256  ;;  %v1252_v22 = vld [vmem:[%s2140_s0 + $0x32] ss:$0 sm:$0xff] }
  0x2f   :  { %173 = vbcast.lane.b32.xlu0 %v1150_v23, 256  ;;  %v1250_v23 = vld [vmem:[%s2140_s0 + $0x12] ss:$0 sm:$0xff] }
  0x32   :  { %196 = vbcast.lane.b32.xlu1 %v1156_v24, 256 }
  0x33   :  { %188 = vbcast.lane.b32.xlu0 %v1154_v25, 256 }
  0x36   :  { %212 = vbcast.lane.b32.xlu1 %v1160_v26, 256  ;;  %v1256_v26 = vld [vmem:[%s2140_s0 + $0x72] ss:$0 sm:$0xff] }
  0x37   :  { %204 = vbcast.lane.b32.xlu0 %v1158_v27, 256  ;;  %v1254_v27 = vld [vmem:[%s2140_s0 + $0x52] ss:$0 sm:$0xff] }
  0x3a   :  { %227 = vbcast.lane.b32.xlu1 %v1164_v28, 256 }
  0x3b   :  { %219 = vbcast.lane.b32.xlu0 %v1162_v29, 256 }
  0x3e   :  { %243 = vbcast.lane.b32.xlu1 %v1168_v30, 256  ;;  %v1260_v30 = vld [vmem:[%s2140_s0 + $0x33] ss:$0 sm:$0xff] }
  0x3f   :  { %235 = vbcast.lane.b32.xlu0 %v1166_v31, 256  ;;  %v1258_v31 = vld [vmem:[%s2140_s0 + $0x13] ss:$0 sm:$0xff] }
  0x42   :  { %257 = vbcast.lane.b32.xlu1 %v1172_v32, 256 }
  0x43   :  { %250 = vbcast.lane.b32.xlu0 %v1170_v33, 256 }
  0x46   :  { %271 = vbcast.lane.b32.xlu1 %v1176_v34, 256  ;;  %v1264_v34 = vld [vmem:[%s2140_s0 + $0x73] ss:$0 sm:$0xff] }
  0x47   :  { %264 = vbcast.lane.b32.xlu0 %v1174_v35, 256  ;;  %v1262_v35 = vld [vmem:[%s2140_s0 + $0x53] ss:$0 sm:$0xff] }
  0x4a   :  { %287 = vbcast.lane.b32.xlu1 %v1180_v36, 256 }
  0x4b   :  { %279 = vbcast.lane.b32.xlu0 %v1178_v37, 256 }
  0x4e   :  { %303 = vbcast.lane.b32.xlu1 %v1184_v38, 256  ;;  %v1268_v38 = vld [vmem:[%s2140_s0 + $0x34] ss:$0 sm:$0xff] }
  0x4f   :  { %295 = vbcast.lane.b32.xlu0 %v1182_v39, 256  ;;  %v1266_v39 = vld [vmem:[%s2140_s0 + $0x14] ss:$0 sm:$0xff] }
  0x52   :  { %319 = vbcast.lane.b32.xlu1 %v1188_v40, 256 }
  0x53   :  { %311 = vbcast.lane.b32.xlu0 %v1186_v41, 256 }
  0x56   :  { %335 = vbcast.lane.b32.xlu1 %v1192_v42, 256  ;;  %v1272_v42 = vld [vmem:[%s2140_s0 + $0x74] ss:$0 sm:$0xff] }
  0x57   :  { %327 = vbcast.lane.b32.xlu0 %v1190_v43, 256  ;;  %v1270_v43 = vld [vmem:[%s2140_s0 + $0x54] ss:$0 sm:$0xff] }
  0x5a   :  { %351 = vbcast.lane.b32.xlu1 %v1196_v44, 256 }
  0x5b   :  { %343 = vbcast.lane.b32.xlu0 %v1194_v45, 256 }
  0x5e   :  { %367 = vbcast.lane.b32.xlu1 %v1200_v46, 256  ;;  %v1276_v46 = vld [vmem:[%s2140_s0 + $0x35] ss:$0 sm:$0xff] }
  0x5f   :  { %359 = vbcast.lane.b32.xlu0 %v1198_v47, 256  ;;  %v1274_v47 = vld [vmem:[%s2140_s0 + $0x15] ss:$0 sm:$0xff] }
  0x62   :  { %383 = vbcast.lane.b32.xlu1 %v1204_v48, 256 }
  0x63   :  { %375 = vbcast.lane.b32.xlu0 %v1202_v49, 256 }
  0x66   :  { %399 = vbcast.lane.b32.xlu1 %v1208_v50, 256  ;;  %v1280_v50 = vld [vmem:[%s2140_s0 + $0x75] ss:$0 sm:$0xff] }
  0x67   :  { %391 = vbcast.lane.b32.xlu0 %v1206_v51, 256  ;;  %v1278_v51 = vld [vmem:[%s2140_s0 + $0x55] ss:$0 sm:$0xff] }
  0x6a   :  { %415 = vbcast.lane.b32.xlu1 %v1212_v52, 256 }
  0x6b   :  { %407 = vbcast.lane.b32.xlu0 %v1210_v53, 256 }
  0x6e   :  { %431 = vbcast.lane.b32.xlu1 %v1216_v54, 256  ;;  %v1284_v54 = vld [vmem:[%s2140_s0 + $0x36] ss:$0 sm:$0xff] }
  0x6f   :  { %423 = vbcast.lane.b32.xlu0 %v1214_v55, 256  ;;  %v1282_v55 = vld [vmem:[%s2140_s0 + $0x16] ss:$0 sm:$0xff] }
  0x72   :  { %447 = vbcast.lane.b32.xlu1 %v1220_v56, 256 }
  0x73   :  { %439 = vbcast.lane.b32.xlu0 %v1218_v57, 256 }
  0x74   :  { %v20_v60 = vpop.permute.xlu1 %19 }
  0x75   :  { %v7_v61 = vpop.permute.xlu0 %6  ;;  %1111 = vst [vmem:[%s2141_s1 + $0x100] sm:$0xf] %v20_v60 }
  0x76   :  { %8 = vst [vmem:[%s2141_s1] sm:$0xf] %v7_v61  ;;  %463 = vbcast.lane.b32.xlu1 %v1224_v58, 256  ;;  %v1288_v58 = vld [vmem:[%s2140_s0 + $0x76] ss:$0 sm:$0xff] }
  0x77   :  { %455 = vbcast.lane.b32.xlu0 %v1222_v59, 256  ;;  %v1286_v59 = vld [vmem:[%s2140_s0 + $0x56] ss:$0 sm:$0xff] }
  0x78   :  { %v27_v0 = vpop.permute.xlu1 %26 }
  0x79   :  { %v13_v1 = vpop.permute.xlu0 %12  ;;  %1113 = vst [vmem:[%s2141_s1 + $0x180] sm:$0xf] %v27_v0 }
  0x7a   :  { %1109 = vst [vmem:[%s2141_s1 + $0x80] sm:$0xf] %v13_v1  ;;  %479 = vbcast.lane.b32.xlu1 %v1228_v62, 256  ;;  %v1292_v62 = vld [vmem:[%s2140_s0 + $0x37] ss:$0 sm:$0xff] }
  0x7b   :  { %471 = vbcast.lane.b32.xlu0 %v1226_v63, 256  ;;  %v1290_v63 = vld [vmem:[%s2140_s0 + $0x17] ss:$0 sm:$0xff] }
  0x7c   :  { %v42_v4 = vpop.permute.xlu1 %41 }
  0x7d   :  { %v34_v5 = vpop.permute.xlu0 %33  ;;  %1117 = vst [vmem:[%s2141_s1 + $0x84] sm:$0xf] %v42_v4 }
  0x7e   :  { %1115 = vst [vmem:[%s2141_s1 + $0x4] sm:$0xf] %v34_v5  ;;  %495 = vbcast.lane.b32.xlu1 %v1232_v2, 256  ;;  %v1296_v2 = vld [vmem:[%s2140_s0 + $0x77] ss:$0 sm:$0xff] }
  0x7f   :  { %487 = vbcast.lane.b32.xlu0 %v1230_v3, 256  ;;  %v1294_v3 = vld [vmem:[%s2140_s0 + $0x57] ss:$0 sm:$0xff] }
  0x80   :  { %v58_v8 = vpop.permute.xlu1 %57 }
  0x81   :  { %v50_v9 = vpop.permute.xlu0 %49  ;;  %1121 = vst [vmem:[%s2141_s1 + $0x184] sm:$0xf] %v58_v8 }
  0x82   :  { %1119 = vst [vmem:[%s2141_s1 + $0x104] sm:$0xf] %v50_v9  ;;  %509 = vbcast.lane.b32.xlu1 %v1236_v6, 256  ;;  %v1300_v6 = vld [vmem:[%s2140_s0 + $0x38] ss:$0 sm:$0xff] }
  0x83   :  { %502 = vbcast.lane.b32.xlu0 %v1234_v7, 256  ;;  %v1298_v7 = vld [vmem:[%s2140_s0 + $0x18] ss:$0 sm:$0xff] }
  0x84   :  { %v73_v12 = vpop.permute.xlu1 %72 }
  0x85   :  { %v65_v13 = vpop.permute.xlu0 %64  ;;  %1125 = vst [vmem:[%s2141_s1 + $0x88] sm:$0xf] %v73_v12 }
  0x86   :  { %1123 = vst [vmem:[%s2141_s1 + $0x8] sm:$0xf] %v65_v13  ;;  %523 = vbcast.lane.b32.xlu1 %v1240_v10, 256  ;;  %v1304_v10 = vld [vmem:[%s2140_s0 + $0x78] ss:$0 sm:$0xff] }
  0x87   :  { %516 = vbcast.lane.b32.xlu0 %v1238_v11, 256  ;;  %v1302_v11 = vld [vmem:[%s2140_s0 + $0x58] ss:$0 sm:$0xff] }
  0x88   :  { %v89_v16 = vpop.permute.xlu1 %88 }
  0x89   :  { %v81_v17 = vpop.permute.xlu0 %80  ;;  %1129 = vst [vmem:[%s2141_s1 + $0x188] sm:$0xf] %v89_v16 }
  0x8a   :  { %1127 = vst [vmem:[%s2141_s1 + $0x108] sm:$0xf] %v81_v17  ;;  %539 = vbcast.lane.b32.xlu1 %v1244_v14, 256  ;;  %v1308_v14 = vld [vmem:[%s2140_s0 + $0x39] ss:$0 sm:$0xff] }
  0x8b   :  { %531 = vbcast.lane.b32.xlu0 %v1242_v15, 256  ;;  %v1306_v15 = vld [vmem:[%s2140_s0 + $0x19] ss:$0 sm:$0xff] }
  0x8c   :  { %v104_v20 = vpop.permute.xlu1 %103 }
  0x8d   :  { %v96_v21 = vpop.permute.xlu0 %95  ;;  %1133 = vst [vmem:[%s2141_s1 + $0x8c] sm:$0xf] %v104_v20 }
  0x8e   :  { %1131 = vst [vmem:[%s2141_s1 + $0xc] sm:$0xf] %v96_v21  ;;  %555 = vbcast.lane.b32.xlu1 %v1248_v18, 256  ;;  %v1312_v18 = vld [vmem:[%s2140_s0 + $0x79] ss:$0 sm:$0xff] }
  0x8f   :  { %547 = vbcast.lane.b32.xlu0 %v1246_v19, 256  ;;  %v1310_v19 = vld [vmem:[%s2140_s0 + $0x59] ss:$0 sm:$0xff] }
  0x90   :  { %v120_v24 = vpop.permute.xlu1 %119 }
  0x91   :  { %v112_v25 = vpop.permute.xlu0 %111  ;;  %1137 = vst [vmem:[%s2141_s1 + $0x18c] sm:$0xf] %v120_v24 }
  0x92   :  { %1135 = vst [vmem:[%s2141_s1 + $0x10c] sm:$0xf] %v112_v25  ;;  %571 = vbcast.lane.b32.xlu1 %v1252_v22, 256  ;;  %v1316_v22 = vld [vmem:[%s2140_s0 + $0x3a] ss:$0 sm:$0xff] }
  0x93   :  { %563 = vbcast.lane.b32.xlu0 %v1250_v23, 256  ;;  %v1314_v23 = vld [vmem:[%s2140_s0 + $0x1a] ss:$0 sm:$0xff] }
  0x94   :  { %v135_v28 = vpop.permute.xlu1 %134 }
  0x95   :  { %v127_v29 = vpop.permute.xlu0 %126  ;;  %1141 = vst [vmem:[%s2141_s1 + $0x90] sm:$0xf] %v135_v28 }
  0x96   :  { %1139 = vst [vmem:[%s2141_s1 + $0x10] sm:$0xf] %v127_v29  ;;  %587 = vbcast.lane.b32.xlu1 %v1256_v26, 256  ;;  %v1320_v26 = vld [vmem:[%s2140_s0 + $0x7a] ss:$0 sm:$0xff] }
  0x97   :  { %579 = vbcast.lane.b32.xlu0 %v1254_v27, 256  ;;  %v1318_v27 = vld [vmem:[%s2140_s0 + $0x5a] ss:$0 sm:$0xff] }
  0x98   :  { %v151_v32 = vpop.permute.xlu1 %150 }
  0x99   :  { %v143_v33 = vpop.permute.xlu0 %142  ;;  %1145 = vst [vmem:[%s2141_s1 + $0x190] sm:$0xf] %v151_v32 }
  0x9a   :  { %1143 = vst [vmem:[%s2141_s1 + $0x110] sm:$0xf] %v143_v33  ;;  %603 = vbcast.lane.b32.xlu1 %v1260_v30, 256  ;;  %v1324_v30 = vld [vmem:[%s2140_s0 + $0x3b] ss:$0 sm:$0xff] }
  0x9b   :  { %595 = vbcast.lane.b32.xlu0 %v1258_v31, 256  ;;  %v1322_v31 = vld [vmem:[%s2140_s0 + $0x1b] ss:$0 sm:$0xff] }
  0x9c   :  { %v166_v36 = vpop.permute.xlu1 %165 }
  0x9d   :  { %v158_v37 = vpop.permute.xlu0 %157  ;;  %1149 = vst [vmem:[%s2141_s1 + $0x94] sm:$0xf] %v166_v36 }
  0x9e   :  { %1147 = vst [vmem:[%s2141_s1 + $0x14] sm:$0xf] %v158_v37  ;;  %619 = vbcast.lane.b32.xlu1 %v1264_v34, 256  ;;  %v1328_v34 = vld [vmem:[%s2140_s0 + $0x7b] ss:$0 sm:$0xff] }
  0x9f   :  { %611 = vbcast.lane.b32.xlu0 %v1262_v35, 256  ;;  %v1326_v35 = vld [vmem:[%s2140_s0 + $0x5b] ss:$0 sm:$0xff] }
  0xa0   :  { %v182_v40 = vpop.permute.xlu1 %181 }
  0xa1   :  { %v174_v41 = vpop.permute.xlu0 %173  ;;  %1153 = vst [vmem:[%s2141_s1 + $0x194] sm:$0xf] %v182_v40 }
  0xa2   :  { %1151 = vst [vmem:[%s2141_s1 + $0x114] sm:$0xf] %v174_v41  ;;  %635 = vbcast.lane.b32.xlu1 %v1268_v38, 256  ;;  %v1332_v38 = vld [vmem:[%s2140_s0 + $0x3c] ss:$0 sm:$0xff] }
  0xa3   :  { %627 = vbcast.lane.b32.xlu0 %v1266_v39, 256  ;;  %v1330_v39 = vld [vmem:[%s2140_s0 + $0x1c] ss:$0 sm:$0xff] }
  0xa4   :  { %v197_v44 = vpop.permute.xlu1 %196 }
  0xa5   :  { %v189_v45 = vpop.permute.xlu0 %188  ;;  %1157 = vst [vmem:[%s2141_s1 + $0x98] sm:$0xf] %v197_v44 }
  0xa6   :  { %1155 = vst [vmem:[%s2141_s1 + $0x18] sm:$0xf] %v189_v45  ;;  %651 = vbcast.lane.b32.xlu1 %v1272_v42, 256  ;;  %v1336_v42 = vld [vmem:[%s2140_s0 + $0x7c] ss:$0 sm:$0xff] }
  0xa7   :  { %643 = vbcast.lane.b32.xlu0 %v1270_v43, 256  ;;  %v1334_v43 = vld [vmem:[%s2140_s0 + $0x5c] ss:$0 sm:$0xff] }
  0xa8   :  { %v213_v48 = vpop.permute.xlu1 %212 }
  0xa9   :  { %v205_v49 = vpop.permute.xlu0 %204  ;;  %1161 = vst [vmem:[%s2141_s1 + $0x198] sm:$0xf] %v213_v48 }
  0xaa   :  { %1159 = vst [vmem:[%s2141_s1 + $0x118] sm:$0xf] %v205_v49  ;;  %667 = vbcast.lane.b32.xlu1 %v1276_v46, 256  ;;  %v1340_v46 = vld [vmem:[%s2140_s0 + $0x3d] ss:$0 sm:$0xff] }
  0xab   :  { %659 = vbcast.lane.b32.xlu0 %v1274_v47, 256  ;;  %v1338_v47 = vld [vmem:[%s2140_s0 + $0x1d] ss:$0 sm:$0xff] }
  0xac   :  { %v228_v52 = vpop.permute.xlu1 %227 }
  0xad   :  { %v220_v53 = vpop.permute.xlu0 %219  ;;  %1165 = vst [vmem:[%s2141_s1 + $0x9c] sm:$0xf] %v228_v52 }
  0xae   :  { %1163 = vst [vmem:[%s2141_s1 + $0x1c] sm:$0xf] %v220_v53  ;;  %683 = vbcast.lane.b32.xlu1 %v1280_v50, 256  ;;  %v1344_v50 = vld [vmem:[%s2140_s0 + $0x7d] ss:$0 sm:$0xff] }
  0xaf   :  { %675 = vbcast.lane.b32.xlu0 %v1278_v51, 256  ;;  %v1342_v51 = vld [vmem:[%s2140_s0 + $0x5d] ss:$0 sm:$0xff] }
  0xb0   :  { %v244_v56 = vpop.permute.xlu1 %243 }
  0xb1   :  { %v236_v57 = vpop.permute.xlu0 %235  ;;  %1169 = vst [vmem:[%s2141_s1 + $0x19c] sm:$0xf] %v244_v56 }
  0xb2   :  { %1167 = vst [vmem:[%s2141_s1 + $0x11c] sm:$0xf] %v236_v57  ;;  %699 = vbcast.lane.b32.xlu1 %v1284_v54, 256  ;;  %v1348_v54 = vld [vmem:[%s2140_s0 + $0x3e] ss:$0 sm:$0xff] }
  0xb3   :  { %691 = vbcast.lane.b32.xlu0 %v1282_v55, 256  ;;  %v1346_v55 = vld [vmem:[%s2140_s0 + $0x1e] ss:$0 sm:$0xff] }
  0xb4   :  { %v258_v60 = vpop.permute.xlu1 %257 }
  0xb5   :  { %v251_v61 = vpop.permute.xlu0 %250  ;;  %1173 = vst [vmem:[%s2141_s1 + $0xa0] sm:$0xf] %v258_v60 }
  0xb6   :  { %1171 = vst [vmem:[%s2141_s1 + $0x20] sm:$0xf] %v251_v61  ;;  %715 = vbcast.lane.b32.xlu1 %v1288_v58, 256  ;;  %v1352_v58 = vld [vmem:[%s2140_s0 + $0x7e] ss:$0 sm:$0xff] }
  0xb7   :  { %707 = vbcast.lane.b32.xlu0 %v1286_v59, 256  ;;  %v1350_v59 = vld [vmem:[%s2140_s0 + $0x5e] ss:$0 sm:$0xff] }
  0xb8   :  { %v272_v0 = vpop.permute.xlu1 %271 }
  0xb9   :  { %v265_v1 = vpop.permute.xlu0 %264  ;;  %1177 = vst [vmem:[%s2141_s1 + $0x1a0] sm:$0xf] %v272_v0 }
  0xba   :  { %1175 = vst [vmem:[%s2141_s1 + $0x120] sm:$0xf] %v265_v1  ;;  %731 = vbcast.lane.b32.xlu1 %v1292_v62, 256  ;;  %v1356_v62 = vld [vmem:[%s2140_s0 + $0x3f] ss:$0 sm:$0xff] }
  0xbb   :  { %723 = vbcast.lane.b32.xlu0 %v1290_v63, 256  ;;  %v1354_v63 = vld [vmem:[%s2140_s0 + $0x1f] ss:$0 sm:$0xff] }
  0xbc   :  { %v288_v4 = vpop.permute.xlu1 %287 }
  0xbd   :  { %v280_v5 = vpop.permute.xlu0 %279  ;;  %1181 = vst [vmem:[%s2141_s1 + $0xa4] sm:$0xf] %v288_v4 }
  0xbe   :  { %1179 = vst [vmem:[%s2141_s1 + $0x24] sm:$0xf] %v280_v5  ;;  %747 = vbcast.lane.b32.xlu1 %v1296_v2, 256  ;;  %v1360_v2 = vld [vmem:[%s2140_s0 + $0x7f] ss:$0 sm:$0xff] }
  0xbf   :  { %739 = vbcast.lane.b32.xlu0 %v1294_v3, 256  ;;  %v1358_v3 = vld [vmem:[%s2140_s0 + $0x5f] ss:$0 sm:$0xff] }
  0xc0   :  { %v304_v8 = vpop.permute.xlu1 %303 }
  0xc1   :  { %v296_v9 = vpop.permute.xlu0 %295  ;;  %1185 = vst [vmem:[%s2141_s1 + $0x1a4] sm:$0xf] %v304_v8 }
  0xc2   :  { %1183 = vst [vmem:[%s2141_s1 + $0x124] sm:$0xf] %v296_v9  ;;  %761 = vbcast.lane.b32.xlu1 %v1300_v6, 256 }
  0xc3   :  { %754 = vbcast.lane.b32.xlu0 %v1298_v7, 256 }
  0xc4   :  { %v320_v12 = vpop.permute.xlu1 %319 }
  0xc5   :  { %v312_v13 = vpop.permute.xlu0 %311  ;;  %1189 = vst [vmem:[%s2141_s1 + $0xa8] sm:$0xf] %v320_v12 }
  0xc6   :  { %1187 = vst [vmem:[%s2141_s1 + $0x28] sm:$0xf] %v312_v13  ;;  %775 = vbcast.lane.b32.xlu1 %v1304_v10, 256 }
  0xc7   :  { %768 = vbcast.lane.b32.xlu0 %v1302_v11, 256 }
  0xc8   :  { %v336_v16 = vpop.permute.xlu1 %335 }
  0xc9   :  { %v328_v17 = vpop.permute.xlu0 %327  ;;  %1193 = vst [vmem:[%s2141_s1 + $0x1a8] sm:$0xf] %v336_v16 }
  0xca   :  { %1191 = vst [vmem:[%s2141_s1 + $0x128] sm:$0xf] %v328_v17  ;;  %791 = vbcast.lane.b32.xlu1 %v1308_v14, 256 }
  0xcb   :  { %783 = vbcast.lane.b32.xlu0 %v1306_v15, 256 }
  0xcc   :  { %v352_v20 = vpop.permute.xlu1 %351 }
  0xcd   :  { %v344_v21 = vpop.permute.xlu0 %343  ;;  %1197 = vst [vmem:[%s2141_s1 + $0xac] sm:$0xf] %v352_v20 }
  0xce   :  { %1195 = vst [vmem:[%s2141_s1 + $0x2c] sm:$0xf] %v344_v21  ;;  %807 = vbcast.lane.b32.xlu1 %v1312_v18, 256 }
  0xcf   :  { %799 = vbcast.lane.b32.xlu0 %v1310_v19, 256 }
  0xd0   :  { %v368_v24 = vpop.permute.xlu1 %367 }
  0xd1   :  { %v360_v25 = vpop.permute.xlu0 %359  ;;  %1201 = vst [vmem:[%s2141_s1 + $0x1ac] sm:$0xf] %v368_v24 }
  0xd2   :  { %1199 = vst [vmem:[%s2141_s1 + $0x12c] sm:$0xf] %v360_v25  ;;  %823 = vbcast.lane.b32.xlu1 %v1316_v22, 256 }
  0xd3   :  { %815 = vbcast.lane.b32.xlu0 %v1314_v23, 256 }
  0xd4   :  { %v384_v28 = vpop.permute.xlu1 %383 }
  0xd5   :  { %v376_v29 = vpop.permute.xlu0 %375  ;;  %1205 = vst [vmem:[%s2141_s1 + $0xb0] sm:$0xf] %v384_v28 }
  0xd6   :  { %1203 = vst [vmem:[%s2141_s1 + $0x30] sm:$0xf] %v376_v29  ;;  %839 = vbcast.lane.b32.xlu1 %v1320_v26, 256 }
  0xd7   :  { %831 = vbcast.lane.b32.xlu0 %v1318_v27, 256 }
  0xd8   :  { %v400_v32 = vpop.permute.xlu1 %399 }
  0xd9   :  { %v392_v33 = vpop.permute.xlu0 %391  ;;  %1209 = vst [vmem:[%s2141_s1 + $0x1b0] sm:$0xf] %v400_v32 }
  0xda   :  { %1207 = vst [vmem:[%s2141_s1 + $0x130] sm:$0xf] %v392_v33  ;;  %855 = vbcast.lane.b32.xlu1 %v1324_v30, 256 }
  0xdb   :  { %847 = vbcast.lane.b32.xlu0 %v1322_v31, 256 }
  0xdc   :  { %v416_v36 = vpop.permute.xlu1 %415 }
  0xdd   :  { %v408_v37 = vpop.permute.xlu0 %407  ;;  %1213 = vst [vmem:[%s2141_s1 + $0xb4] sm:$0xf] %v416_v36 }
  0xde   :  { %1211 = vst [vmem:[%s2141_s1 + $0x34] sm:$0xf] %v408_v37  ;;  %871 = vbcast.lane.b32.xlu1 %v1328_v34, 256 }
  0xdf   :  { %863 = vbcast.lane.b32.xlu0 %v1326_v35, 256 }
  0xe0   :  { %v432_v40 = vpop.permute.xlu1 %431 }
  0xe1   :  { %v424_v41 = vpop.permute.xlu0 %423  ;;  %1217 = vst [vmem:[%s2141_s1 + $0x1b4] sm:$0xf] %v432_v40 }
  0xe2   :  { %1215 = vst [vmem:[%s2141_s1 + $0x134] sm:$0xf] %v424_v41  ;;  %887 = vbcast.lane.b32.xlu1 %v1332_v38, 256 }
  0xe3   :  { %879 = vbcast.lane.b32.xlu0 %v1330_v39, 256 }
  0xe4   :  { %v448_v44 = vpop.permute.xlu1 %447 }
  0xe5   :  { %v440_v45 = vpop.permute.xlu0 %439  ;;  %1221 = vst [vmem:[%s2141_s1 + $0xb8] sm:$0xf] %v448_v44 }
  0xe6   :  { %1219 = vst [vmem:[%s2141_s1 + $0x38] sm:$0xf] %v440_v45  ;;  %903 = vbcast.lane.b32.xlu1 %v1336_v42, 256 }
  0xe7   :  { %895 = vbcast.lane.b32.xlu0 %v1334_v43, 256 }
  0xe8   :  { %v464_v48 = vpop.permute.xlu1 %463 }
  0xe9   :  { %v456_v49 = vpop.permute.xlu0 %455  ;;  %1225 = vst [vmem:[%s2141_s1 + $0x1b8] sm:$0xf] %v464_v48 }
  0xea   :  { %1223 = vst [vmem:[%s2141_s1 + $0x138] sm:$0xf] %v456_v49  ;;  %919 = vbcast.lane.b32.xlu1 %v1340_v46, 256 }
  0xeb   :  { %911 = vbcast.lane.b32.xlu0 %v1338_v47, 256 }
  0xec   :  { %v480_v52 = vpop.permute.xlu1 %479 }
  0xed   :  { %v472_v53 = vpop.permute.xlu0 %471  ;;  %1229 = vst [vmem:[%s2141_s1 + $0xbc] sm:$0xf] %v480_v52 }
  0xee   :  { %1227 = vst [vmem:[%s2141_s1 + $0x3c] sm:$0xf] %v472_v53  ;;  %935 = vbcast.lane.b32.xlu1 %v1344_v50, 256 }
  0xef   :  { %927 = vbcast.lane.b32.xlu0 %v1342_v51, 256 }
  0xf0   :  { %v496_v56 = vpop.permute.xlu1 %495 }
  0xf1   :  { %v488_v57 = vpop.permute.xlu0 %487  ;;  %1233 = vst [vmem:[%s2141_s1 + $0x1bc] sm:$0xf] %v496_v56 }
  0xf2   :  { %1231 = vst [vmem:[%s2141_s1 + $0x13c] sm:$0xf] %v488_v57  ;;  %951 = vbcast.lane.b32.xlu1 %v1348_v54, 256 }
  0xf3   :  { %943 = vbcast.lane.b32.xlu0 %v1346_v55, 256 }
  0xf4   :  { %v510_v60 = vpop.permute.xlu1 %509 }
  0xf5   :  { %v503_v61 = vpop.permute.xlu0 %502  ;;  %1237 = vst [vmem:[%s2141_s1 + $0xc0] sm:$0xf] %v510_v60 }
  0xf6   :  { %1235 = vst [vmem:[%s2141_s1 + $0x40] sm:$0xf] %v503_v61  ;;  %967 = vbcast.lane.b32.xlu1 %v1352_v58, 256 }
  0xf7   :  { %959 = vbcast.lane.b32.xlu0 %v1350_v59, 256 }
  0xf8   :  { %v524_v0 = vpop.permute.xlu1 %523 }
  0xf9   :  { %v517_v1 = vpop.permute.xlu0 %516  ;;  %1241 = vst [vmem:[%s2141_s1 + $0x1c0] sm:$0xf] %v524_v0 }
  0xfa   :  { %1239 = vst [vmem:[%s2141_s1 + $0x140] sm:$0xf] %v517_v1  ;;  %983 = vbcast.lane.b32.xlu1 %v1356_v62, 256 }
  0xfb   :  { %975 = vbcast.lane.b32.xlu0 %v1354_v63, 256 }
  0xfc   :  { %v540_v4 = vpop.permute.xlu1 %539 }
  0xfd   :  { %v532_v5 = vpop.permute.xlu0 %531  ;;  %1245 = vst [vmem:[%s2141_s1 + $0xc4] sm:$0xf] %v540_v4 }
  0xfe   :  { %1243 = vst [vmem:[%s2141_s1 + $0x44] sm:$0xf] %v532_v5  ;;  %999 = vbcast.lane.b32.xlu1 %v1360_v2, 256 }
  0xff   :  { %991 = vbcast.lane.b32.xlu0 %v1358_v3, 256 }
 0x100   :  { %v556_v6 = vpop.permute.xlu1 %555 }
 0x101   :  { %v548_v7 = vpop.permute.xlu0 %547  ;;  %1249 = vst [vmem:[%s2141_s1 + $0x1c4] sm:$0xf] %v556_v6 }
 0x102   :  { %1247 = vst [vmem:[%s2141_s1 + $0x144] sm:$0xf] %v548_v7 }
 0x104   :  { %v572_v8 = vpop.permute.xlu1 %571 }
 0x105   :  { %v564_v9 = vpop.permute.xlu0 %563  ;;  %1253 = vst [vmem:[%s2141_s1 + $0xc8] sm:$0xf] %v572_v8 }
 0x106   :  { %1251 = vst [vmem:[%s2141_s1 + $0x48] sm:$0xf] %v564_v9 }
 0x108   :  { %v588_v10 = vpop.permute.xlu1 %587 }
 0x109   :  { %v580_v11 = vpop.permute.xlu0 %579  ;;  %1257 = vst [vmem:[%s2141_s1 + $0x1c8] sm:$0xf] %v588_v10 }
 0x10a   :  { %1255 = vst [vmem:[%s2141_s1 + $0x148] sm:$0xf] %v580_v11 }
 0x10c   :  { %v604_v12 = vpop.permute.xlu1 %603 }
 0x10d   :  { %v596_v13 = vpop.permute.xlu0 %595  ;;  %1261 = vst [vmem:[%s2141_s1 + $0xcc] sm:$0xf] %v604_v12 }
 0x10e   :  { %1259 = vst [vmem:[%s2141_s1 + $0x4c] sm:$0xf] %v596_v13 }
 0x110   :  { %v620_v14 = vpop.permute.xlu1 %619 }
 0x111   :  { %v612_v15 = vpop.permute.xlu0 %611  ;;  %1265 = vst [vmem:[%s2141_s1 + $0x1cc] sm:$0xf] %v620_v14 }
 0x112   :  { %1263 = vst [vmem:[%s2141_s1 + $0x14c] sm:$0xf] %v612_v15 }
 0x114   :  { %v636_v16 = vpop.permute.xlu1 %635 }
 0x115   :  { %v628_v17 = vpop.permute.xlu0 %627  ;;  %1269 = vst [vmem:[%s2141_s1 + $0xd0] sm:$0xf] %v636_v16 }
 0x116   :  { %1267 = vst [vmem:[%s2141_s1 + $0x50] sm:$0xf] %v628_v17 }
 0x118   :  { %v652_v18 = vpop.permute.xlu1 %651 }
 0x119   :  { %v644_v19 = vpop.permute.xlu0 %643  ;;  %1273 = vst [vmem:[%s2141_s1 + $0x1d0] sm:$0xf] %v652_v18 }
 0x11a   :  { %1271 = vst [vmem:[%s2141_s1 + $0x150] sm:$0xf] %v644_v19 }
 0x11c   :  { %v668_v20 = vpop.permute.xlu1 %667 }
 0x11d   :  { %v660_v21 = vpop.permute.xlu0 %659  ;;  %1277 = vst [vmem:[%s2141_s1 + $0xd4] sm:$0xf] %v668_v20 }
 0x11e   :  { %1275 = vst [vmem:[%s2141_s1 + $0x54] sm:$0xf] %v660_v21 }
 0x120   :  { %v684_v22 = vpop.permute.xlu1 %683 }
 0x121   :  { %v676_v23 = vpop.permute.xlu0 %675  ;;  %1281 = vst [vmem:[%s2141_s1 + $0x1d4] sm:$0xf] %v684_v22 }
 0x122   :  { %1279 = vst [vmem:[%s2141_s1 + $0x154] sm:$0xf] %v676_v23 }
 0x124   :  { %v700_v24 = vpop.permute.xlu1 %699 }
 0x125   :  { %v692_v25 = vpop.permute.xlu0 %691  ;;  %1285 = vst [vmem:[%s2141_s1 + $0xd8] sm:$0xf] %v700_v24 }
 0x126   :  { %1283 = vst [vmem:[%s2141_s1 + $0x58] sm:$0xf] %v692_v25 }
 0x128   :  { %v716_v26 = vpop.permute.xlu1 %715 }
 0x129   :  { %v708_v27 = vpop.permute.xlu0 %707  ;;  %1289 = vst [vmem:[%s2141_s1 + $0x1d8] sm:$0xf] %v716_v26 }
 0x12a   :  { %1287 = vst [vmem:[%s2141_s1 + $0x158] sm:$0xf] %v708_v27 }
 0x12c   :  { %v732_v28 = vpop.permute.xlu1 %731 }
 0x12d   :  { %v724_v29 = vpop.permute.xlu0 %723  ;;  %1293 = vst [vmem:[%s2141_s1 + $0xdc] sm:$0xf] %v732_v28 }
 0x12e   :  { %1291 = vst [vmem:[%s2141_s1 + $0x5c] sm:$0xf] %v724_v29 }
 0x130   :  { %v748_v30 = vpop.permute.xlu1 %747 }
 0x131   :  { %v740_v31 = vpop.permute.xlu0 %739  ;;  %1297 = vst [vmem:[%s2141_s1 + $0x1dc] sm:$0xf] %v748_v30 }
 0x132   :  { %1295 = vst [vmem:[%s2141_s1 + $0x15c] sm:$0xf] %v740_v31 }
 0x134   :  { %v762_v32 = vpop.permute.xlu1 %761 }
 0x135   :  { %v755_v33 = vpop.permute.xlu0 %754  ;;  %1301 = vst [vmem:[%s2141_s1 + $0xe0] sm:$0xf] %v762_v32 }
 0x136   :  { %1299 = vst [vmem:[%s2141_s1 + $0x60] sm:$0xf] %v755_v33 }
 0x138   :  { %v776_v34 = vpop.permute.xlu1 %775 }
 0x139   :  { %v769_v35 = vpop.permute.xlu0 %768  ;;  %1305 = vst [vmem:[%s2141_s1 + $0x1e0] sm:$0xf] %v776_v34 }
 0x13a   :  { %1303 = vst [vmem:[%s2141_s1 + $0x160] sm:$0xf] %v769_v35 }
 0x13c   :  { %v792_v36 = vpop.permute.xlu1 %791 }
 0x13d   :  { %v784_v37 = vpop.permute.xlu0 %783  ;;  %1309 = vst [vmem:[%s2141_s1 + $0xe4] sm:$0xf] %v792_v36 }
 0x13e   :  { %1307 = vst [vmem:[%s2141_s1 + $0x64] sm:$0xf] %v784_v37 }
 0x140   :  { %v808_v38 = vpop.permute.xlu1 %807 }
 0x141   :  { %v800_v39 = vpop.permute.xlu0 %799  ;;  %1313 = vst [vmem:[%s2141_s1 + $0x1e4] sm:$0xf] %v808_v38 }
 0x142   :  { %1311 = vst [vmem:[%s2141_s1 + $0x164] sm:$0xf] %v800_v39 }
 0x144   :  { %v824_v40 = vpop.permute.xlu1 %823 }
 0x145   :  { %v816_v41 = vpop.permute.xlu0 %815  ;;  %1317 = vst [vmem:[%s2141_s1 + $0xe8] sm:$0xf] %v824_v40 }
 0x146   :  { %1315 = vst [vmem:[%s2141_s1 + $0x68] sm:$0xf] %v816_v41 }
 0x148   :  { %v840_v42 = vpop.permute.xlu1 %839 }
 0x149   :  { %v832_v43 = vpop.permute.xlu0 %831  ;;  %1321 = vst [vmem:[%s2141_s1 + $0x1e8] sm:$0xf] %v840_v42 }
 0x14a   :  { %1319 = vst [vmem:[%s2141_s1 + $0x168] sm:$0xf] %v832_v43 }
 0x14c   :  { %v856_v44 = vpop.permute.xlu1 %855 }
 0x14d   :  { %v848_v45 = vpop.permute.xlu0 %847  ;;  %1325 = vst [vmem:[%s2141_s1 + $0xec] sm:$0xf] %v856_v44 }
 0x14e   :  { %1323 = vst [vmem:[%s2141_s1 + $0x6c] sm:$0xf] %v848_v45 }
 0x150   :  { %v872_v46 = vpop.permute.xlu1 %871 }
 0x151   :  { %v864_v47 = vpop.permute.xlu0 %863  ;;  %1329 = vst [vmem:[%s2141_s1 + $0x1ec] sm:$0xf] %v872_v46 }
 0x152   :  { %1327 = vst [vmem:[%s2141_s1 + $0x16c] sm:$0xf] %v864_v47 }
 0x154   :  { %v888_v48 = vpop.permute.xlu1 %887 }
 0x155   :  { %v880_v49 = vpop.permute.xlu0 %879  ;;  %1333 = vst [vmem:[%s2141_s1 + $0xf0] sm:$0xf] %v888_v48 }
 0x156   :  { %1331 = vst [vmem:[%s2141_s1 + $0x70] sm:$0xf] %v880_v49 }
 0x158   :  { %v904_v50 = vpop.permute.xlu1 %903 }
 0x159   :  { %v896_v51 = vpop.permute.xlu0 %895  ;;  %1337 = vst [vmem:[%s2141_s1 + $0x1f0] sm:$0xf] %v904_v50 }
 0x15a   :  { %1335 = vst [vmem:[%s2141_s1 + $0x170] sm:$0xf] %v896_v51 }
 0x15c   :  { %v920_v52 = vpop.permute.xlu1 %919 }
 0x15d   :  { %v912_v53 = vpop.permute.xlu0 %911  ;;  %1341 = vst [vmem:[%s2141_s1 + $0xf4] sm:$0xf] %v920_v52 }
 0x15e   :  { %1339 = vst [vmem:[%s2141_s1 + $0x74] sm:$0xf] %v912_v53 }
 0x160   :  { %v936_v54 = vpop.permute.xlu1 %935 }
 0x161   :  { %v928_v55 = vpop.permute.xlu0 %927  ;;  %1345 = vst [vmem:[%s2141_s1 + $0x1f4] sm:$0xf] %v936_v54 }
 0x162   :  { %1343 = vst [vmem:[%s2141_s1 + $0x174] sm:$0xf] %v928_v55 }
 0x164   :  { %v952_v56 = vpop.permute.xlu1 %951 }
 0x165   :  { %v944_v57 = vpop.permute.xlu0 %943  ;;  %1349 = vst [vmem:[%s2141_s1 + $0xf8] sm:$0xf] %v952_v56 }
 0x166   :  { %1347 = vst [vmem:[%s2141_s1 + $0x78] sm:$0xf] %v944_v57 }
 0x168   :  { %v968_v58 = vpop.permute.xlu1 %967 }
 0x169   :  { %v960_v59 = vpop.permute.xlu0 %959  ;;  %1353 = vst [vmem:[%s2141_s1 + $0x1f8] sm:$0xf] %v968_v58 }
 0x16a   :  { %1351 = vst [vmem:[%s2141_s1 + $0x178] sm:$0xf] %v960_v59 }
 0x16c   :  { %v984_v60 = vpop.permute.xlu1 %983 }
 0x16d   :  { %v976_v61 = vpop.permute.xlu0 %975  ;;  %1357 = vst [vmem:[%s2141_s1 + $0xfc] sm:$0xf] %v984_v60 }
 0x16e   :  { %1355 = vst [vmem:[%s2141_s1 + $0x7c] sm:$0xf] %v976_v61 }
 0x170   :  { %v1000_v62 = vpop.permute.xlu1 %999 }
 0x171   :  { %v992_v63 = vpop.permute.xlu0 %991  ;;  %1361 = vst [vmem:[%s2141_s1 + $0x1fc] sm:$0xf] %v1000_v62 }
 0x172   :  { %1359 = vst [vmem:[%s2141_s1 + $0x17c] sm:$0xf] %v992_v63 }

// kernel: mul.86
= control target key start
LH: loop header
LB: loop body
LE: loop exit
PB: predicated region body
PF: predicated region fallthrough
CT: control target
= control target key end

     0   :  { %s800_s0 = inlined_call_operand.vmem [shape: f32[6,8,6], index: 0, kind: input, shape index: {}]   ;;  %s801_s1 = inlined_call_operand.vmem [shape: f32[6,8,6,32], index: 1, kind: output, shape index: {}]  }
   0x1   :  { %v410_v0 = vld [vmem:[%s800_s0 + $0x10] ss:$0 sm:$0xff]  ;;  %v4_v1 = vld [vmem:[%s800_s0] ss:$0 sm:$0xff]  ;;  %v412_v2 = vld [vmem:[%s800_s0 + $0x18] ss:$0 sm:$0xff] }
   0x2   :  { %19 = vbcast.lane.b32.xlu1 %v410_v0, 256  ;;  %6 = vbcast.lane.b32.xlu0 %v4_v1, 256  ;;  %v408_v3 = vld [vmem:[%s800_s0 + $0x8] ss:$0 sm:$0xff]  ;;  %v414_v5 = vld [vmem:[%s800_s0 + $0x20] ss:$0 sm:$0xff] }
   0x3   :  { %v416_v4 = vld [vmem:[%s800_s0 + $0x28] ss:$0 sm:$0xff]  ;;  %v420_v6 = vld [vmem:[%s800_s0 + $0x9] ss:$0 sm:$0xff]  ;;  %v418_v7 = vld [vmem:[%s800_s0 + $0x1] ss:$0 sm:$0xff] }
   0x4   :  { %v424_v8 = vld [vmem:[%s800_s0 + $0x19] ss:$0 sm:$0xff]  ;;  %v422_v9 = vld [vmem:[%s800_s0 + $0x11] ss:$0 sm:$0xff]  ;;  %v428_v10 = vld [vmem:[%s800_s0 + $0x29] ss:$0 sm:$0xff] }
   0x5   :  { %v426_v11 = vld [vmem:[%s800_s0 + $0x21] ss:$0 sm:$0xff]  ;;  %v432_v12 = vld [vmem:[%s800_s0 + $0xa] ss:$0 sm:$0xff]  ;;  %v430_v13 = vld [vmem:[%s800_s0 + $0x2] ss:$0 sm:$0xff] }
   0x6   :  { %26 = vbcast.lane.b32.xlu1 %v412_v2, 256  ;;  %12 = vbcast.lane.b32.xlu0 %v408_v3, 256  ;;  %v436_v14 = vld [vmem:[%s800_s0 + $0x1a] ss:$0 sm:$0xff]  ;;  %v434_v15 = vld [vmem:[%s800_s0 + $0x12] ss:$0 sm:$0xff] }
   0x7   :  { %v440_v16 = vld [vmem:[%s800_s0 + $0x2a] ss:$0 sm:$0xff]  ;;  %v438_v17 = vld [vmem:[%s800_s0 + $0x22] ss:$0 sm:$0xff]  ;;  %v444_v18 = vld [vmem:[%s800_s0 + $0xb] ss:$0 sm:$0xff] }
   0x8   :  { %v442_v19 = vld [vmem:[%s800_s0 + $0x3] ss:$0 sm:$0xff]  ;;  %v448_v20 = vld [vmem:[%s800_s0 + $0x1b] ss:$0 sm:$0xff]  ;;  %v446_v21 = vld [vmem:[%s800_s0 + $0x13] ss:$0 sm:$0xff] }
   0x9   :  { %v452_v22 = vld [vmem:[%s800_s0 + $0x2b] ss:$0 sm:$0xff]  ;;  %v450_v23 = vld [vmem:[%s800_s0 + $0x23] ss:$0 sm:$0xff]  ;;  %v456_v24 = vld [vmem:[%s800_s0 + $0xc] ss:$0 sm:$0xff] }
   0xa   :  { %40 = vbcast.lane.b32.xlu1 %v416_v4, 256  ;;  %33 = vbcast.lane.b32.xlu0 %v414_v5, 256  ;;  %v454_v25 = vld [vmem:[%s800_s0 + $0x4] ss:$0 sm:$0xff]  ;;  %v460_v26 = vld [vmem:[%s800_s0 + $0x1c] ss:$0 sm:$0xff] }
   0xb   :  { %v458_v27 = vld [vmem:[%s800_s0 + $0x14] ss:$0 sm:$0xff]  ;;  %v464_v28 = vld [vmem:[%s800_s0 + $0x2c] ss:$0 sm:$0xff]  ;;  %v462_v29 = vld [vmem:[%s800_s0 + $0x24] ss:$0 sm:$0xff] }
   0xc   :  { %v468_v30 = vld [vmem:[%s800_s0 + $0xd] ss:$0 sm:$0xff]  ;;  %v466_v31 = vld [vmem:[%s800_s0 + $0x5] ss:$0 sm:$0xff]  ;;  %v472_v32 = vld [vmem:[%s800_s0 + $0x1d] ss:$0 sm:$0xff] }
   0xd   :  { %v470_v33 = vld [vmem:[%s800_s0 + $0x15] ss:$0 sm:$0xff]  ;;  %v476_v34 = vld [vmem:[%s800_s0 + $0x2d] ss:$0 sm:$0xff]  ;;  %v474_v35 = vld [vmem:[%s800_s0 + $0x25] ss:$0 sm:$0xff] }
   0xe   :  { %55 = vbcast.lane.b32.xlu1 %v420_v6, 256  ;;  %47 = vbcast.lane.b32.xlu0 %v418_v7, 256  ;;  %v480_v36 = vld [vmem:[%s800_s0 + $0xe] ss:$0 sm:$0xff]  ;;  %v478_v37 = vld [vmem:[%s800_s0 + $0x6] ss:$0 sm:$0xff] }
   0xf   :  { %v484_v38 = vld [vmem:[%s800_s0 + $0x1e] ss:$0 sm:$0xff]  ;;  %v482_v39 = vld [vmem:[%s800_s0 + $0x16] ss:$0 sm:$0xff]  ;;  %v488_v40 = vld [vmem:[%s800_s0 + $0x2e] ss:$0 sm:$0xff] }
  0x10   :  { %v486_v41 = vld [vmem:[%s800_s0 + $0x26] ss:$0 sm:$0xff]  ;;  %v492_v42 = vld [vmem:[%s800_s0 + $0xf] ss:$0 sm:$0xff]  ;;  %v490_v43 = vld [vmem:[%s800_s0 + $0x7] ss:$0 sm:$0xff] }
  0x11   :  { %v496_v44 = vld [vmem:[%s800_s0 + $0x1f] ss:$0 sm:$0xff]  ;;  %v494_v45 = vld [vmem:[%s800_s0 + $0x17] ss:$0 sm:$0xff]  ;;  %v500_v46 = vld [vmem:[%s800_s0 + $0x2f] ss:$0 sm:$0xff] }
  0x12   :  { %71 = vbcast.lane.b32.xlu1 %v424_v8, 256  ;;  %63 = vbcast.lane.b32.xlu0 %v422_v9, 256  ;;  %v498_v47 = vld [vmem:[%s800_s0 + $0x27] ss:$0 sm:$0xff] }
  0x16   :  { %87 = vbcast.lane.b32.xlu1 %v428_v10, 256  ;;  %79 = vbcast.lane.b32.xlu0 %v426_v11, 256 }
  0x1a   :  { %102 = vbcast.lane.b32.xlu1 %v432_v12, 256  ;;  %94 = vbcast.lane.b32.xlu0 %v430_v13, 256 }
  0x1e   :  { %118 = vbcast.lane.b32.xlu1 %v436_v14, 256  ;;  %110 = vbcast.lane.b32.xlu0 %v434_v15, 256 }
  0x22   :  { %134 = vbcast.lane.b32.xlu1 %v440_v16, 256  ;;  %126 = vbcast.lane.b32.xlu0 %v438_v17, 256 }
  0x26   :  { %149 = vbcast.lane.b32.xlu1 %v444_v18, 256  ;;  %141 = vbcast.lane.b32.xlu0 %v442_v19, 256 }
  0x2a   :  { %165 = vbcast.lane.b32.xlu1 %v448_v20, 256  ;;  %157 = vbcast.lane.b32.xlu0 %v446_v21, 256 }
  0x2e   :  { %181 = vbcast.lane.b32.xlu1 %v452_v22, 256  ;;  %173 = vbcast.lane.b32.xlu0 %v450_v23, 256 }
  0x32   :  { %196 = vbcast.lane.b32.xlu1 %v456_v24, 256  ;;  %188 = vbcast.lane.b32.xlu0 %v454_v25, 256 }
  0x36   :  { %212 = vbcast.lane.b32.xlu1 %v460_v26, 256  ;;  %204 = vbcast.lane.b32.xlu0 %v458_v27, 256 }
  0x3a   :  { %228 = vbcast.lane.b32.xlu1 %v464_v28, 256  ;;  %220 = vbcast.lane.b32.xlu0 %v462_v29, 256 }
  0x3e   :  { %243 = vbcast.lane.b32.xlu1 %v468_v30, 256  ;;  %235 = vbcast.lane.b32.xlu0 %v466_v31, 256 }
  0x42   :  { %259 = vbcast.lane.b32.xlu1 %v472_v32, 256  ;;  %251 = vbcast.lane.b32.xlu0 %v470_v33, 256 }
  0x46   :  { %275 = vbcast.lane.b32.xlu1 %v476_v34, 256  ;;  %267 = vbcast.lane.b32.xlu0 %v474_v35, 256 }
  0x4a   :  { %290 = vbcast.lane.b32.xlu1 %v480_v36, 256  ;;  %282 = vbcast.lane.b32.xlu0 %v478_v37, 256 }
  0x4e   :  { %306 = vbcast.lane.b32.xlu1 %v484_v38, 256  ;;  %298 = vbcast.lane.b32.xlu0 %v482_v39, 256 }
  0x52   :  { %322 = vbcast.lane.b32.xlu1 %v488_v40, 256  ;;  %314 = vbcast.lane.b32.xlu0 %v486_v41, 256 }
  0x56   :  { %337 = vbcast.lane.b32.xlu1 %v492_v42, 256  ;;  %329 = vbcast.lane.b32.xlu0 %v490_v43, 256 }
  0x5a   :  { %353 = vbcast.lane.b32.xlu1 %v496_v44, 256  ;;  %345 = vbcast.lane.b32.xlu0 %v494_v45, 256 }
  0x5e   :  { %369 = vbcast.lane.b32.xlu1 %v500_v46, 256  ;;  %361 = vbcast.lane.b32.xlu0 %v498_v47, 256 }
  0x74   :  { %v20_v48 = vpop.permute.xlu1 %19  ;;  %v7_v49 = vpop.permute.xlu0 %6 }
  0x75   :  { %411 = vst [vmem:[%s801_s1 + $0x80] sm:$0xff] %v20_v48  ;;  %8 = vst [vmem:[%s801_s1] sm:$0xff] %v7_v49 }
  0x78   :  { %v27_v50 = vpop.permute.xlu1 %26  ;;  %v13_v51 = vpop.permute.xlu0 %12 }
  0x79   :  { %413 = vst [vmem:[%s801_s1 + $0xc0] sm:$0xff] %v27_v50  ;;  %409 = vst [vmem:[%s801_s1 + $0x40] sm:$0xff] %v13_v51 }
  0x7c   :  { %v41_v52 = vpop.permute.xlu1 %40  ;;  %v34_v53 = vpop.permute.xlu0 %33 }
  0x7d   :  { %417 = vst [vmem:[%s801_s1 + $0x140] sm:$0xff] %v41_v52  ;;  %415 = vst [vmem:[%s801_s1 + $0x100] sm:$0xff] %v34_v53 }
  0x80   :  { %v56_v54 = vpop.permute.xlu1 %55  ;;  %v48_v55 = vpop.permute.xlu0 %47 }
  0x81   :  { %421 = vst [vmem:[%s801_s1 + $0x48] sm:$0xff] %v56_v54  ;;  %419 = vst [vmem:[%s801_s1 + $0x8] sm:$0xff] %v48_v55 }
  0x84   :  { %v72_v56 = vpop.permute.xlu1 %71  ;;  %v64_v57 = vpop.permute.xlu0 %63 }
  0x85   :  { %425 = vst [vmem:[%s801_s1 + $0xc8] sm:$0xff] %v72_v56  ;;  %423 = vst [vmem:[%s801_s1 + $0x88] sm:$0xff] %v64_v57 }
  0x88   :  { %v88_v58 = vpop.permute.xlu1 %87  ;;  %v80_v59 = vpop.permute.xlu0 %79 }
  0x89   :  { %429 = vst [vmem:[%s801_s1 + $0x148] sm:$0xff] %v88_v58  ;;  %427 = vst [vmem:[%s801_s1 + $0x108] sm:$0xff] %v80_v59 }
  0x8c   :  { %v103_v60 = vpop.permute.xlu1 %102  ;;  %v95_v61 = vpop.permute.xlu0 %94 }
  0x8d   :  { %433 = vst [vmem:[%s801_s1 + $0x50] sm:$0xff] %v103_v60  ;;  %431 = vst [vmem:[%s801_s1 + $0x10] sm:$0xff] %v95_v61 }
  0x90   :  { %v119_v62 = vpop.permute.xlu1 %118  ;;  %v111_v63 = vpop.permute.xlu0 %110 }
  0x91   :  { %437 = vst [vmem:[%s801_s1 + $0xd0] sm:$0xff] %v119_v62  ;;  %435 = vst [vmem:[%s801_s1 + $0x90] sm:$0xff] %v111_v63 }
  0x94   :  { %v135_v0 = vpop.permute.xlu1 %134  ;;  %v127_v1 = vpop.permute.xlu0 %126 }
  0x95   :  { %441 = vst [vmem:[%s801_s1 + $0x150] sm:$0xff] %v135_v0  ;;  %439 = vst [vmem:[%s801_s1 + $0x110] sm:$0xff] %v127_v1 }
  0x98   :  { %v150_v2 = vpop.permute.xlu1 %149  ;;  %v142_v3 = vpop.permute.xlu0 %141 }
  0x99   :  { %445 = vst [vmem:[%s801_s1 + $0x58] sm:$0xff] %v150_v2  ;;  %443 = vst [vmem:[%s801_s1 + $0x18] sm:$0xff] %v142_v3 }
  0x9c   :  { %v166_v4 = vpop.permute.xlu1 %165  ;;  %v158_v5 = vpop.permute.xlu0 %157 }
  0x9d   :  { %449 = vst [vmem:[%s801_s1 + $0xd8] sm:$0xff] %v166_v4  ;;  %447 = vst [vmem:[%s801_s1 + $0x98] sm:$0xff] %v158_v5 }
  0xa0   :  { %v182_v6 = vpop.permute.xlu1 %181  ;;  %v174_v7 = vpop.permute.xlu0 %173 }
  0xa1   :  { %453 = vst [vmem:[%s801_s1 + $0x158] sm:$0xff] %v182_v6  ;;  %451 = vst [vmem:[%s801_s1 + $0x118] sm:$0xff] %v174_v7 }
  0xa4   :  { %v197_v8 = vpop.permute.xlu1 %196  ;;  %v189_v9 = vpop.permute.xlu0 %188 }
  0xa5   :  { %457 = vst [vmem:[%s801_s1 + $0x60] sm:$0xff] %v197_v8  ;;  %455 = vst [vmem:[%s801_s1 + $0x20] sm:$0xff] %v189_v9 }
  0xa8   :  { %v213_v10 = vpop.permute.xlu1 %212  ;;  %v205_v11 = vpop.permute.xlu0 %204 }
  0xa9   :  { %461 = vst [vmem:[%s801_s1 + $0xe0] sm:$0xff] %v213_v10  ;;  %459 = vst [vmem:[%s801_s1 + $0xa0] sm:$0xff] %v205_v11 }
  0xac   :  { %v229_v12 = vpop.permute.xlu1 %228  ;;  %v221_v13 = vpop.permute.xlu0 %220 }
  0xad   :  { %465 = vst [vmem:[%s801_s1 + $0x160] sm:$0xff] %v229_v12  ;;  %463 = vst [vmem:[%s801_s1 + $0x120] sm:$0xff] %v221_v13 }
  0xb0   :  { %v244_v14 = vpop.permute.xlu1 %243  ;;  %v236_v15 = vpop.permute.xlu0 %235 }
  0xb1   :  { %469 = vst [vmem:[%s801_s1 + $0x68] sm:$0xff] %v244_v14  ;;  %467 = vst [vmem:[%s801_s1 + $0x28] sm:$0xff] %v236_v15 }
  0xb4   :  { %v260_v16 = vpop.permute.xlu1 %259  ;;  %v252_v17 = vpop.permute.xlu0 %251 }
  0xb5   :  { %473 = vst [vmem:[%s801_s1 + $0xe8] sm:$0xff] %v260_v16  ;;  %471 = vst [vmem:[%s801_s1 + $0xa8] sm:$0xff] %v252_v17 }
  0xb8   :  { %v276_v18 = vpop.permute.xlu1 %275  ;;  %v268_v19 = vpop.permute.xlu0 %267 }
  0xb9   :  { %477 = vst [vmem:[%s801_s1 + $0x168] sm:$0xff] %v276_v18  ;;  %475 = vst [vmem:[%s801_s1 + $0x128] sm:$0xff] %v268_v19 }
  0xbc   :  { %v291_v20 = vpop.permute.xlu1 %290  ;;  %v283_v21 = vpop.permute.xlu0 %282 }
  0xbd   :  { %481 = vst [vmem:[%s801_s1 + $0x70] sm:$0xff] %v291_v20  ;;  %479 = vst [vmem:[%s801_s1 + $0x30] sm:$0xff] %v283_v21 }
  0xc0   :  { %v307_v22 = vpop.permute.xlu1 %306  ;;  %v299_v23 = vpop.permute.xlu0 %298 }
  0xc1   :  { %485 = vst [vmem:[%s801_s1 + $0xf0] sm:$0xff] %v307_v22  ;;  %483 = vst [vmem:[%s801_s1 + $0xb0] sm:$0xff] %v299_v23 }
  0xc4   :  { %v323_v24 = vpop.permute.xlu1 %322  ;;  %v315_v25 = vpop.permute.xlu0 %314 }
  0xc5   :  { %489 = vst [vmem:[%s801_s1 + $0x170] sm:$0xff] %v323_v24  ;;  %487 = vst [vmem:[%s801_s1 + $0x130] sm:$0xff] %v315_v25 }
  0xc8   :  { %v338_v26 = vpop.permute.xlu1 %337  ;;  %v330_v27 = vpop.permute.xlu0 %329 }
  0xc9   :  { %493 = vst [vmem:[%s801_s1 + $0x78] sm:$0xff] %v338_v26  ;;  %491 = vst [vmem:[%s801_s1 + $0x38] sm:$0xff] %v330_v27 }
  0xcc   :  { %v354_v28 = vpop.permute.xlu1 %353  ;;  %v346_v29 = vpop.permute.xlu0 %345 }
  0xcd   :  { %497 = vst [vmem:[%s801_s1 + $0xf8] sm:$0xff] %v354_v28  ;;  %495 = vst [vmem:[%s801_s1 + $0xb8] sm:$0xff] %v346_v29 }
  0xd0   :  { %v370_v30 = vpop.permute.xlu1 %369  ;;  %v362_v31 = vpop.permute.xlu0 %361 }
  0xd1   :  { %501 = vst [vmem:[%s801_s1 + $0x178] sm:$0xff] %v370_v30  ;;  %499 = vst [vmem:[%s801_s1 + $0x138] sm:$0xff] %v362_v31 }

// kernel: mul.113
= control target key start
LH: loop header
LB: loop body
LE: loop exit
PB: predicated region body
PF: predicated region fallthrough
CT: control target
= control target key end

     0   :  { %s352_s0 = inlined_call_operand.vmem [shape: f32[6,6], index: 0, kind: input, shape index: {}]   ;;  %s353_s1 = inlined_call_operand.vmem [shape: f32[6,32,6,8], index: 1, kind: output, shape index: {}]  }
   0x1   :  { %v130_v0 = vld [vmem:[%s352_s0 + $0x2] ss:$0 sm:$0xff]  ;;  %v4_v1 = vld [vmem:[%s352_s0] ss:$0 sm:$0xff]  ;;  %v132_v2 = vld [vmem:[%s352_s0 + $0x3] ss:$0 sm:$0xff] }
   0x2   :  { %19 = vbcast.lane.b32.xlu1 %v130_v0, 256  ;;  %6 = vbcast.lane.b32.xlu0 %v4_v1, 256  ;;  %v128_v3 = vld [vmem:[%s352_s0 + $0x1] ss:$0 sm:$0xff]  ;;  %v136_v4 = vld [vmem:[%s352_s0 + $0x5] ss:$0 sm:$0xff] }
   0x3   :  { %v134_v5 = vld [vmem:[%s352_s0 + $0x4] ss:$0 sm:$0xff] }
   0x6   :  { %26 = vbcast.lane.b32.xlu1 %v132_v2, 256  ;;  %12 = vbcast.lane.b32.xlu0 %v128_v3, 256 }
   0xa   :  { %40 = vbcast.lane.b32.xlu1 %v136_v4, 256  ;;  %33 = vbcast.lane.b32.xlu0 %v134_v5, 256 }
  0x74   :  { %v20_v6 = vpop.permute.xlu1 %19  ;;  %v7_v7 = vpop.permute.xlu0 %6 }
  0x75   :  { %131 = vst [vmem:[%s353_s1 + $0x80] sm:$0xff] %v20_v6  ;;  %140 = vst [vmem:[%s353_s1 + $0x88] sm:$0xff] %v20_v6 }
  0x76   :  { %146 = vst [vmem:[%s353_s1 + $0x90] sm:$0xff] %v20_v6  ;;  %152 = vst [vmem:[%s353_s1 + $0x98] sm:$0xff] %v20_v6 }
  0x77   :  { %158 = vst [vmem:[%s353_s1 + $0xa0] sm:$0xff] %v20_v6  ;;  %164 = vst [vmem:[%s353_s1 + $0xa8] sm:$0xff] %v20_v6 }
  0x78   :  { %170 = vst [vmem:[%s353_s1 + $0xb0] sm:$0xff] %v20_v6  ;;  %176 = vst [vmem:[%s353_s1 + $0xb8] sm:$0xff] %v20_v6  ;;  %v27_v8 = vpop.permute.xlu1 %26  ;;  %v13_v9 = vpop.permute.xlu0 %12 }
  0x79   :  { %8 = vst [vmem:[%s353_s1] sm:$0xff] %v7_v7  ;;  %138 = vst [vmem:[%s353_s1 + $0x8] sm:$0xff] %v7_v7 }
  0x7a   :  { %144 = vst [vmem:[%s353_s1 + $0x10] sm:$0xff] %v7_v7  ;;  %150 = vst [vmem:[%s353_s1 + $0x18] sm:$0xff] %v7_v7 }
  0x7b   :  { %156 = vst [vmem:[%s353_s1 + $0x20] sm:$0xff] %v7_v7  ;;  %162 = vst [vmem:[%s353_s1 + $0x28] sm:$0xff] %v7_v7 }
  0x7c   :  { %168 = vst [vmem:[%s353_s1 + $0x30] sm:$0xff] %v7_v7  ;;  %174 = vst [vmem:[%s353_s1 + $0x38] sm:$0xff] %v7_v7  ;;  %v41_v10 = vpop.permute.xlu1 %40  ;;  %v34_v11 = vpop.permute.xlu0 %33 }
  0x7d   :  { %133 = vst [vmem:[%s353_s1 + $0xc0] sm:$0xff] %v27_v8  ;;  %141 = vst [vmem:[%s353_s1 + $0xc8] sm:$0xff] %v27_v8 }
  0x7e   :  { %147 = vst [vmem:[%s353_s1 + $0xd0] sm:$0xff] %v27_v8  ;;  %153 = vst [vmem:[%s353_s1 + $0xd8] sm:$0xff] %v27_v8 }
  0x7f   :  { %159 = vst [vmem:[%s353_s1 + $0xe0] sm:$0xff] %v27_v8  ;;  %165 = vst [vmem:[%s353_s1 + $0xe8] sm:$0xff] %v27_v8 }
  0x80   :  { %171 = vst [vmem:[%s353_s1 + $0xf0] sm:$0xff] %v27_v8  ;;  %177 = vst [vmem:[%s353_s1 + $0xf8] sm:$0xff] %v27_v8 }
  0x81   :  { %129 = vst [vmem:[%s353_s1 + $0x40] sm:$0xff] %v13_v9  ;;  %139 = vst [vmem:[%s353_s1 + $0x48] sm:$0xff] %v13_v9 }
  0x82   :  { %145 = vst [vmem:[%s353_s1 + $0x50] sm:$0xff] %v13_v9  ;;  %151 = vst [vmem:[%s353_s1 + $0x58] sm:$0xff] %v13_v9 }
  0x83   :  { %157 = vst [vmem:[%s353_s1 + $0x60] sm:$0xff] %v13_v9  ;;  %163 = vst [vmem:[%s353_s1 + $0x68] sm:$0xff] %v13_v9 }
  0x84   :  { %169 = vst [vmem:[%s353_s1 + $0x70] sm:$0xff] %v13_v9  ;;  %175 = vst [vmem:[%s353_s1 + $0x78] sm:$0xff] %v13_v9 }
  0x85   :  { %137 = vst [vmem:[%s353_s1 + $0x140] sm:$0xff] %v41_v10  ;;  %143 = vst [vmem:[%s353_s1 + $0x148] sm:$0xff] %v41_v10 }
  0x86   :  { %149 = vst [vmem:[%s353_s1 + $0x150] sm:$0xff] %v41_v10  ;;  %155 = vst [vmem:[%s353_s1 + $0x158] sm:$0xff] %v41_v10 }
  0x87   :  { %161 = vst [vmem:[%s353_s1 + $0x160] sm:$0xff] %v41_v10  ;;  %167 = vst [vmem:[%s353_s1 + $0x168] sm:$0xff] %v41_v10 }
  0x88   :  { %173 = vst [vmem:[%s353_s1 + $0x170] sm:$0xff] %v41_v10  ;;  %179 = vst [vmem:[%s353_s1 + $0x178] sm:$0xff] %v41_v10 }
  0x89   :  { %135 = vst [vmem:[%s353_s1 + $0x100] sm:$0xff] %v34_v11  ;;  %142 = vst [vmem:[%s353_s1 + $0x108] sm:$0xff] %v34_v11 }
  0x8a   :  { %148 = vst [vmem:[%s353_s1 + $0x110] sm:$0xff] %v34_v11  ;;  %154 = vst [vmem:[%s353_s1 + $0x118] sm:$0xff] %v34_v11 }
  0x8b   :  { %160 = vst [vmem:[%s353_s1 + $0x120] sm:$0xff] %v34_v11  ;;  %166 = vst [vmem:[%s353_s1 + $0x128] sm:$0xff] %v34_v11 }
  0x8c   :  { %172 = vst [vmem:[%s353_s1 + $0x130] sm:$0xff] %v34_v11  ;;  %178 = vst [vmem:[%s353_s1 + $0x138] sm:$0xff] %v34_v11 }

// kernel: mul.110
= control target key start
LH: loop header
LB: loop body
LE: loop exit
PB: predicated region body
PF: predicated region fallthrough
CT: control target
= control target key end

     0   :  { %s882_s0 = inlined_call_operand.vmem [shape: f32[4,4], index: 0, kind: input, shape index: {}]   ;;  %s883_s1 = inlined_call_operand.vmem [shape: f32[4,32,4,32], index: 1, kind: output, shape index: {}]  }
   0x1   :  { %v280_v0 = vld [vmem:[%s882_s0 + $0x2] ss:$0 sm:$0xff]  ;;  %v4_v1 = vld [vmem:[%s882_s0] ss:$0 sm:$0xff]  ;;  %v282_v2 = vld [vmem:[%s882_s0 + $0x3] ss:$0 sm:$0xff] }
   0x2   :  { %19 = vbcast.lane.b32.xlu1 %v280_v0, 256  ;;  %6 = vbcast.lane.b32.xlu0 %v4_v1, 256  ;;  %v278_v3 = vld [vmem:[%s882_s0 + $0x1] ss:$0 sm:$0xff] }
   0x6   :  { %26 = vbcast.lane.b32.xlu1 %v282_v2, 256  ;;  %12 = vbcast.lane.b32.xlu0 %v278_v3, 256 }
  0x74   :  { %v430_v4 = vpop.permute.xlu1 %19  ;;  %v7_v5 = vpop.permute.xlu0 %6 }
  0x75   :  { %8 = vst [vmem:[%s883_s1] sm:$0xf] %v7_v5  ;;  %281 = vst [vmem:[%s883_s1 + $0x100] sm:$0xf] %v430_v4 }
  0x76   :  { %284 = vst [vmem:[%s883_s1 + $0x4] sm:$0xf] %v7_v5  ;;  %286 = vst [vmem:[%s883_s1 + $0x104] sm:$0xf] %v430_v4 }
  0x77   :  { %288 = vst [vmem:[%s883_s1 + $0x8] sm:$0xf] %v7_v5  ;;  %290 = vst [vmem:[%s883_s1 + $0x108] sm:$0xf] %v430_v4 }
  0x78   :  { %292 = vst [vmem:[%s883_s1 + $0xc] sm:$0xf] %v7_v5  ;;  %294 = vst [vmem:[%s883_s1 + $0x10c] sm:$0xf] %v430_v4  ;;  %v656_v6 = vpop.permute.xlu1 %26  ;;  %v13_v7 = vpop.permute.xlu0 %12 }
  0x79   :  { %296 = vst [vmem:[%s883_s1 + $0x10] sm:$0xf] %v7_v5  ;;  %298 = vst [vmem:[%s883_s1 + $0x110] sm:$0xf] %v430_v4 }
  0x7a   :  { %300 = vst [vmem:[%s883_s1 + $0x14] sm:$0xf] %v7_v5  ;;  %302 = vst [vmem:[%s883_s1 + $0x114] sm:$0xf] %v430_v4 }
  0x7b   :  { %304 = vst [vmem:[%s883_s1 + $0x18] sm:$0xf] %v7_v5  ;;  %306 = vst [vmem:[%s883_s1 + $0x118] sm:$0xf] %v430_v4 }
  0x7c   :  { %308 = vst [vmem:[%s883_s1 + $0x1c] sm:$0xf] %v7_v5  ;;  %310 = vst [vmem:[%s883_s1 + $0x11c] sm:$0xf] %v430_v4 }
  0x7d   :  { %312 = vst [vmem:[%s883_s1 + $0x20] sm:$0xf] %v7_v5  ;;  %314 = vst [vmem:[%s883_s1 + $0x120] sm:$0xf] %v430_v4 }
  0x7e   :  { %316 = vst [vmem:[%s883_s1 + $0x24] sm:$0xf] %v7_v5  ;;  %318 = vst [vmem:[%s883_s1 + $0x124] sm:$0xf] %v430_v4 }
  0x7f   :  { %320 = vst [vmem:[%s883_s1 + $0x28] sm:$0xf] %v7_v5  ;;  %322 = vst [vmem:[%s883_s1 + $0x128] sm:$0xf] %v430_v4 }
  0x80   :  { %324 = vst [vmem:[%s883_s1 + $0x2c] sm:$0xf] %v7_v5  ;;  %326 = vst [vmem:[%s883_s1 + $0x12c] sm:$0xf] %v430_v4 }
  0x81   :  { %328 = vst [vmem:[%s883_s1 + $0x30] sm:$0xf] %v7_v5  ;;  %330 = vst [vmem:[%s883_s1 + $0x130] sm:$0xf] %v430_v4 }
  0x82   :  { %332 = vst [vmem:[%s883_s1 + $0x34] sm:$0xf] %v7_v5  ;;  %334 = vst [vmem:[%s883_s1 + $0x134] sm:$0xf] %v430_v4 }
  0x83   :  { %336 = vst [vmem:[%s883_s1 + $0x38] sm:$0xf] %v7_v5  ;;  %338 = vst [vmem:[%s883_s1 + $0x138] sm:$0xf] %v430_v4 }
  0x84   :  { %340 = vst [vmem:[%s883_s1 + $0x3c] sm:$0xf] %v7_v5  ;;  %342 = vst [vmem:[%s883_s1 + $0x13c] sm:$0xf] %v430_v4 }
  0x85   :  { %344 = vst [vmem:[%s883_s1 + $0x40] sm:$0xf] %v7_v5  ;;  %346 = vst [vmem:[%s883_s1 + $0x140] sm:$0xf] %v430_v4 }
  0x86   :  { %348 = vst [vmem:[%s883_s1 + $0x44] sm:$0xf] %v7_v5  ;;  %350 = vst [vmem:[%s883_s1 + $0x144] sm:$0xf] %v430_v4 }
  0x87   :  { %352 = vst [vmem:[%s883_s1 + $0x48] sm:$0xf] %v7_v5  ;;  %354 = vst [vmem:[%s883_s1 + $0x148] sm:$0xf] %v430_v4 }
  0x88   :  { %356 = vst [vmem:[%s883_s1 + $0x4c] sm:$0xf] %v7_v5  ;;  %358 = vst [vmem:[%s883_s1 + $0x14c] sm:$0xf] %v430_v4 }
  0x89   :  { %360 = vst [vmem:[%s883_s1 + $0x50] sm:$0xf] %v7_v5  ;;  %362 = vst [vmem:[%s883_s1 + $0x150] sm:$0xf] %v430_v4 }
  0x8a   :  { %364 = vst [vmem:[%s883_s1 + $0x54] sm:$0xf] %v7_v5  ;;  %366 = vst [vmem:[%s883_s1 + $0x154] sm:$0xf] %v430_v4 }
  0x8b   :  { %368 = vst [vmem:[%s883_s1 + $0x58] sm:$0xf] %v7_v5  ;;  %370 = vst [vmem:[%s883_s1 + $0x158] sm:$0xf] %v430_v4 }
  0x8c   :  { %372 = vst [vmem:[%s883_s1 + $0x5c] sm:$0xf] %v7_v5  ;;  %374 = vst [vmem:[%s883_s1 + $0x15c] sm:$0xf] %v430_v4 }
  0x8d   :  { %376 = vst [vmem:[%s883_s1 + $0x60] sm:$0xf] %v7_v5  ;;  %378 = vst [vmem:[%s883_s1 + $0x160] sm:$0xf] %v430_v4 }
  0x8e   :  { %380 = vst [vmem:[%s883_s1 + $0x64] sm:$0xf] %v7_v5  ;;  %382 = vst [vmem:[%s883_s1 + $0x164] sm:$0xf] %v430_v4 }
  0x8f   :  { %384 = vst [vmem:[%s883_s1 + $0x68] sm:$0xf] %v7_v5  ;;  %386 = vst [vmem:[%s883_s1 + $0x168] sm:$0xf] %v430_v4 }
  0x90   :  { %388 = vst [vmem:[%s883_s1 + $0x6c] sm:$0xf] %v7_v5  ;;  %390 = vst [vmem:[%s883_s1 + $0x16c] sm:$0xf] %v430_v4 }
  0x91   :  { %392 = vst [vmem:[%s883_s1 + $0x70] sm:$0xf] %v7_v5  ;;  %394 = vst [vmem:[%s883_s1 + $0x170] sm:$0xf] %v430_v4 }
  0x92   :  { %396 = vst [vmem:[%s883_s1 + $0x74] sm:$0xf] %v7_v5  ;;  %398 = vst [vmem:[%s883_s1 + $0x174] sm:$0xf] %v430_v4 }
  0x93   :  { %400 = vst [vmem:[%s883_s1 + $0x78] sm:$0xf] %v7_v5  ;;  %402 = vst [vmem:[%s883_s1 + $0x178] sm:$0xf] %v430_v4 }
  0x94   :  { %404 = vst [vmem:[%s883_s1 + $0x7c] sm:$0xf] %v7_v5  ;;  %406 = vst [vmem:[%s883_s1 + $0x17c] sm:$0xf] %v430_v4 }
  0x95   :  { %279 = vst [vmem:[%s883_s1 + $0x80] sm:$0xf] %v13_v7  ;;  %283 = vst [vmem:[%s883_s1 + $0x180] sm:$0xf] %v656_v6 }
  0x96   :  { %285 = vst [vmem:[%s883_s1 + $0x84] sm:$0xf] %v13_v7  ;;  %287 = vst [vmem:[%s883_s1 + $0x184] sm:$0xf] %v656_v6 }
  0x97   :  { %289 = vst [vmem:[%s883_s1 + $0x88] sm:$0xf] %v13_v7  ;;  %291 = vst [vmem:[%s883_s1 + $0x188] sm:$0xf] %v656_v6 }
  0x98   :  { %293 = vst [vmem:[%s883_s1 + $0x8c] sm:$0xf] %v13_v7  ;;  %295 = vst [vmem:[%s883_s1 + $0x18c] sm:$0xf] %v656_v6 }
  0x99   :  { %297 = vst [vmem:[%s883_s1 + $0x90] sm:$0xf] %v13_v7  ;;  %299 = vst [vmem:[%s883_s1 + $0x190] sm:$0xf] %v656_v6 }
  0x9a   :  { %301 = vst [vmem:[%s883_s1 + $0x94] sm:$0xf] %v13_v7  ;;  %303 = vst [vmem:[%s883_s1 + $0x194] sm:$0xf] %v656_v6 }
  0x9b   :  { %305 = vst [vmem:[%s883_s1 + $0x98] sm:$0xf] %v13_v7  ;;  %307 = vst [vmem:[%s883_s1 + $0x198] sm:$0xf] %v656_v6 }
  0x9c   :  { %309 = vst [vmem:[%s883_s1 + $0x9c] sm:$0xf] %v13_v7  ;;  %311 = vst [vmem:[%s883_s1 + $0x19c] sm:$0xf] %v656_v6 }
  0x9d   :  { %313 = vst [vmem:[%s883_s1 + $0xa0] sm:$0xf] %v13_v7  ;;  %315 = vst [vmem:[%s883_s1 + $0x1a0] sm:$0xf] %v656_v6 }
  0x9e   :  { %317 = vst [vmem:[%s883_s1 + $0xa4] sm:$0xf] %v13_v7  ;;  %319 = vst [vmem:[%s883_s1 + $0x1a4] sm:$0xf] %v656_v6 }
  0x9f   :  { %321 = vst [vmem:[%s883_s1 + $0xa8] sm:$0xf] %v13_v7  ;;  %323 = vst [vmem:[%s883_s1 + $0x1a8] sm:$0xf] %v656_v6 }
  0xa0   :  { %325 = vst [vmem:[%s883_s1 + $0xac] sm:$0xf] %v13_v7  ;;  %327 = vst [vmem:[%s883_s1 + $0x1ac] sm:$0xf] %v656_v6 }
  0xa1   :  { %329 = vst [vmem:[%s883_s1 + $0xb0] sm:$0xf] %v13_v7  ;;  %331 = vst [vmem:[%s883_s1 + $0x1b0] sm:$0xf] %v656_v6 }
  0xa2   :  { %333 = vst [vmem:[%s883_s1 + $0xb4] sm:$0xf] %v13_v7  ;;  %335 = vst [vmem:[%s883_s1 + $0x1b4] sm:$0xf] %v656_v6 }
  0xa3   :  { %337 = vst [vmem:[%s883_s1 + $0xb8] sm:$0xf] %v13_v7  ;;  %339 = vst [vmem:[%s883_s1 + $0x1b8] sm:$0xf] %v656_v6 }
  0xa4   :  { %341 = vst [vmem:[%s883_s1 + $0xbc] sm:$0xf] %v13_v7  ;;  %343 = vst [vmem:[%s883_s1 + $0x1bc] sm:$0xf] %v656_v6 }
  0xa5   :  { %345 = vst [vmem:[%s883_s1 + $0xc0] sm:$0xf] %v13_v7  ;;  %347 = vst [vmem:[%s883_s1 + $0x1c0] sm:$0xf] %v656_v6 }
  0xa6   :  { %349 = vst [vmem:[%s883_s1 + $0xc4] sm:$0xf] %v13_v7  ;;  %351 = vst [vmem:[%s883_s1 + $0x1c4] sm:$0xf] %v656_v6 }
  0xa7   :  { %353 = vst [vmem:[%s883_s1 + $0xc8] sm:$0xf] %v13_v7  ;;  %355 = vst [vmem:[%s883_s1 + $0x1c8] sm:$0xf] %v656_v6 }
  0xa8   :  { %357 = vst [vmem:[%s883_s1 + $0xcc] sm:$0xf] %v13_v7  ;;  %359 = vst [vmem:[%s883_s1 + $0x1cc] sm:$0xf] %v656_v6 }
  0xa9   :  { %361 = vst [vmem:[%s883_s1 + $0xd0] sm:$0xf] %v13_v7  ;;  %363 = vst [vmem:[%s883_s1 + $0x1d0] sm:$0xf] %v656_v6 }
  0xaa   :  { %365 = vst [vmem:[%s883_s1 + $0xd4] sm:$0xf] %v13_v7  ;;  %367 = vst [vmem:[%s883_s1 + $0x1d4] sm:$0xf] %v656_v6 }
  0xab   :  { %369 = vst [vmem:[%s883_s1 + $0xd8] sm:$0xf] %v13_v7  ;;  %371 = vst [vmem:[%s883_s1 + $0x1d8] sm:$0xf] %v656_v6 }
  0xac   :  { %373 = vst [vmem:[%s883_s1 + $0xdc] sm:$0xf] %v13_v7  ;;  %375 = vst [vmem:[%s883_s1 + $0x1dc] sm:$0xf] %v656_v6 }
  0xad   :  { %377 = vst [vmem:[%s883_s1 + $0xe0] sm:$0xf] %v13_v7  ;;  %379 = vst [vmem:[%s883_s1 + $0x1e0] sm:$0xf] %v656_v6 }
  0xae   :  { %381 = vst [vmem:[%s883_s1 + $0xe4] sm:$0xf] %v13_v7  ;;  %383 = vst [vmem:[%s883_s1 + $0x1e4] sm:$0xf] %v656_v6 }
  0xaf   :  { %385 = vst [vmem:[%s883_s1 + $0xe8] sm:$0xf] %v13_v7  ;;  %387 = vst [vmem:[%s883_s1 + $0x1e8] sm:$0xf] %v656_v6 }
  0xb0   :  { %389 = vst [vmem:[%s883_s1 + $0xec] sm:$0xf] %v13_v7  ;;  %391 = vst [vmem:[%s883_s1 + $0x1ec] sm:$0xf] %v656_v6 }
  0xb1   :  { %393 = vst [vmem:[%s883_s1 + $0xf0] sm:$0xf] %v13_v7  ;;  %395 = vst [vmem:[%s883_s1 + $0x1f0] sm:$0xf] %v656_v6 }
  0xb2   :  { %397 = vst [vmem:[%s883_s1 + $0xf4] sm:$0xf] %v13_v7  ;;  %399 = vst [vmem:[%s883_s1 + $0x1f4] sm:$0xf] %v656_v6 }
  0xb3   :  { %401 = vst [vmem:[%s883_s1 + $0xf8] sm:$0xf] %v13_v7  ;;  %403 = vst [vmem:[%s883_s1 + $0x1f8] sm:$0xf] %v656_v6 }
  0xb4   :  { %405 = vst [vmem:[%s883_s1 + $0xfc] sm:$0xf] %v13_v7  ;;  %407 = vst [vmem:[%s883_s1 + $0x1fc] sm:$0xf] %v656_v6 }

// kernel: net_forward.1
= control target key start
LH: loop header
LB: loop body
LE: loop exit
PB: predicated region body
PF: predicated region fallthrough
CT: control target
= control target key end

     0   :  { %vm61_vm0 = vcmask 130048   ;;  %v3365_v22 = vmov 0.0   ;;  %vm3366_vm1 = vmmov 0   ;;  %v229_v62 = vlaneseq  ;;  %s3367_s10 = smov 96   ;;  %s3368_s11 = smov 32   ;;  %s4699_s2 = inlined_call_operand.vmem [shape: f32[1264,256], index: 2, kind: input, shape index: {}]   ;;  %s4700_s0 = inlined_call_operand.vmem [shape: f32[32,16], index: 0, kind: input, shape index: {}]   ;;  %s4701_s1 = inlined_call_operand.vmem [shape: f32[32,192], index: 1, kind: input, shape index: {}]   ;;  %s4702_s3 = inlined_call_operand.vmem [shape: f32[32,128], index: 3, kind: output, shape index: {}]  }
   0x1   :  { %v27_v0 = vld [vmem:[%s4699_s2 + $0x10] sm:$0xff]  ;;  %v26_v1 = vld [vmem:[%s4699_s2] sm:$0xff]  ;;  %v3406_v3 = vld [vmem:[%s4700_s0 + $0x8] sm:$0xff]  ;;  %2830 = vmatprep.subr.mxu1 %v3365_v22  ;;  %2838 = vmatprep.mubr.msk.f32.mxu1 %vm3366_vm1, %v3365_v22  ;;  %s3369_s12 = smov 64   ;;  %vm257_vm2 = vcmask 261120   ;;  %vm259_vm3 = vcmask 523264  }
   0x2   :  { %v3399_v2 = vld [vmem:[%s4700_s0] sm:$0xff]  ;;  %2820 = vmatprep.subr.mxu0 %v27_v0  ;;  %v43_v4 = vld [vmem:[%s4699_s2 + $0x530] sm:$0xff]  ;;  %v3426_v7 = vld [vmem:[%s4700_s0 + $0x18] sm:$0xff]  ;;  %v3624_v63 = vshrl.u32 %v229_v62, 7  ;;  %vm261_vm4 = vcmask 785408   ;;  %vm376_vm7 = vcmask 523520  }
   0x3   :  { %2824 = vmatprep.mubr.msk.f32.mxu0 %vm61_vm0, %v3399_v2  ;;  %2821 = vmatpush3.msra.mxu0 %v27_v0  ;;  %v3414_v5 = vld [vmem:[%s4700_s0 + $0x10] sm:$0xff]  ;;  %v42_v6 = vld [vmem:[%s4699_s2 + $0x520] sm:$0xff]  ;;  %vm389_vm8 = vcmask 785920   ;;  %vm402_vm10 = vcmask 1048320  }
   0x4   :  { %2822 = vmatprep.subr.mxu0 %v26_v1  ;;  %v41_v8 = vld [vmem:[%s4699_s2 + $0x510] sm:$0xff]  ;;  %v40_v9 = vld [vmem:[%s4699_s2 + $0x500] sm:$0xff]  ;;  %v3627_v0 = vsub.s32 3, %v3624_v63 }
   0x5   :  { %2823 = vmatpush3.msra.mxu0 %v26_v1  ;;  %v39_v10 = vld [vmem:[%s4699_s2 + $0x4f0] sm:$0xff]  ;;  %v38_v11 = vld [vmem:[%s4699_s2 + $0x4e0] sm:$0xff]  ;;  %v3630_v1 = vsub.s32 1, %v3624_v63 }
   0x6   :  { %2825 = vmatmul.mubr.msk.f32.vlgmr.msra.gmra.mxu0 %vm61_vm0, %v3406_v3  ;;  %2841 = vmatprep.subr.mxu0 %v43_v4  ;;  %v37_v12 = vld [vmem:[%s4699_s2 + $0x4d0] sm:$0xff]  ;;  %v36_v13 = vld [vmem:[%s4699_s2 + $0x4c0] sm:$0xff] }
   0x7   :  { %2827 = vmatprep.mubr.msk.f32.mxu0 %vm61_vm0, %v3414_v5  ;;  %2842 = vmatpush3.msra.mxu0 %v43_v4  ;;  %v35_v14 = vld [vmem:[%s4699_s2 + $0x4b0] sm:$0xff]  ;;  %v34_v15 = vld [vmem:[%s4699_s2 + $0x4a0] sm:$0xff] }
   0x8   :  { %2843 = vmatprep.subr.mxu0 %v42_v6  ;;  %v33_v16 = vld [vmem:[%s4699_s2 + $0x490] sm:$0xff]  ;;  %v32_v17 = vld [vmem:[%s4699_s2 + $0x480] sm:$0xff] }
   0x9   :  { %2844 = vmatpush3.msra.mxu0 %v42_v6  ;;  %v31_v18 = vld [vmem:[%s4699_s2 + $0x470] sm:$0xff]  ;;  %v30_v19 = vld [vmem:[%s4699_s2 + $0x460] sm:$0xff] }
   0xa   :  { %2828 = vmatmul.mubr.msk.f32.gmra.mxu0 %vm61_vm0, %v3426_v7  ;;  %2845 = vmatprep.subr.mxu0 %v41_v8  ;;  %v29_v20 = vld [vmem:[%s4699_s2 + $0x450] sm:$0xff]  ;;  %v28_v21 = vld [vmem:[%s4699_s2 + $0x440] sm:$0xff] }
   0xb   :  { %2846 = vmatpush3.msra.mxu0 %v41_v8  ;;  %v592_v27 = vld [vmem:[%s4699_s2 + $0x30] sm:$0xff]  ;;  %v44_v28 = vld [vmem:[%s4699_s2 + $0x6a0] sm:$0xf]  ;;  %v3642_v8 = vsub.s32 0, %v3624_v63 }
   0xc   :  { %2847 = vmatprep.subr.mxu0 %v40_v9  ;;  %v591_v29 = vld [vmem:[%s4699_s2 + $0x20] sm:$0xff]  ;;  %v3513_v31 = vld [vmem:[%s4699_s2 + $0x7b0] sm:$0xff] }
   0xd   :  { %2848 = vmatpush3.msra.mxu0 %v40_v9  ;;  %v3506_v30 = vld [vmem:[%s4699_s2 + $0x7c0] sm:$0xff]  ;;  %v3529_v35 = vld [vmem:[%s4699_s2 + $0x790] sm:$0xff] }
   0xe   :  { %2849 = vmatprep.subr.mxu0 %v39_v10  ;;  %v3520_v33 = vld [vmem:[%s4699_s2 + $0x7a0] sm:$0xff]  ;;  %v3547_v39 = vld [vmem:[%s4699_s2 + $0x770] sm:$0xff] }
   0xf   :  { %2850 = vmatpush3.msra.mxu0 %v39_v10  ;;  %v3538_v37 = vld [vmem:[%s4699_s2 + $0x780] sm:$0xff]  ;;  %v3561_v43 = vld [vmem:[%s4699_s2 + $0x750] sm:$0xff] }
  0x10   :  { %2851 = vmatprep.subr.mxu0 %v38_v11  ;;  %v3554_v41 = vld [vmem:[%s4699_s2 + $0x760] sm:$0xff]  ;;  %v3575_v47 = vld [vmem:[%s4699_s2 + $0x730] sm:$0xff] }
  0x11   :  { %2852 = vmatpush3.msra.mxu0 %v38_v11  ;;  %v3568_v45 = vld [vmem:[%s4699_s2 + $0x740] sm:$0xff]  ;;  %v3589_v51 = vld [vmem:[%s4699_s2 + $0x710] sm:$0xff] }
  0x12   :  { %2853 = vmatprep.subr.mxu0 %v37_v12  ;;  %v3582_v49 = vld [vmem:[%s4699_s2 + $0x720] sm:$0xff]  ;;  %v3603_v55 = vld [vmem:[%s4699_s2 + $0x6f0] sm:$0xff] }
  0x13   :  { %2854 = vmatpush3.msra.mxu0 %v37_v12  ;;  %v3596_v53 = vld [vmem:[%s4699_s2 + $0x700] sm:$0xff]  ;;  %v3617_v59 = vld [vmem:[%s4699_s2 + $0x6d0] sm:$0xff] }
  0x14   :  { %2855 = vmatprep.subr.mxu0 %v36_v13  ;;  %v3610_v57 = vld [vmem:[%s4699_s2 + $0x6e0] sm:$0xff] }
  0x15   :  { %2856 = vmatpush3.msra.mxu0 %v36_v13 }
  0x16   :  { %2857 = vmatprep.subr.mxu0 %v35_v14 }
  0x17   :  { %2858 = vmatpush3.msra.mxu0 %v35_v14 }
  0x18   :  { %2859 = vmatprep.subr.mxu0 %v34_v15 }
  0x19   :  { %2860 = vmatpush3.msra.mxu0 %v34_v15 }
  0x1a   :  { %2861 = vmatprep.subr.mxu0 %v33_v16 }
  0x1b   :  { %2862 = vmatpush3.msra.mxu0 %v33_v16 }
  0x1c   :  { %2863 = vmatprep.subr.mxu0 %v32_v17 }
  0x1d   :  { %2864 = vmatpush3.msra.mxu0 %v32_v17 }
  0x1e   :  { %2865 = vmatprep.subr.mxu0 %v31_v18 }
  0x1f   :  { %2866 = vmatpush3.msra.mxu0 %v31_v18 }
  0x20   :  { %2867 = vmatprep.subr.mxu0 %v30_v19 }
  0x21   :  { %2868 = vmatpush3.msra.mxu0 %v30_v19 }
  0x22   :  { %2869 = vmatprep.subr.mxu0 %v29_v20 }
  0x23   :  { %2870 = vmatpush3.msra.mxu0 %v29_v20 }
  0x24   :  { %2871 = vmatprep.subr.mxu0 %v28_v21 }
  0x25   :  { %2872 = vmatpush3.msra.mxu0 %v28_v21 }
  0xc6   :  { %v3475_v23 = vpop.f32.mrf.mxu0 }
  0xc7   :  { %v588_v36 = vmul.f32 %v3475_v23, %v3520_v33  ;;  %v584_v44 = vmul.f32 %v3475_v23, %v3554_v41  ;;  %v580_v52 = vmul.f32 %v3475_v23, %v3582_v49  ;;  %v576_v60 = vmul.f32 %v3475_v23, %v3610_v57 }
  0xc8   :  { %v3477_v24 = vpop.f32.mrf.mxu0 }
  0xc9   :  { %2873 = vmatprep.mubr.f32.mxu0 %v3477_v24  ;;  %v587_v38 = vmul.f32 %v3477_v24, %v3529_v35  ;;  %v583_v46 = vmul.f32 %v3477_v24, %v3561_v43  ;;  %v579_v54 = vmul.f32 %v3477_v24, %v3589_v51  ;;  %v575_v61 = vmul.f32 %v3477_v24, %v3617_v59 }
  0xca   :  { %v3480_v25 = vpop.f32.mrf.mxu0  ;;  %2874 = vmatmul.mubr.f32.vlgmr.msra.gmra.mxu0 %v3475_v23 }
  0xcb   :  { %2831 = vmatpush3.xpose.msra.mxu1 %v3480_v25  ;;  %v590_v32 = vmul.f32 %v3480_v25, %v3506_v30  ;;  %v586_v40 = vmul.f32 %v3480_v25, %v3538_v37  ;;  %v582_v48 = vmul.f32 %v3480_v25, %v3568_v45  ;;  %v578_v56 = vmul.f32 %v3480_v25, %v3596_v53 }
  0xcc   :  { %v3484_v26 = vpop.f32.mrf.mxu0  ;;  %2832 = vmatprep.subr.mxu1 %v3365_v22 }
  0xcd   :  { %2876 = vmatprep.mubr.f32.mxu0 %v3484_v26  ;;  %v589_v34 = vmul.f32 %v3484_v26, %v3513_v31  ;;  %v585_v42 = vmul.f32 %v3484_v26, %v3547_v39  ;;  %v581_v50 = vmul.f32 %v3484_v26, %v3575_v47  ;;  %v577_v58 = vmul.f32 %v3484_v26, %v3603_v55 }
  0xce   :  { %2877 = vmatmul.mubr.f32.gmra.mxu0 %v3480_v25 }
  0xcf   :  { %2833 = vmatpush3.xpose.msra.mxu1 %v3484_v26 }
  0xd0   :  { %2834 = vmatprep.subr.mxu1 %v3365_v22 }
  0xd3   :  { %2835 = vmatpush3.xpose.msra.mxu1 %v3475_v23  ;;  %v18_v23 = vld [vmem:[%s4701_s1] sm:$0xff] }
  0xd4   :  { %2836 = vmatprep.subr.mxu1 %v3365_v22 }
  0xd7   :  { %2837 = vmatpush3.xpose.msra.mxu1 %v3477_v24 }
  0xd8   :  { %2879 = vmatprep.subr.mxu1 %v592_v27 }
  0xda   :  { %2839 = vmatmul.mubr.f32.vlgmr.msra.gmra.mxu1 %v44_v28 }
  0xdb   :  { %2880 = vmatpush3.msra.mxu1 %v592_v27  ;;  %2883 = vmatprep.mubr.msk.f32.mxu1 %vm61_vm0, %v3399_v2  ;;  %v3654_v27 = vld [vmem:[%s4701_s1 + $0x10] sm:$0xff] }
  0xdc   :  { %2881 = vmatprep.subr.mxu1 %v591_v29 }
  0xdd   :  { %2882 = vmatpush3.msra.mxu1 %v591_v29 }
  0xde   :  { %2889 = vmatprep.subr.mxu1 %v590_v32  ;;  %2884 = vmatmul.mubr.msk.f32.vlgmr.msra.gmra.mxu1 %vm61_vm0, %v3406_v3 }
  0xdf   :  { %2890 = vmatpush3.msra.mxu1 %v590_v32  ;;  %2886 = vmatprep.mubr.msk.f32.mxu1 %vm61_vm0, %v3414_v5  ;;  %v3635_v5 = vsub.s32 2, %v3624_v63 }
  0xe0   :  { %2891 = vmatprep.subr.mxu1 %v589_v34 }
  0xe1   :  { %2892 = vmatpush3.msra.mxu1 %v589_v34 }
  0xe2   :  { %2893 = vmatprep.subr.mxu1 %v588_v36  ;;  %2887 = vmatmul.mubr.msk.f32.gmra.mxu1 %vm61_vm0, %v3426_v7 }
  0xe3   :  { %2894 = vmatpush3.msra.mxu1 %v588_v36 }
  0xe4   :  { %2895 = vmatprep.subr.mxu1 %v587_v38 }
  0xe5   :  { %2896 = vmatpush3.msra.mxu1 %v587_v38 }
  0xe6   :  { %2897 = vmatprep.subr.mxu1 %v586_v40 }
  0xe7   :  { %2898 = vmatpush3.msra.mxu1 %v586_v40 }
  0xe8   :  { %2899 = vmatprep.subr.mxu1 %v585_v42 }
  0xe9   :  { %2900 = vmatpush3.msra.mxu1 %v585_v42 }
  0xea   :  { %2901 = vmatprep.subr.mxu1 %v584_v44 }
  0xeb   :  { %2902 = vmatpush3.msra.mxu1 %v584_v44 }
  0xec   :  { %2903 = vmatprep.subr.mxu1 %v583_v46 }
  0xed   :  { %2904 = vmatpush3.msra.mxu1 %v583_v46 }
  0xee   :  { %2905 = vmatprep.subr.mxu1 %v582_v48 }
  0xef   :  { %2906 = vmatpush3.msra.mxu1 %v582_v48 }
  0xf0   :  { %2907 = vmatprep.subr.mxu1 %v581_v50 }
  0xf1   :  { %2908 = vmatpush3.msra.mxu1 %v581_v50 }
  0xf2   :  { %2909 = vmatprep.subr.mxu1 %v580_v52 }
  0xf3   :  { %2910 = vmatpush3.msra.mxu1 %v580_v52 }
  0xf4   :  { %2911 = vmatprep.subr.mxu1 %v579_v54 }
  0xf5   :  { %2912 = vmatpush3.msra.mxu1 %v579_v54 }
  0xf6   :  { %2913 = vmatprep.subr.mxu1 %v578_v56 }
  0xf7   :  { %2914 = vmatpush3.msra.mxu1 %v578_v56  ;;  %v3671_v56 = vld [vmem:[%s4701_s1 + $0x20] sm:$0xff] }
  0xf8   :  { %2915 = vmatprep.subr.mxu1 %v577_v58 }
  0xf9   :  { %2916 = vmatpush3.msra.mxu1 %v577_v58 }
  0xfa   :  { %2917 = vmatprep.subr.mxu1 %v576_v60 }
  0xfb   :  { %2918 = vmatpush3.msra.mxu1 %v576_v60 }
  0xfc   :  { %2919 = vmatprep.subr.mxu1 %v575_v61 }
  0xfd   :  { %2920 = vmatpush3.msra.mxu1 %v575_v61 }
  0xfe   :  { %2965 = vmatprep.subr.mxu1 %v3365_v22 }
 0x18a   :  { %v2875_v10 = vpop.f32.mrf.mxu0 }
 0x18c   :  { %v329_v16 = vpop.f32.mrf.mxu0 }
 0x18e   :  { %v2878_v24 = vpop.f32.mrf.mxu0 }
 0x190   :  { %v339_v29 = vpop.f32.mrf.mxu0 }
 0x19a   :  { %v225_v2 = vpop.f32.mrf.mxu1 }
 0x19b   :  { %v244_v3 = vrot.slane %v225_v2, %v3627_v0  ;;  %v236_v4 = vrot.slane %v225_v2, %v3630_v1  ;;  %v240_v7 = vrot.slane %v225_v2, %v3635_v5  ;;  %v232_v11 = vrot.slane %v225_v2, %v3642_v8  ;;  %v3680_v2 = vld [vmem:[%s4701_s1 + $0x30] sm:$0xff] }
 0x19c   :  { %v2840_v6 = vpop.f32.mrf.mxu1 }
 0x19d   :  { %254 = vrot.lane.b32.xlu1 %v244_v3, %s3367_s10  ;;  %246 = vrot.lane.b32.xlu0 %v236_v4, %s3368_s11 }
 0x1a1   :  { %250 = vrot.lane.b32.xlu0 %v240_v7, %s3369_s12 }
 0x20f   :  { %v247_v9 = vpop.permute.xlu0 %246  ;;  %v255_v14 = vpop.permute.xlu1 %254 }
 0x210   :  { %v258_v12 = vsel %vm257_vm2, %v232_v11, %v247_v9 }
 0x213   :  { %v251_v13 = vpop.permute.xlu0 %250 }
 0x214   :  { %v260_v15 = vsel %vm259_vm3, %v258_v12, %v251_v13 }
 0x215   :  { %v262_v17 = vsel %vm261_vm4, %v260_v15, %v255_v14 }
 0x216   :  { %v330_v18 = vadd.f32 %v329_v16, %v262_v17  ;;  %v335_v19 = vadd.f32 %v2875_v10, %v262_v17  ;;  %v340_v38 = vadd.f32 %v339_v29, %v262_v17  ;;  %v345_v44 = vadd.f32 %v2878_v24, %v262_v17 }
 0x218   :  { %vm348_vm5 = vcmp.gt.f32.partialorder %v330_v18, 0.0  ;;  %vm349_vm6 = vcmp.gt.f32.partialorder %v335_v19, 0.0  ;;  %v352_v20 = vmul.f32 0.2, %v330_v18  ;;  %v353_v21 = vmul.f32 0.2, %v335_v19 }
 0x219   :  { %v354_v46 = vmul.f32 0.2, %v340_v38  ;;  %vm350_vm9 = vcmp.gt.f32.partialorder %v340_v38, 0.0  ;;  %v355_v52 = vmul.f32 0.2, %v345_v44  ;;  %vm351_vm11 = vcmp.gt.f32.partialorder %v345_v44, 0.0 }
 0x21a   :  { %v356_v25 = vsel %vm348_vm5, %v330_v18, %v352_v20  ;;  %v357_v26 = vsel %vm349_vm6, %v335_v19, %v353_v21 }
 0x21b   :  { %v3656_v28 = vadd.f32 %v356_v25, %v18_v23  ;;  %v361_v36 = vadd.f32 %v357_v26, %v3654_v27  ;;  %v358_v54 = vsel %vm350_vm9, %v340_v38, %v354_v46  ;;  %v359_v62 = vsel %vm351_vm11, %v345_v44, %v355_v52 }
 0x21c   :  { %v362_v61 = vadd.f32 %v358_v54, %v3671_v56  ;;  %v363_v6 = vadd.f32 %v359_v62, %v3680_v2 }
 0x21d   :  { %v377_v32 = vsel %vm376_vm7, %v3656_v28, -inf  ;;  %v364_v34 = vsel %vm257_vm2, %v3656_v28, -inf  ;;  %v367_v40 = vsel %vm257_vm2, %v361_v36, -inf  ;;  %v380_v42 = vsel %vm376_vm7, %v361_v36, -inf }
 0x21e   :  { %378 = vmax.xlane.f32.xlu0 %v377_v32  ;;  %365 = vmax.xlane.f32.xlu1 %v364_v34  ;;  %v390_v48 = vsel %vm389_vm8, %v3656_v28, -inf  ;;  %v393_v50 = vsel %vm389_vm8, %v361_v36, -inf  ;;  %v403_v58 = vsel %vm402_vm10, %v3656_v28, -inf  ;;  %v406_v60 = vsel %vm402_vm10, %v361_v36, -inf }
 0x21f   :  { %v370_v3 = vsel %vm257_vm2, %v362_v61, -inf  ;;  %v383_v4 = vsel %vm376_vm7, %v362_v61, -inf  ;;  %v373_v7 = vsel %vm257_vm2, %v363_v6, -inf  ;;  %v386_v9 = vsel %vm376_vm7, %v363_v6, -inf }
 0x220   :  { %v396_v10 = vsel %vm389_vm8, %v362_v61, -inf  ;;  %v399_v11 = vsel %vm389_vm8, %v363_v6, -inf  ;;  %v409_v12 = vsel %vm402_vm10, %v362_v61, -inf  ;;  %v412_v13 = vsel %vm402_vm10, %v363_v6, -inf }
 0x222   :  { %368 = vmax.xlane.f32.xlu0 %v367_v40  ;;  %381 = vmax.xlane.f32.xlu1 %v380_v42 }
 0x226   :  { %391 = vmax.xlane.f32.xlu0 %v390_v48  ;;  %394 = vmax.xlane.f32.xlu1 %v393_v50 }
 0x22a   :  { %404 = vmax.xlane.f32.xlu0 %v403_v58  ;;  %407 = vmax.xlane.f32.xlu1 %v406_v60 }
 0x22e   :  { %371 = vmax.xlane.f32.xlu0 %v370_v3  ;;  %384 = vmax.xlane.f32.xlu1 %v383_v4 }
 0x232   :  { %374 = vmax.xlane.f32.xlu0 %v373_v7  ;;  %387 = vmax.xlane.f32.xlu1 %v386_v9 }
 0x236   :  { %397 = vmax.xlane.f32.xlu0 %v396_v10  ;;  %400 = vmax.xlane.f32.xlu1 %v399_v11 }
 0x23a   :  { %410 = vmax.xlane.f32.xlu0 %v409_v12  ;;  %413 = vmax.xlane.f32.xlu1 %v412_v13 }
 0x2a7   :  { %v379_v14 = vpop.xlane.xlu0 %378  ;;  %v366_v15 = vpop.xlane.xlu1 %365 }
 0x2a8   :  { %v415_v20 = vsel %vm257_vm2, %v366_v15, %v379_v14 }
 0x2ab   :  { %v369_v16 = vpop.xlane.xlu0 %368  ;;  %v382_v17 = vpop.xlane.xlu1 %381 }
 0x2ac   :  { %v416_v21 = vsel %vm257_vm2, %v369_v16, %v382_v17 }
 0x2af   :  { %v392_v18 = vpop.xlane.xlu0 %391  ;;  %v395_v19 = vpop.xlane.xlu1 %394 }
 0x2b0   :  { %v419_v23 = vsel %vm259_vm3, %v415_v20, %v392_v18  ;;  %v420_v24 = vsel %vm259_vm3, %v416_v21, %v395_v19 }
 0x2b3   :  { %v405_v25 = vpop.xlane.xlu0 %404  ;;  %v408_v26 = vpop.xlane.xlu1 %407 }
 0x2b4   :  { %v423_v29 = vsel %vm261_vm4, %v419_v23, %v405_v25  ;;  %v424_v32 = vsel %vm261_vm4, %v420_v24, %v408_v26 }
 0x2b5   :  { %v427_v34 = vsub.f32 %v3656_v28, %v423_v29  ;;  %v428_v38 = vsub.f32 %v361_v36, %v424_v32 }
 0x2b7   :  { %v431_v40 = vmul.f32 1.442695, %v427_v34  ;;  %v433_v42 = vmul.f32 1.442695, %v428_v38  ;;  %v372_v44 = vpop.xlane.xlu0 %371  ;;  %v385_v46 = vpop.xlane.xlu1 %384 }
 0x2b8   :  { %v417_v58 = vsel %vm257_vm2, %v372_v44, %v385_v46 }
 0x2b9   :  { %3200 = vpow2.f32 %v431_v40 }
 0x2ba   :  { %3202 = vpow2.f32 %v433_v42 }
 0x2bb   :  { %v375_v48 = vpop.xlane.xlu0 %374  ;;  %v388_v50 = vpop.xlane.xlu1 %387 }
 0x2bc   :  { %v418_v60 = vsel %vm257_vm2, %v375_v48, %v388_v50 }
 0x2bf   :  { %v398_v52 = vpop.xlane.xlu0 %397  ;;  %v401_v54 = vpop.xlane.xlu1 %400 }
 0x2c0   :  { %v421_v62 = vsel %vm259_vm3, %v417_v58, %v398_v52  ;;  %v422_v3 = vsel %vm259_vm3, %v418_v60, %v401_v54 }
 0x2c3   :  { %v411_v28 = vpop.xlane.xlu0 %410  ;;  %v414_v36 = vpop.xlane.xlu1 %413 }
 0x2c4   :  { %v425_v4 = vsel %vm261_vm4, %v421_v62, %v411_v28  ;;  %v426_v7 = vsel %vm261_vm4, %v422_v3, %v414_v36  ;;  %v807_v36 = vld [vmem:[%s4699_s2 + $0x130] sm:$0xff] }
 0x2c5   :  { %v429_v9 = vsub.f32 %v362_v61, %v425_v4  ;;  %v430_v10 = vsub.f32 %v363_v6, %v426_v7  ;;  %v806_v4 = vld [vmem:[%s4699_s2 + $0x120] sm:$0xff]  ;;  %2927 = vmatprep.subr.mxu0 %v807_v36 }
 0x2c6   :  { %v3704_v11 = vpop.eup %3200  ;;  %2928 = vmatpush3.msra.mxu0 %v807_v36 }
 0x2c7   :  { %v3706_v12 = vpop.eup %3202  ;;  %v435_v13 = vmul.f32 1.442695, %v429_v9  ;;  %v437_v14 = vmul.f32 1.442695, %v430_v10  ;;  %463 = vrot.lane.b32.xlu0 %v3704_v11, %s3367_s10  ;;  %v439_v17 = vsel %vm257_vm2, %v3704_v11, 0.0  ;;  %2929 = vmatprep.subr.mxu0 %v806_v4 }
 0x2c8   :  { %465 = vrot.lane.b32.xlu1 %v3706_v12, %s3367_s10  ;;  %v442_v15 = vsel %vm257_vm2, %v3706_v12, 0.0  ;;  %2930 = vmatpush3.msra.mxu0 %v806_v4 }
 0x2c9   :  { %3204 = vpow2.f32 %v435_v13 }
 0x2ca   :  { %3206 = vpow2.f32 %v437_v14 }
 0x2cb   :  { %497 = vrot.lane.b32.xlu0 %v3706_v12, %s3369_s12 }
 0x2cc   :  { %495 = vrot.lane.b32.xlu1 %v3704_v11, %s3369_s12 }
 0x2cf   :  { %529 = vrot.lane.b32.xlu0 %v3706_v12, %s3368_s11 }
 0x2d0   :  { %527 = vrot.lane.b32.xlu1 %v3704_v11, %s3368_s11 }
 0x2d6   :  { %v3720_v61 = vpop.eup %3204 }
 0x2d7   :  { %v3722_v6 = vpop.eup %3206  ;;  %467 = vrot.lane.b32.xlu1 %v3720_v61, %s3367_s10  ;;  %v445_v16 = vsel %vm257_vm2, %v3720_v61, 0.0 }
 0x2d8   :  { %469 = vrot.lane.b32.xlu0 %v3722_v6, %s3367_s10  ;;  %v448_v18 = vsel %vm257_vm2, %v3722_v6, 0.0 }
 0x2db   :  { %499 = vrot.lane.b32.xlu1 %v3720_v61, %s3369_s12 }
 0x2dc   :  { %501 = vrot.lane.b32.xlu0 %v3722_v6, %s3369_s12 }
 0x2df   :  { %531 = vrot.lane.b32.xlu1 %v3720_v61, %s3368_s11 }
 0x2e0   :  { %533 = vrot.lane.b32.xlu0 %v3722_v6, %s3368_s11 }
 0x2ff   :  { %443 = vadd.xlane.f32.xlu0 %v442_v15 }
 0x303   :  { %446 = vadd.xlane.f32.xlu0 %v445_v16  ;;  %440 = vadd.xlane.f32.xlu1 %v439_v17 }
 0x307   :  { %449 = vadd.xlane.f32.xlu0 %v448_v18 }
 0x339   :  { %v464_v19 = vpop.permute.xlu0 %463 }
 0x33a   :  { %v466_v20 = vpop.permute.xlu1 %465  ;;  %v475_v21 = vsel %vm257_vm2, %v464_v19, 0.0 }
 0x33b   :  { %476 = vadd.xlane.f32.xlu0 %v475_v21  ;;  %v478_v23 = vsel %vm257_vm2, %v466_v20, 0.0 }
 0x33c   :  { %479 = vadd.xlane.f32.xlu1 %v478_v23 }
 0x33d   :  { %v498_v24 = vpop.permute.xlu0 %497 }
 0x33e   :  { %v496_v25 = vpop.permute.xlu1 %495  ;;  %v510_v26 = vsel %vm257_vm2, %v498_v24, 0.0 }
 0x33f   :  { %v507_v29 = vsel %vm257_vm2, %v496_v25, 0.0 }
 0x340   :  { %511 = vadd.xlane.f32.xlu1 %v510_v26  ;;  %508 = vadd.xlane.f32.xlu0 %v507_v29 }
 0x341   :  { %v530_v32 = vpop.permute.xlu0 %529 }
 0x342   :  { %v528_v34 = vpop.permute.xlu1 %527  ;;  %v542_v38 = vsel %vm257_vm2, %v530_v32, 0.0 }
 0x343   :  { %v539_v40 = vsel %vm257_vm2, %v528_v34, 0.0 }
 0x344   :  { %543 = vadd.xlane.f32.xlu1 %v542_v38  ;;  %540 = vadd.xlane.f32.xlu0 %v539_v40 }
 0x349   :  { %v468_v42 = vpop.permute.xlu1 %467 }
 0x34a   :  { %v470_v44 = vpop.permute.xlu0 %469  ;;  %v481_v46 = vsel %vm257_vm2, %v468_v42, 0.0 }
 0x34b   :  { %482 = vadd.xlane.f32.xlu1 %v481_v46  ;;  %v484_v52 = vsel %vm257_vm2, %v470_v44, 0.0 }
 0x34d   :  { %v500_v48 = vpop.permute.xlu1 %499 }
 0x34e   :  { %v502_v50 = vpop.permute.xlu0 %501  ;;  %v513_v54 = vsel %vm257_vm2, %v500_v48, 0.0 }
 0x34f   :  { %485 = vadd.xlane.f32.xlu1 %v484_v52  ;;  %514 = vadd.xlane.f32.xlu0 %v513_v54  ;;  %v516_v60 = vsel %vm257_vm2, %v502_v50, 0.0 }
 0x351   :  { %v532_v58 = vpop.permute.xlu1 %531 }
 0x352   :  { %v545_v62 = vsel %vm257_vm2, %v532_v58, 0.0  ;;  %v534_v3 = vpop.permute.xlu0 %533 }
 0x353   :  { %517 = vadd.xlane.f32.xlu1 %v516_v60  ;;  %546 = vadd.xlane.f32.xlu0 %v545_v62  ;;  %v548_v28 = vsel %vm257_vm2, %v534_v3, 0.0 }
 0x357   :  { %549 = vadd.xlane.f32.xlu1 %v548_v28 }
 0x388   :  { %v444_v7 = vpop.xlane.xlu0 %443 }
 0x38c   :  { %v447_v9 = vpop.xlane.xlu0 %446  ;;  %v441_v13 = vpop.xlane.xlu1 %440 }
 0x38d   :  { %3208 = vrcp.f32 %v441_v13 }
 0x390   :  { %v450_v10 = vpop.xlane.xlu0 %449 }
 0x39a   :  { %v3209_v21 = vpop.eup %3208 }
 0x3c4   :  { %v477_v14 = vpop.xlane.xlu0 %476 }
 0x3c5   :  { %v480_v15 = vpop.xlane.xlu1 %479  ;;  %3210 = vrcp.f32 %v477_v14 }
 0x3c6   :  { %3212 = vrcp.f32 %v480_v15 }
 0x3c9   :  { %v509_v16 = vpop.xlane.xlu0 %508  ;;  %v512_v17 = vpop.xlane.xlu1 %511 }
 0x3ca   :  { %3214 = vrcp.f32 %v509_v16 }
 0x3cb   :  { %3216 = vrcp.f32 %v512_v17 }
 0x3cc   :  { %3218 = vrcp.f32 %v444_v7 }
 0x3cd   :  { %v541_v18 = vpop.xlane.xlu0 %540  ;;  %v544_v19 = vpop.xlane.xlu1 %543 }
 0x3ce   :  { %3220 = vrcp.f32 %v541_v18 }
 0x3cf   :  { %3222 = vrcp.f32 %v544_v19 }
 0x3d2   :  { %v3211_v23 = vpop.eup %3210 }
 0x3d3   :  { %v3213_v24 = vpop.eup %3212  ;;  %v559_v38 = vsel %vm257_vm2, %v3209_v21, %v3211_v23  ;;  %v805_v21 = vld [vmem:[%s4699_s2 + $0x110] sm:$0xff]  ;;  %v802_v23 = vld [vmem:[%s4699_s2 + $0xe0] sm:$0xff] }
 0x3d4   :  { %v483_v20 = vpop.xlane.xlu1 %482  ;;  %2931 = vmatprep.subr.mxu0 %v805_v21 }
 0x3d5   :  { %3224 = vrcp.f32 %v483_v20  ;;  %2932 = vmatpush3.msra.mxu0 %v805_v21 }
 0x3d7   :  { %v3215_v25 = vpop.eup %3214 }
 0x3d8   :  { %v515_v26 = vpop.xlane.xlu0 %514  ;;  %v486_v29 = vpop.xlane.xlu1 %485  ;;  %v563_v42 = vsel %vm259_vm3, %v559_v38, %v3215_v25  ;;  %v800_v25 = vld [vmem:[%s4699_s2 + $0xc0] sm:$0xff]  ;;  %v795_v38 = vld [vmem:[%s4699_s2 + $0x70] sm:$0xff] }
 0x3d9   :  { %v3217_v32 = vpop.eup %3216  ;;  %3226 = vrcp.f32 %v515_v26  ;;  %v799_v26 = vld [vmem:[%s4699_s2 + $0xb0] sm:$0xff] }
 0x3da   :  { %v3219_v34 = vpop.eup %3218  ;;  %3228 = vrcp.f32 %v447_v9 }
 0x3db   :  { %v3221_v40 = vpop.eup %3220  ;;  %v560_v44 = vsel %vm257_vm2, %v3219_v34, %v3213_v24  ;;  %3230 = vrcp.f32 %v486_v29  ;;  %v801_v24 = vld [vmem:[%s4699_s2 + $0xd0] sm:$0xff]  ;;  %v798_v29 = vld [vmem:[%s4699_s2 + $0xa0] sm:$0xff] }
 0x3dc   :  { %v3223_v46 = vpop.eup %3222  ;;  %v547_v48 = vpop.xlane.xlu0 %546  ;;  %v567_v52 = vsel %vm261_vm4, %v563_v42, %v3221_v40  ;;  %v564_v54 = vsel %vm259_vm3, %v560_v44, %v3217_v32  ;;  %v797_v32 = vld [vmem:[%s4699_s2 + $0x90] sm:$0xff]  ;;  %v796_v34 = vld [vmem:[%s4699_s2 + $0x80] sm:$0xff] }
 0x3dd   :  { %v518_v50 = vpop.xlane.xlu1 %517  ;;  %3232 = vrcp.f32 %v547_v48  ;;  %v571_v58 = vmul.f32 %v3704_v11, %v567_v52  ;;  %v568_v60 = vsel %vm261_vm4, %v564_v54, %v3223_v46  ;;  %v794_v40 = vld [vmem:[%s4699_s2 + $0x60] sm:$0xff]  ;;  %v793_v42 = vld [vmem:[%s4699_s2 + $0x50] sm:$0xff]  ;;  %v2885_v48 = vpop.f32.mrf.mxu1 }
 0x3de   :  { %3234 = vrcp.f32 %v518_v50  ;;  %v572_v62 = vmul.f32 %v3706_v12, %v568_v60  ;;  %v792_v44 = vld [vmem:[%s4699_s2 + $0x40] sm:$0xff]  ;;  %v823_v46 = vld [vmem:[%s4699_s2 + $0x630] sm:$0xff] }
 0x3df   :  { %3236 = vrcp.f32 %v450_v10  ;;  %2921 = vmatprep.mubr.f32.mxu1 %v571_v58  ;;  %v659_v50 = vpop.f32.mrf.mxu1  ;;  %v763_v60 = vld [vmem:[%s4699_s2 + $0x9b0] ss:$0 sm:$0xff] }
 0x3e0   :  { %2922 = vmatmul.mubr.f32.vlgmr.msra.gmra.mxu1 %v572_v62 }
 0x3e1   :  { %v550_v3 = vpop.xlane.xlu1 %549  ;;  %v2888_v52 = vpop.f32.mrf.mxu1 }
 0x3e2   :  { %3238 = vrcp.f32 %v550_v3  ;;  %v3225_v28 = vpop.eup %3224 }
 0x3e3   :  { %v669_v54 = vpop.f32.mrf.mxu1 }
 0x3e6   :  { %v3227_v36 = vpop.eup %3226 }
 0x3e7   :  { %v3229_v4 = vpop.eup %3228 }
 0x3e8   :  { %v3231_v7 = vpop.eup %3230  ;;  %v561_v9 = vsel %vm257_vm2, %v3229_v4, %v3225_v28 }
 0x3e9   :  { %v565_v14 = vsel %vm259_vm3, %v561_v9, %v3227_v36 }
 0x3ea   :  { %v3233_v13 = vpop.eup %3232 }
 0x3eb   :  { %v3235_v11 = vpop.eup %3234  ;;  %v569_v15 = vsel %vm261_vm4, %v565_v14, %v3233_v13 }
 0x3ec   :  { %v3237_v16 = vpop.eup %3236  ;;  %v573_v12 = vmul.f32 %v3720_v61, %v569_v15  ;;  %v804_v61 = vld [vmem:[%s4699_s2 + $0x100] sm:$0xff] }
 0x3ed   :  { %v562_v10 = vsel %vm257_vm2, %v3237_v16, %v3231_v7  ;;  %2933 = vmatprep.subr.mxu0 %v804_v61 }
 0x3ee   :  { %2924 = vmatprep.mubr.f32.mxu1 %v573_v12  ;;  %v566_v18 = vsel %vm259_vm3, %v562_v10, %v3235_v11  ;;  %2934 = vmatpush3.msra.mxu0 %v804_v61 }
 0x3ef   :  { %v3239_v17 = vpop.eup %3238 }
 0x3f0   :  { %v570_v19 = vsel %vm261_vm4, %v566_v18, %v3239_v17 }
 0x3f1   :  { %v574_v20 = vmul.f32 %v3722_v6, %v570_v19  ;;  %v803_v6 = vld [vmem:[%s4699_s2 + $0xf0] sm:$0xff] }
 0x3f2   :  { %2935 = vmatprep.subr.mxu0 %v803_v6 }
 0x3f3   :  { %2925 = vmatmul.mubr.f32.gmra.mxu1 %v574_v20  ;;  %2936 = vmatpush3.msra.mxu0 %v803_v6 }
 0x3f4   :  { %2973 = vmatprep.mubr.msk.f32.mxu1 %vm3366_vm1, %v3365_v22  ;;  %2937 = vmatprep.subr.mxu0 %v802_v23 }
 0x3f5   :  { %2938 = vmatpush3.msra.mxu0 %v802_v23 }
 0x3f6   :  { %2939 = vmatprep.subr.mxu0 %v801_v24 }
 0x3f7   :  { %2940 = vmatpush3.msra.mxu0 %v801_v24 }
 0x3f8   :  { %2941 = vmatprep.subr.mxu0 %v800_v25 }
 0x3f9   :  { %2942 = vmatpush3.msra.mxu0 %v800_v25 }
 0x3fa   :  { %2943 = vmatprep.subr.mxu0 %v799_v26 }
 0x3fb   :  { %2944 = vmatpush3.msra.mxu0 %v799_v26 }
 0x3fc   :  { %2945 = vmatprep.subr.mxu0 %v798_v29 }
 0x3fd   :  { %2946 = vmatpush3.msra.mxu0 %v798_v29  ;;  %v822_v29 = vld [vmem:[%s4699_s2 + $0x620] sm:$0xff] }
 0x3fe   :  { %2947 = vmatprep.subr.mxu0 %v797_v32 }
 0x3ff   :  { %2948 = vmatpush3.msra.mxu0 %v797_v32  ;;  %v821_v32 = vld [vmem:[%s4699_s2 + $0x610] sm:$0xff] }
 0x400   :  { %2949 = vmatprep.subr.mxu0 %v796_v34 }
 0x401   :  { %2950 = vmatpush3.msra.mxu0 %v796_v34  ;;  %v820_v34 = vld [vmem:[%s4699_s2 + $0x600] sm:$0xff] }
 0x402   :  { %2951 = vmatprep.subr.mxu0 %v795_v38 }
 0x403   :  { %2952 = vmatpush3.msra.mxu0 %v795_v38  ;;  %v819_v38 = vld [vmem:[%s4699_s2 + $0x5f0] sm:$0xff] }
 0x404   :  { %2953 = vmatprep.subr.mxu0 %v794_v40 }
 0x405   :  { %2954 = vmatpush3.msra.mxu0 %v794_v40  ;;  %v818_v40 = vld [vmem:[%s4699_s2 + $0x5e0] sm:$0xff] }
 0x406   :  { %2955 = vmatprep.subr.mxu0 %v793_v42 }
 0x407   :  { %2956 = vmatpush3.msra.mxu0 %v793_v42  ;;  %v817_v42 = vld [vmem:[%s4699_s2 + $0x5d0] sm:$0xff] }
 0x408   :  { %2957 = vmatprep.subr.mxu0 %v792_v44 }
 0x409   :  { %2958 = vmatpush3.msra.mxu0 %v792_v44 }
 0x40a   :  { %2976 = vmatprep.subr.mxu0 %v823_v46 }
 0x4a0   :  { %v2923_v58 = vpop.f32.mrf.mxu1 }
 0x4a1   :  { %v750_v62 = vadd.f32 %v2923_v58, %v2885_v48  ;;  %v814_v58 = vld [vmem:[%s4699_s2 + $0x5a0] sm:$0xff] }
 0x4a2   :  { %v744_v3 = vpop.f32.mrf.mxu1 }
 0x4a3   :  { %v765_v28 = vadd.f32 %v763_v60, %v750_v62  ;;  %v745_v36 = vadd.f32 %v744_v3, %v659_v50  ;;  %v813_v3 = vld [vmem:[%s4699_s2 + $0x590] sm:$0xff] }
 0x4a5   :  { %v773_v4 = vmin.f32 %v765_v28, 0.0  ;;  %v764_v7 = vadd.f32 %v763_v60, %v745_v36  ;;  %vm769_vm13 = vcmp.gt.f32.partialorder %v765_v28, 0.0  ;;  %v811_v36 = vld [vmem:[%s4699_s2 + $0x570] sm:$0xff] }
 0x4a7   :  { %v778_v9 = vmul.f32 1.442695, %v773_v4  ;;  %v772_v13 = vmin.f32 %v764_v7, 0.0  ;;  %vm768_vm12 = vcmp.gt.f32.partialorder %v764_v7, 0.0  ;;  %v810_v4 = vld [vmem:[%s4699_s2 + $0x560] sm:$0xff] }
 0x4a9   :  { %3240 = vpow2.f32 %v778_v9  ;;  %v776_v14 = vmul.f32 1.442695, %v772_v13  ;;  %v808_v9 = vld [vmem:[%s4699_s2 + $0x540] sm:$0xff] }
 0x4ab   :  { %3242 = vpow2.f32 %v776_v14 }
 0x4b3   :  { %v2926_v11 = vpop.f32.mrf.mxu1 }
 0x4b4   :  { %v760_v15 = vadd.f32 %v2926_v11, %v2888_v52  ;;  %v815_v52 = vld [vmem:[%s4699_s2 + $0x5b0] sm:$0xff] }
 0x4b5   :  { %v754_v16 = vpop.f32.mrf.mxu1 }
 0x4b6   :  { %v767_v12 = vadd.f32 %v763_v60, %v760_v15  ;;  %v755_v10 = vadd.f32 %v754_v16, %v669_v54  ;;  %v3241_v17 = vpop.eup %3240 }
 0x4b7   :  { %v2599_v21 = vadd.f32 -1.0, %v3241_v17 }
 0x4b8   :  { %v775_v18 = vmin.f32 %v767_v12, 0.0  ;;  %v766_v19 = vadd.f32 %v763_v60, %v755_v10  ;;  %v3243_v20 = vpop.eup %3242  ;;  %vm771_vm15 = vcmp.gt.f32.partialorder %v767_v12, 0.0 }
 0x4b9   :  { %v2598_v23 = vadd.f32 -1.0, %v3243_v20  ;;  %v3831_v26 = vsel %vm769_vm13, %v765_v28, %v2599_v21  ;;  %v812_v28 = vld [vmem:[%s4699_s2 + $0x580] sm:$0xff]  ;;  %v1347_v21 = vld [vmem:[%s4699_s2 + $0x1f0] sm:$0xff] }
 0x4ba   :  { %v782_v61 = vmul.f32 1.442695, %v775_v18  ;;  %v774_v6 = vmin.f32 %v766_v19, 0.0  ;;  %vm770_vm14 = vcmp.gt.f32.partialorder %v766_v19, 0.0  ;;  %v1348_v20 = vld [vmem:[%s4699_s2 + $0x200] sm:$0xff] }
 0x4bb   :  { %v3828_v25 = vsel %vm768_vm12, %v764_v7, %v2598_v23  ;;  %v809_v7 = vld [vmem:[%s4699_s2 + $0x550] sm:$0xff]  ;;  %v1344_v23 = vld [vmem:[%s4699_s2 + $0x1c0] sm:$0xff] }
 0x4bc   :  { %3244 = vpow2.f32 %v782_v61  ;;  %v780_v24 = vmul.f32 1.442695, %v774_v6  ;;  %2959 = vmatprep.mubr.f32.mxu0 %v3828_v25  ;;  %v1346_v61 = vld [vmem:[%s4699_s2 + $0x1e0] sm:$0xff]  ;;  %v1345_v6 = vld [vmem:[%s4699_s2 + $0x1d0] sm:$0xff] }
 0x4bd   :  { %2960 = vmatmul.mubr.f32.vlgmr.msra.gmra.mxu0 %v3831_v26 }
 0x4be   :  { %3246 = vpow2.f32 %v780_v24  ;;  %2977 = vmatpush3.msra.mxu0 %v823_v46  ;;  %v816_v46 = vld [vmem:[%s4699_s2 + $0x5c0] sm:$0xff]  ;;  %v1343_v24 = vld [vmem:[%s4699_s2 + $0x1b0] sm:$0xff] }
 0x4bf   :  { %2978 = vmatprep.subr.mxu0 %v822_v29 }
 0x4c0   :  { %2979 = vmatpush3.msra.mxu0 %v822_v29  ;;  %v1340_v29 = vld [vmem:[%s4699_s2 + $0x180] sm:$0xff] }
 0x4c1   :  { %2980 = vmatprep.subr.mxu0 %v821_v32 }
 0x4c2   :  { %2981 = vmatpush3.msra.mxu0 %v821_v32  ;;  %v1338_v32 = vld [vmem:[%s4699_s2 + $0x160] sm:$0xff] }
 0x4c3   :  { %2982 = vmatprep.subr.mxu0 %v820_v34 }
 0x4c4   :  { %2983 = vmatpush3.msra.mxu0 %v820_v34  ;;  %v1337_v34 = vld [vmem:[%s4699_s2 + $0x150] sm:$0xff] }
 0x4c5   :  { %2984 = vmatprep.subr.mxu0 %v819_v38 }
 0x4c6   :  { %2985 = vmatpush3.msra.mxu0 %v819_v38  ;;  %v1336_v38 = vld [vmem:[%s4699_s2 + $0x140] sm:$0xff] }
 0x4c7   :  { %2986 = vmatprep.subr.mxu0 %v818_v40 }
 0x4c8   :  { %2987 = vmatpush3.msra.mxu0 %v818_v40 }
 0x4c9   :  { %v3245_v44 = vpop.eup %3244  ;;  %2988 = vmatprep.subr.mxu0 %v817_v42 }
 0x4ca   :  { %v2601_v50 = vadd.f32 -1.0, %v3245_v44  ;;  %2989 = vmatpush3.msra.mxu0 %v817_v42 }
 0x4cb   :  { %v3247_v48 = vpop.eup %3246  ;;  %2990 = vmatprep.subr.mxu0 %v816_v46 }
 0x4cc   :  { %v2600_v54 = vadd.f32 -1.0, %v3247_v48  ;;  %2991 = vmatpush3.msra.mxu0 %v816_v46  ;;  %v3864_v62 = vsel %vm771_vm15, %v767_v12, %v2601_v50 }
 0x4cd   :  { %2992 = vmatprep.subr.mxu0 %v815_v52 }
 0x4ce   :  { %v3861_v60 = vsel %vm770_vm14, %v766_v19, %v2600_v54  ;;  %2993 = vmatpush3.msra.mxu0 %v815_v52  ;;  %vm1689_vm14 = vcmask 392192  }
 0x4cf   :  { %2962 = vmatprep.mubr.f32.mxu0 %v3861_v60  ;;  %2994 = vmatprep.subr.mxu0 %v814_v58 }
 0x4d0   :  { %2963 = vmatmul.mubr.f32.gmra.mxu0 %v3864_v62 }
 0x4d1   :  { %2995 = vmatpush3.msra.mxu0 %v814_v58 }
 0x4d2   :  { %2996 = vmatprep.subr.mxu0 %v813_v3 }
 0x4d3   :  { %2997 = vmatpush3.msra.mxu0 %v813_v3 }
 0x4d4   :  { %2998 = vmatprep.subr.mxu0 %v812_v28 }
 0x4d5   :  { %2999 = vmatpush3.msra.mxu0 %v812_v28 }
 0x4d6   :  { %3000 = vmatprep.subr.mxu0 %v811_v36 }
 0x4d7   :  { %3001 = vmatpush3.msra.mxu0 %v811_v36 }
 0x4d8   :  { %3002 = vmatprep.subr.mxu0 %v810_v4 }
 0x4d9   :  { %3003 = vmatpush3.msra.mxu0 %v810_v4 }
 0x4da   :  { %3004 = vmatprep.subr.mxu0 %v809_v7 }
 0x4db   :  { %3005 = vmatpush3.msra.mxu0 %v809_v7 }
 0x4dc   :  { %3006 = vmatprep.subr.mxu0 %v808_v9 }
 0x4dd   :  { %3007 = vmatpush3.msra.mxu0 %v808_v9 }
 0x57d   :  { %v3885_v13 = vpop.f32.mrf.mxu0 }
 0x57e   :  { %v1333_v10 = vmul.f32 %v3885_v13, %v3520_v33  ;;  %v1351_v33 = vld [vmem:[%s4699_s2 + $0x230] sm:$0xff] }
 0x57f   :  { %v3887_v14 = vpop.f32.mrf.mxu0 }
 0x580   :  { %3008 = vmatprep.mubr.f32.mxu0 %v3887_v14  ;;  %v1328_v18 = vmul.f32 %v3887_v14, %v3561_v43 }
 0x581   :  { %3009 = vmatmul.mubr.f32.vlgmr.msra.gmra.mxu0 %v3885_v13 }
 0x590   :  { %v3891_v11 = vpop.f32.mrf.mxu0 }
 0x591   :  { %2966 = vmatpush3.xpose.msra.mxu1 %v3891_v11  ;;  %v1335_v15 = vmul.f32 %v3891_v11, %v3506_v30  ;;  %v1332_v30 = vmul.f32 %v3887_v14, %v3529_v35  ;;  %v824_v35 = vld [vmem:[%s4699_s2 + $0x6b0] sm:$0xf]  ;;  %v1327_v19 = vmul.f32 %v3891_v11, %v3568_v45  ;;  %v1325_v45 = vmul.f32 %v3885_v13, %v3582_v49 }
 0x592   :  { %v3896_v16 = vpop.f32.mrf.mxu0  ;;  %2967 = vmatprep.subr.mxu1 %v3365_v22  ;;  %v1323_v49 = vmul.f32 %v3891_v11, %v3596_v53  ;;  %v1321_v53 = vmul.f32 %v3885_v13, %v3610_v57  ;;  %v1341_v57 = vld [vmem:[%s4699_s2 + $0x190] sm:$0xff] }
 0x593   :  { %3011 = vmatprep.mubr.f32.mxu0 %v3896_v16  ;;  %3052 = vmatprep.subr.mxu0 %v1335_v15  ;;  %v1334_v12 = vmul.f32 %v3896_v16, %v3513_v31  ;;  %v1331_v31 = vmul.f32 %v3891_v11, %v3538_v37  ;;  %v1330_v17 = vmul.f32 %v3896_v16, %v3547_v39  ;;  %v1350_v39 = vld [vmem:[%s4699_s2 + $0x220] sm:$0xff] }
 0x594   :  { %3012 = vmatmul.mubr.f32.gmra.mxu0 %v3891_v11  ;;  %v1329_v37 = vmul.f32 %v3885_v13, %v3554_v41  ;;  %v1349_v41 = vld [vmem:[%s4699_s2 + $0x210] sm:$0xff]  ;;  %v1326_v43 = vmul.f32 %v3896_v16, %v3575_v47  ;;  %v1324_v47 = vmul.f32 %v3887_v14, %v3589_v51  ;;  %v1322_v51 = vmul.f32 %v3896_v16, %v3603_v55 }
 0x595   :  { %3053 = vmatpush3.msra.mxu0 %v1335_v15  ;;  %2968 = vmatpush3.xpose.msra.mxu1 %v3896_v16  ;;  %v1320_v55 = vmul.f32 %v3887_v14, %v3617_v59  ;;  %v1339_v59 = vld [vmem:[%s4699_s2 + $0x170] sm:$0xff] }
 0x596   :  { %3054 = vmatprep.subr.mxu0 %v1334_v12  ;;  %2969 = vmatprep.subr.mxu1 %v3365_v22 }
 0x597   :  { %3055 = vmatpush3.msra.mxu0 %v1334_v12  ;;  %v3360_v12 = vld [vmem:[%s4701_s1] sm:$0xff] }
 0x598   :  { %3056 = vmatprep.subr.mxu0 %v1333_v10 }
 0x599   :  { %3057 = vmatpush3.msra.mxu0 %v1333_v10  ;;  %2970 = vmatpush3.xpose.msra.mxu1 %v3885_v13 }
 0x59a   :  { %3058 = vmatprep.subr.mxu0 %v1332_v30  ;;  %2971 = vmatprep.subr.mxu1 %v3365_v22 }
 0x59b   :  { %3059 = vmatpush3.msra.mxu0 %v1332_v30 }
 0x59c   :  { %3060 = vmatprep.subr.mxu0 %v1331_v31 }
 0x59d   :  { %3061 = vmatpush3.msra.mxu0 %v1331_v31  ;;  %2972 = vmatpush3.xpose.msra.mxu1 %v3887_v14 }
 0x59e   :  { %3062 = vmatprep.subr.mxu0 %v1330_v17  ;;  %3014 = vmatprep.subr.mxu1 %v1351_v33 }
 0x59f   :  { %3063 = vmatpush3.msra.mxu0 %v1330_v17 }
 0x5a0   :  { %3064 = vmatprep.subr.mxu0 %v1329_v37  ;;  %2974 = vmatmul.mubr.f32.vlgmr.msra.gmra.mxu1 %v824_v35 }
 0x5a1   :  { %3065 = vmatpush3.msra.mxu0 %v1329_v37  ;;  %3015 = vmatpush3.msra.mxu1 %v1351_v33 }
 0x5a2   :  { %3046 = vmatprep.mubr.f32.mxu1 %v3828_v25  ;;  %3066 = vmatprep.subr.mxu0 %v1328_v18  ;;  %v1342_v25 = vld [vmem:[%s4699_s2 + $0x1a0] sm:$0xff] }
 0x5a3   :  { %3016 = vmatprep.subr.mxu1 %v1350_v39  ;;  %3067 = vmatpush3.msra.mxu0 %v1328_v18 }
 0x5a4   :  { %3017 = vmatpush3.msra.mxu1 %v1350_v39  ;;  %3068 = vmatprep.subr.mxu0 %v1327_v19 }
 0x5a5   :  { %3018 = vmatprep.subr.mxu1 %v1349_v41  ;;  %3069 = vmatpush3.msra.mxu0 %v1327_v19 }
 0x5a6   :  { %3019 = vmatpush3.msra.mxu1 %v1349_v41  ;;  %3070 = vmatprep.subr.mxu0 %v1326_v43 }
 0x5a7   :  { %3020 = vmatprep.subr.mxu1 %v1348_v20  ;;  %3071 = vmatpush3.msra.mxu0 %v1326_v43 }
 0x5a8   :  { %3021 = vmatpush3.msra.mxu1 %v1348_v20  ;;  %3072 = vmatprep.subr.mxu0 %v1325_v45 }
 0x5a9   :  { %3022 = vmatprep.subr.mxu1 %v1347_v21  ;;  %3073 = vmatpush3.msra.mxu0 %v1325_v45 }
 0x5aa   :  { %3023 = vmatpush3.msra.mxu1 %v1347_v21  ;;  %3074 = vmatprep.subr.mxu0 %v1324_v47 }
 0x5ab   :  { %3024 = vmatprep.subr.mxu1 %v1346_v61  ;;  %3075 = vmatpush3.msra.mxu0 %v1324_v47 }
 0x5ac   :  { %3025 = vmatpush3.msra.mxu1 %v1346_v61  ;;  %3076 = vmatprep.subr.mxu0 %v1323_v49 }
 0x5ad   :  { %3026 = vmatprep.subr.mxu1 %v1345_v6  ;;  %3077 = vmatpush3.msra.mxu0 %v1323_v49 }
 0x5ae   :  { %3027 = vmatpush3.msra.mxu1 %v1345_v6  ;;  %3078 = vmatprep.subr.mxu0 %v1322_v51 }
 0x5af   :  { %3028 = vmatprep.subr.mxu1 %v1344_v23  ;;  %3079 = vmatpush3.msra.mxu0 %v1322_v51 }
 0x5b0   :  { %3029 = vmatpush3.msra.mxu1 %v1344_v23  ;;  %3080 = vmatprep.subr.mxu0 %v1321_v53 }
 0x5b1   :  { %3030 = vmatprep.subr.mxu1 %v1343_v24  ;;  %3081 = vmatpush3.msra.mxu0 %v1321_v53 }
 0x5b2   :  { %3031 = vmatpush3.msra.mxu1 %v1343_v24  ;;  %3082 = vmatprep.subr.mxu0 %v1320_v55 }
 0x5b3   :  { %3032 = vmatprep.subr.mxu1 %v1342_v25  ;;  %3083 = vmatpush3.msra.mxu0 %v1320_v55 }
 0x5b4   :  { %3033 = vmatpush3.msra.mxu1 %v1342_v25  ;;  %3128 = vmatprep.subr.mxu0 %v3365_v22 }
 0x5b5   :  { %3034 = vmatprep.subr.mxu1 %v1341_v57 }
 0x5b6   :  { %3035 = vmatpush3.msra.mxu1 %v1341_v57 }
 0x5b7   :  { %3036 = vmatprep.subr.mxu1 %v1340_v29 }
 0x5b8   :  { %3037 = vmatpush3.msra.mxu1 %v1340_v29 }
 0x5b9   :  { %3038 = vmatprep.subr.mxu1 %v1339_v59 }
 0x5ba   :  { %3039 = vmatpush3.msra.mxu1 %v1339_v59 }
 0x5bb   :  { %3040 = vmatprep.subr.mxu1 %v1338_v32 }
 0x5bc   :  { %3041 = vmatpush3.msra.mxu1 %v1338_v32 }
 0x5bd   :  { %3042 = vmatprep.subr.mxu1 %v1337_v34 }
 0x5be   :  { %3043 = vmatpush3.msra.mxu1 %v1337_v34 }
 0x5bf   :  { %3044 = vmatprep.subr.mxu1 %v1336_v38 }
 0x5c0   :  { %3045 = vmatpush3.msra.mxu1 %v1336_v38 }
 0x5c1   :  { %3047 = vmatmul.mubr.f32.vlgmr.msra.gmra.mxu1 %v3831_v26 }
 0x5c2   :  { %3049 = vmatprep.mubr.f32.mxu1 %v3861_v60 }
 0x5c5   :  { %3050 = vmatmul.mubr.f32.gmra.mxu1 %v3864_v62 }
 0x641   :  { %v3010_v50 = vpop.f32.mrf.mxu0 }
 0x643   :  { %v1077_v60 = vpop.f32.mrf.mxu0 }
 0x654   :  { %v3013_v36 = vpop.f32.mrf.mxu0 }
 0x656   :  { %v1087_v14 = vpop.f32.mrf.mxu0 }
 0x660   :  { %v976_v40 = vpop.f32.mrf.mxu1 }
 0x661   :  { %v991_v42 = vrot.slane %v976_v40, %v3635_v5  ;;  %v987_v44 = vrot.slane %v976_v40, %v3630_v1  ;;  %v995_v48 = vrot.slane %v976_v40, %v3627_v0  ;;  %v983_v26 = vrot.slane %v976_v40, %v3642_v8 }
 0x662   :  { %v2975_v46 = vpop.f32.mrf.mxu1 }
 0x663   :  { %1001 = vrot.lane.b32.xlu1 %v991_v42, %s3369_s12  ;;  %997 = vrot.lane.b32.xlu0 %v987_v44, %s3368_s11 }
 0x667   :  { %1005 = vrot.lane.b32.xlu1 %v995_v48, %s3367_s10 }
 0x6d5   :  { %v1002_v52 = vpop.permute.xlu1 %1001  ;;  %v998_v54 = vpop.permute.xlu0 %997 }
 0x6d6   :  { %v1008_v58 = vsel %vm257_vm2, %v983_v26, %v998_v54 }
 0x6d7   :  { %v1009_v3 = vsel %vm259_vm3, %v1008_v58, %v1002_v52 }
 0x6d9   :  { %v1006_v62 = vpop.permute.xlu1 %1005 }
 0x6da   :  { %v1010_v28 = vsel %vm261_vm4, %v1009_v3, %v1006_v62 }
 0x6db   :  { %v1078_v4 = vadd.f32 %v1077_v60, %v1010_v28  ;;  %v1083_v7 = vadd.f32 %v3010_v50, %v1010_v28  ;;  %v1088_v11 = vadd.f32 %v1087_v14, %v1010_v28  ;;  %v1093_v17 = vadd.f32 %v3013_v36, %v1010_v28 }
 0x6dd   :  { %vm1096_vm0 = vcmp.gt.f32.partialorder %v1078_v4, 0.0  ;;  %vm1097_vm5 = vcmp.gt.f32.partialorder %v1083_v7, 0.0  ;;  %v1100_v9 = vmul.f32 0.2, %v1078_v4  ;;  %v1101_v13 = vmul.f32 0.2, %v1083_v7 }
 0x6de   :  { %v1102_v35 = vmul.f32 0.2, %v1088_v11  ;;  %vm1098_vm6 = vcmp.gt.f32.partialorder %v1088_v11, 0.0  ;;  %v1103_v39 = vmul.f32 0.2, %v1093_v17  ;;  %vm1099_vm9 = vcmp.gt.f32.partialorder %v1093_v17, 0.0 }
 0x6df   :  { %v1104_v15 = vsel %vm1096_vm0, %v1078_v4, %v1100_v9  ;;  %v1105_v16 = vsel %vm1097_vm5, %v1083_v7, %v1101_v13 }
 0x6e0   :  { %v1108_v10 = vadd.f32 %v3360_v12, %v1104_v15  ;;  %v1109_v30 = vadd.f32 %v1105_v16, %v3654_v27  ;;  %v1106_v19 = vsel %vm1098_vm6, %v1088_v11, %v1102_v35  ;;  %v1107_v20 = vsel %vm1099_vm9, %v1093_v17, %v1103_v39 }
 0x6e1   :  { %v1110_v27 = vadd.f32 %v1106_v19, %v3671_v56  ;;  %v4014_v45 = vadd.f32 %v1107_v20, %v3680_v2 }
 0x6e2   :  { %v1124_v31 = vsel %vm376_vm7, %v1108_v10, -inf  ;;  %v1112_v33 = vsel %vm257_vm2, %v1108_v10, -inf  ;;  %v1136_v37 = vsel %vm389_vm8, %v1108_v10, -inf  ;;  %v1115_v18 = vsel %vm257_vm2, %v1109_v30, -inf }
 0x6e3   :  { %1125 = vmax.xlane.f32.xlu1 %v1124_v31  ;;  %1113 = vmax.xlane.f32.xlu0 %v1112_v33  ;;  %v1148_v41 = vsel %vm402_vm10, %v1108_v10, -inf  ;;  %v1127_v43 = vsel %vm376_vm7, %v1109_v30, -inf  ;;  %v1118_v21 = vsel %vm257_vm2, %v1110_v27, -inf  ;;  %v1139_v47 = vsel %vm389_vm8, %v1109_v30, -inf }
 0x6e4   :  { %v1121_v61 = vsel %vm257_vm2, %v4014_v45, -inf  ;;  %v1151_v56 = vsel %vm402_vm10, %v1109_v30, -inf  ;;  %v1142_v49 = vsel %vm389_vm8, %v1110_v27, -inf  ;;  %v1130_v6 = vsel %vm376_vm7, %v1110_v27, -inf }
 0x6e5   :  { %v1154_v2 = vsel %vm402_vm10, %v1110_v27, -inf  ;;  %v1133_v51 = vsel %vm376_vm7, %v4014_v45, -inf  ;;  %v1145_v23 = vsel %vm389_vm8, %v4014_v45, -inf  ;;  %v1157_v53 = vsel %vm402_vm10, %v4014_v45, -inf }
 0x6e7   :  { %1137 = vmax.xlane.f32.xlu1 %v1136_v37  ;;  %1116 = vmax.xlane.f32.xlu0 %v1115_v18 }
 0x6eb   :  { %1149 = vmax.xlane.f32.xlu1 %v1148_v41  ;;  %1128 = vmax.xlane.f32.xlu0 %v1127_v43 }
 0x6ef   :  { %1119 = vmax.xlane.f32.xlu1 %v1118_v21  ;;  %1140 = vmax.xlane.f32.xlu0 %v1139_v47 }
 0x6f3   :  { %1122 = vmax.xlane.f32.xlu1 %v1121_v61  ;;  %1152 = vmax.xlane.f32.xlu0 %v1151_v56 }
 0x6f7   :  { %1143 = vmax.xlane.f32.xlu1 %v1142_v49  ;;  %1131 = vmax.xlane.f32.xlu0 %v1130_v6 }
 0x6fb   :  { %1155 = vmax.xlane.f32.xlu1 %v1154_v2  ;;  %1134 = vmax.xlane.f32.xlu0 %v1133_v51 }
 0x6ff   :  { %1146 = vmax.xlane.f32.xlu0 %v1145_v23 }
 0x703   :  { %1158 = vmax.xlane.f32.xlu0 %v1157_v53 }
 0x76c   :  { %v1126_v24 = vpop.xlane.xlu1 %1125  ;;  %v1114_v55 = vpop.xlane.xlu0 %1113 }
 0x76d   :  { %v1160_v29 = vsel %vm257_vm2, %v1114_v55, %v1126_v24 }
 0x770   :  { %v1138_v25 = vpop.xlane.xlu1 %1137  ;;  %v1117_v57 = vpop.xlane.xlu0 %1116 }
 0x771   :  { %v1164_v59 = vsel %vm259_vm3, %v1160_v29, %v1138_v25 }
 0x774   :  { %v1150_v32 = vpop.xlane.xlu1 %1149  ;;  %v1129_v34 = vpop.xlane.xlu0 %1128 }
 0x775   :  { %v1168_v38 = vsel %vm261_vm4, %v1164_v59, %v1150_v32  ;;  %v1161_v48 = vsel %vm257_vm2, %v1117_v57, %v1129_v34 }
 0x776   :  { %v1172_v40 = vsub.f32 %v1108_v10, %v1168_v38 }
 0x778   :  { %v1176_v42 = vmul.f32 1.442695, %v1172_v40  ;;  %v1120_v44 = vpop.xlane.xlu1 %1119  ;;  %v1141_v46 = vpop.xlane.xlu0 %1140 }
 0x779   :  { %v1165_v50 = vsel %vm259_vm3, %v1161_v48, %v1141_v46 }
 0x77a   :  { %3248 = vpow2.f32 %v1176_v42  ;;  %v1566_v42 = vld [vmem:[%s4699_s2 + $0x330] sm:$0xff] }
 0x77b   :  { %3090 = vmatprep.subr.mxu1 %v1566_v42 }
 0x77c   :  { %v1123_v26 = vpop.xlane.xlu1 %1122  ;;  %v1153_v52 = vpop.xlane.xlu0 %1152  ;;  %3091 = vmatpush3.msra.mxu1 %v1566_v42  ;;  %v1556_v42 = vld [vmem:[%s4699_s2 + $0x290] sm:$0xff] }
 0x77d   :  { %v1169_v54 = vsel %vm261_vm4, %v1165_v50, %v1153_v52 }
 0x77e   :  { %v1173_v58 = vsub.f32 %v1109_v30, %v1169_v54 }
 0x780   :  { %v1178_v60 = vmul.f32 1.442695, %v1173_v58  ;;  %v1144_v62 = vpop.xlane.xlu1 %1143  ;;  %v1132_v3 = vpop.xlane.xlu0 %1131 }
 0x781   :  { %v1162_v28 = vsel %vm257_vm2, %v1120_v44, %v1132_v3  ;;  %v1565_v44 = vld [vmem:[%s4699_s2 + $0x320] sm:$0xff] }
 0x782   :  { %3250 = vpow2.f32 %v1178_v60  ;;  %v1166_v4 = vsel %vm259_vm3, %v1162_v28, %v1144_v62  ;;  %3092 = vmatprep.subr.mxu1 %v1565_v44 }
 0x783   :  { %3093 = vmatpush3.msra.mxu1 %v1565_v44  ;;  %v1555_v44 = vld [vmem:[%s4699_s2 + $0x280] sm:$0xff] }
 0x784   :  { %v1156_v36 = vpop.xlane.xlu1 %1155  ;;  %v1135_v7 = vpop.xlane.xlu0 %1134 }
 0x785   :  { %v1170_v9 = vsel %vm261_vm4, %v1166_v4, %v1156_v36  ;;  %v1163_v16 = vsel %vm257_vm2, %v1123_v26, %v1135_v7 }
 0x786   :  { %v1174_v13 = vsub.f32 %v1110_v27, %v1170_v9 }
 0x787   :  { %v4039_v14 = vpop.eup %3248 }
 0x788   :  { %v1180_v11 = vmul.f32 1.442695, %v1174_v13  ;;  %1208 = vrot.lane.b32.xlu1 %v4039_v14, %s3367_s10  ;;  %v1147_v15 = vpop.xlane.xlu0 %1146  ;;  %v1184_v18 = vsel %vm257_vm2, %v4039_v14, 0.0 }
 0x789   :  { %v1167_v12 = vsel %vm259_vm3, %v1163_v16, %v1147_v15 }
 0x78a   :  { %3252 = vpow2.f32 %v1180_v11 }
 0x78c   :  { %1240 = vrot.lane.b32.xlu1 %v4039_v14, %s3369_s12  ;;  %v1159_v10 = vpop.xlane.xlu0 %1158 }
 0x78d   :  { %v1171_v30 = vsel %vm261_vm4, %v1167_v12, %v1159_v10 }
 0x78e   :  { %v1175_v31 = vsub.f32 %v4014_v45, %v1171_v30 }
 0x78f   :  { %v4049_v33 = vpop.eup %3250 }
 0x790   :  { %v1182_v17 = vmul.f32 1.442695, %v1175_v31  ;;  %1242 = vrot.lane.b32.xlu1 %v4049_v33, %s3369_s12  ;;  %1210 = vrot.lane.b32.xlu0 %v4049_v33, %s3367_s10  ;;  %v1187_v39 = vsel %vm257_vm2, %v4049_v33, 0.0 }
 0x792   :  { %3254 = vpow2.f32 %v1182_v17 }
 0x794   :  { %1274 = vrot.lane.b32.xlu1 %v4049_v33, %s3368_s11  ;;  %1272 = vrot.lane.b32.xlu0 %v4039_v14, %s3368_s11 }
 0x797   :  { %v4059_v35 = vpop.eup %3252 }
 0x798   :  { %1212 = vrot.lane.b32.xlu0 %v4059_v35, %s3367_s10  ;;  %v1190_v19 = vsel %vm257_vm2, %v4059_v35, 0.0 }
 0x79c   :  { %1244 = vrot.lane.b32.xlu0 %v4059_v35, %s3369_s12 }
 0x79f   :  { %v4065_v37 = vpop.eup %3254 }
 0x7a0   :  { %1276 = vrot.lane.b32.xlu0 %v4059_v35, %s3368_s11  ;;  %1214 = vrot.lane.b32.xlu1 %v4065_v37, %s3367_s10  ;;  %v1193_v27 = vsel %vm257_vm2, %v4065_v37, 0.0 }
 0x7a4   :  { %1246 = vrot.lane.b32.xlu1 %v4065_v37, %s3369_s12 }
 0x7a8   :  { %1278 = vrot.lane.b32.xlu1 %v4065_v37, %s3368_s11 }
 0x7bf   :  { %1185 = vadd.xlane.f32.xlu0 %v1184_v18 }
 0x7c3   :  { %1188 = vadd.xlane.f32.xlu0 %v1187_v39 }
 0x7cc   :  { %1191 = vadd.xlane.f32.xlu1 %v1190_v19 }
 0x7d0   :  { %1194 = vadd.xlane.f32.xlu1 %v1193_v27 }
 0x7fa   :  { %v1209_v41 = vpop.permute.xlu1 %1208 }
 0x7fb   :  { %v1220_v43 = vsel %vm257_vm2, %v1209_v41, 0.0 }
 0x7fc   :  { %1221 = vadd.xlane.f32.xlu1 %v1220_v43 }
 0x7fe   :  { %v1241_v20 = vpop.permute.xlu1 %1240 }
 0x7ff   :  { %v1252_v45 = vsel %vm257_vm2, %v1241_v20, 0.0 }
 0x800   :  { %1253 = vadd.xlane.f32.xlu1 %v1252_v45 }
 0x802   :  { %v1243_v21 = vpop.permute.xlu1 %1242  ;;  %v1211_v47 = vpop.permute.xlu0 %1210 }
 0x803   :  { %v1223_v61 = vsel %vm257_vm2, %v1211_v47, 0.0  ;;  %v1255_v49 = vsel %vm257_vm2, %v1243_v21, 0.0 }
 0x804   :  { %1224 = vadd.xlane.f32.xlu0 %v1223_v61 }
 0x806   :  { %v1273_v56 = vpop.permute.xlu0 %1272  ;;  %v1275_v2 = vpop.permute.xlu1 %1274 }
 0x807   :  { %v1284_v6 = vsel %vm257_vm2, %v1273_v56, 0.0  ;;  %v1287_v23 = vsel %vm257_vm2, %v1275_v2, 0.0 }
 0x808   :  { %1256 = vadd.xlane.f32.xlu0 %v1255_v49  ;;  %1285 = vadd.xlane.f32.xlu1 %v1284_v6 }
 0x80a   :  { %v1213_v51 = vpop.permute.xlu0 %1212 }
 0x80b   :  { %v1226_v24 = vsel %vm257_vm2, %v1213_v51, 0.0 }
 0x80c   :  { %1288 = vadd.xlane.f32.xlu0 %v1287_v23 }
 0x80e   :  { %v1245_v53 = vpop.permute.xlu0 %1244 }
 0x80f   :  { %v1258_v55 = vsel %vm257_vm2, %v1245_v53, 0.0 }
 0x810   :  { %1227 = vadd.xlane.f32.xlu0 %v1226_v24  ;;  %1259 = vadd.xlane.f32.xlu1 %v1258_v55 }
 0x812   :  { %v1215_v25 = vpop.permute.xlu1 %1214  ;;  %v1277_v57 = vpop.permute.xlu0 %1276 }
 0x813   :  { %v1229_v29 = vsel %vm257_vm2, %v1215_v25, 0.0  ;;  %v1290_v59 = vsel %vm257_vm2, %v1277_v57, 0.0 }
 0x814   :  { %1230 = vadd.xlane.f32.xlu0 %v1229_v29  ;;  %1291 = vadd.xlane.f32.xlu1 %v1290_v59  ;;  %v1563_v29 = vld [vmem:[%s4699_s2 + $0x300] sm:$0xff] }
 0x815   :  { %v1561_v59 = vld [vmem:[%s4699_s2 + $0x2e0] sm:$0xff] }
 0x816   :  { %v1247_v32 = vpop.permute.xlu1 %1246 }
 0x817   :  { %v1261_v34 = vsel %vm257_vm2, %v1247_v32, 0.0  ;;  %v1560_v32 = vld [vmem:[%s4699_s2 + $0x2d0] sm:$0xff] }
 0x818   :  { %1262 = vadd.xlane.f32.xlu0 %v1261_v34  ;;  %v1559_v34 = vld [vmem:[%s4699_s2 + $0x2c0] sm:$0xff] }
 0x81a   :  { %v1279_v38 = vpop.permute.xlu1 %1278 }
 0x81b   :  { %v1293_v40 = vsel %vm257_vm2, %v1279_v38, 0.0  ;;  %v1558_v38 = vld [vmem:[%s4699_s2 + $0x2b0] sm:$0xff] }
 0x81c   :  { %1294 = vadd.xlane.f32.xlu0 %v1293_v40  ;;  %v1557_v40 = vld [vmem:[%s4699_s2 + $0x2a0] sm:$0xff] }
 0x848   :  { %v1186_v50 = vpop.xlane.xlu0 %1185 }
 0x84c   :  { %v1189_v52 = vpop.xlane.xlu0 %1188 }
 0x855   :  { %v1192_v46 = vpop.xlane.xlu1 %1191 }
 0x859   :  { %v1195_v48 = vpop.xlane.xlu1 %1194 }
 0x885   :  { %v1222_v26 = vpop.xlane.xlu1 %1221 }
 0x886   :  { %3256 = vrcp.f32 %v1222_v26  ;;  %v1551_v26 = vld [vmem:[%s4699_s2 + $0x240] sm:$0xff] }
 0x889   :  { %v1254_v54 = vpop.xlane.xlu1 %1253 }
 0x88a   :  { %3258 = vrcp.f32 %v1254_v54  ;;  %v3048_v54 = vpop.f32.mrf.mxu1 }
 0x88b   :  { %3260 = vrcp.f32 %v1186_v50  ;;  %v1552_v50 = vld [vmem:[%s4699_s2 + $0x250] sm:$0xff] }
 0x88d   :  { %v1225_v58 = vpop.xlane.xlu0 %1224 }
 0x88e   :  { %3262 = vrcp.f32 %v1225_v58 }
 0x891   :  { %v1286_v60 = vpop.xlane.xlu1 %1285  ;;  %v1257_v62 = vpop.xlane.xlu0 %1256 }
 0x892   :  { %3264 = vrcp.f32 %v1286_v60  ;;  %v1522_v60 = vld [vmem:[%s4699_s2 + $0x9c0] ss:$0 sm:$0xff] }
 0x893   :  { %3266 = vrcp.f32 %v1257_v62  ;;  %v3257_v4 = vpop.eup %3256 }
 0x894   :  { %3268 = vrcp.f32 %v1189_v52  ;;  %v1578_v52 = vld [vmem:[%s4699_s2 + $0x698] sm:$0xff] }
 0x895   :  { %v1289_v3 = vpop.xlane.xlu0 %1288 }
 0x896   :  { %3270 = vrcp.f32 %v1289_v3  ;;  %v1418_v3 = vpop.f32.mrf.mxu1 }
 0x897   :  { %3272 = vrcp.f32 %v1192_v46  ;;  %v3259_v7 = vpop.eup %3258  ;;  %v1554_v46 = vld [vmem:[%s4699_s2 + $0x270] sm:$0xff] }
 0x898   :  { %v3261_v9 = vpop.eup %3260 }
 0x899   :  { %v1260_v28 = vpop.xlane.xlu1 %1259  ;;  %v1228_v36 = vpop.xlane.xlu0 %1227  ;;  %v1304_v16 = vsel %vm257_vm2, %v3261_v9, %v3257_v4 }
 0x89a   :  { %3274 = vrcp.f32 %v1260_v28  ;;  %v1308_v10 = vsel %vm259_vm3, %v1304_v16, %v3259_v7  ;;  %v3051_v16 = vpop.f32.mrf.mxu1 }
 0x89b   :  { %3276 = vrcp.f32 %v1228_v36  ;;  %v3263_v15 = vpop.eup %3262 }
 0x89d   :  { %v1292_v13 = vpop.xlane.xlu1 %1291  ;;  %v1231_v11 = vpop.xlane.xlu0 %1230 }
 0x89e   :  { %3278 = vrcp.f32 %v1292_v13 }
 0x89f   :  { %v3265_v12 = vpop.eup %3264  ;;  %3280 = vrcp.f32 %v1231_v11 }
 0x8a0   :  { %v3267_v30 = vpop.eup %3266  ;;  %v1312_v31 = vsel %vm261_vm4, %v1308_v10, %v3265_v12 }
 0x8a1   :  { %v3269_v17 = vpop.eup %3268  ;;  %v1263_v18 = vpop.xlane.xlu0 %1262  ;;  %v1316_v39 = vmul.f32 %v4039_v14, %v1312_v31 }
 0x8a2   :  { %v1305_v19 = vsel %vm257_vm2, %v3269_v17, %v3263_v15  ;;  %3282 = vrcp.f32 %v1263_v18 }
 0x8a3   :  { %v3271_v27 = vpop.eup %3270  ;;  %3084 = vmatprep.mubr.f32.mxu0 %v1316_v39  ;;  %v1309_v41 = vsel %vm259_vm3, %v1305_v19, %v3267_v30  ;;  %3284 = vrcp.f32 %v1195_v48  ;;  %v1553_v48 = vld [vmem:[%s4699_s2 + $0x260] sm:$0xff]  ;;  %v1428_v30 = vpop.f32.mrf.mxu1 }
 0x8a4   :  { %v1313_v43 = vsel %vm261_vm4, %v1309_v41, %v3271_v27  ;;  %v3273_v21 = vpop.eup %3272 }
 0x8a5   :  { %v1295_v20 = vpop.xlane.xlu0 %1294  ;;  %v1317_v45 = vmul.f32 %v4049_v33, %v1313_v43 }
 0x8a6   :  { %3286 = vrcp.f32 %v1295_v20 }
 0x8a7   :  { %v3275_v47 = vpop.eup %3274  ;;  %3085 = vmatmul.mubr.f32.vlgmr.msra.gmra.mxu0 %v1317_v45 }
 0x8a8   :  { %v3277_v61 = vpop.eup %3276 }
 0x8a9   :  { %v1306_v14 = vsel %vm257_vm2, %v3273_v21, %v3277_v61 }
 0x8aa   :  { %v1310_v49 = vsel %vm259_vm3, %v1306_v14, %v3275_v47  ;;  %v1577_v14 = vld [vmem:[%s4699_s2 + $0x690] sm:$0xff] }
 0x8ab   :  { %v3279_v56 = vpop.eup %3278 }
 0x8ac   :  { %v1314_v6 = vsel %vm261_vm4, %v1310_v49, %v3279_v56  ;;  %v3281_v51 = vpop.eup %3280  ;;  %v1576_v49 = vld [vmem:[%s4699_s2 + $0x688] sm:$0xff] }
 0x8ad   :  { %v1318_v2 = vmul.f32 %v4059_v35, %v1314_v6  ;;  %v1564_v35 = vld [vmem:[%s4699_s2 + $0x310] sm:$0xff]  ;;  %v1575_v6 = vld [vmem:[%s4699_s2 + $0x680] sm:$0xff] }
 0x8ae   :  { %3094 = vmatprep.subr.mxu1 %v1564_v35 }
 0x8af   :  { %3087 = vmatprep.mubr.f32.mxu0 %v1318_v2  ;;  %v3283_v23 = vpop.eup %3282  ;;  %3095 = vmatpush3.msra.mxu1 %v1564_v35  ;;  %v1574_v2 = vld [vmem:[%s4699_s2 + $0x678] sm:$0xff] }
 0x8b0   :  { %v3285_v53 = vpop.eup %3284  ;;  %3096 = vmatprep.subr.mxu1 %v1563_v29 }
 0x8b1   :  { %v1307_v33 = vsel %vm257_vm2, %v3285_v53, %v3281_v51  ;;  %3097 = vmatpush3.msra.mxu1 %v1563_v29  ;;  %v1573_v51 = vld [vmem:[%s4699_s2 + $0x670] sm:$0xff]  ;;  %v1571_v53 = vld [vmem:[%s4699_s2 + $0x660] sm:$0xff] }
 0x8b2   :  { %v1311_v55 = vsel %vm259_vm3, %v1307_v33, %v3283_v23  ;;  %v1572_v23 = vld [vmem:[%s4699_s2 + $0x668] sm:$0xff]  ;;  %v1570_v33 = vld [vmem:[%s4699_s2 + $0x658] sm:$0xff] }
 0x8b3   :  { %v3287_v24 = vpop.eup %3286 }
 0x8b4   :  { %v1315_v25 = vsel %vm261_vm4, %v1311_v55, %v3287_v24 }
 0x8b5   :  { %v1319_v57 = vmul.f32 %v4065_v37, %v1315_v25  ;;  %v1562_v37 = vld [vmem:[%s4699_s2 + $0x2f0] sm:$0xff] }
 0x8b6   :  { %3098 = vmatprep.subr.mxu1 %v1562_v37 }
 0x8b7   :  { %3088 = vmatmul.mubr.f32.gmra.mxu0 %v1319_v57  ;;  %3099 = vmatpush3.msra.mxu1 %v1562_v37  ;;  %v1569_v37 = vld [vmem:[%s4699_s2 + $0x650] sm:$0xff] }
 0x8b8   :  { %3136 = vmatprep.mubr.msk.f32.mxu0 %vm3366_vm1, %v3365_v22  ;;  %3100 = vmatprep.subr.mxu1 %v1561_v59 }
 0x8b9   :  { %3101 = vmatpush3.msra.mxu1 %v1561_v59  ;;  %v1568_v59 = vld [vmem:[%s4699_s2 + $0x648] sm:$0xff] }
 0x8ba   :  { %3102 = vmatprep.subr.mxu1 %v1560_v32 }
 0x8bb   :  { %3103 = vmatpush3.msra.mxu1 %v1560_v32  ;;  %v1567_v32 = vld [vmem:[%s4699_s2 + $0x640] sm:$0xff] }
 0x8bc   :  { %3104 = vmatprep.subr.mxu1 %v1559_v34 }
 0x8bd   :  { %3105 = vmatpush3.msra.mxu1 %v1559_v34 }
 0x8be   :  { %3106 = vmatprep.subr.mxu1 %v1558_v38 }
 0x8bf   :  { %3107 = vmatpush3.msra.mxu1 %v1558_v38 }
 0x8c0   :  { %3108 = vmatprep.subr.mxu1 %v1557_v40 }
 0x8c1   :  { %3109 = vmatpush3.msra.mxu1 %v1557_v40  ;;  %v1595_v40 = vld [vmem:[%s4699_s2 + $0x8c0] sm:$0xff] }
 0x8c2   :  { %3110 = vmatprep.subr.mxu1 %v1556_v42 }
 0x8c3   :  { %3111 = vmatpush3.msra.mxu1 %v1556_v42 }
 0x8c4   :  { %3112 = vmatprep.subr.mxu1 %v1555_v44 }
 0x8c5   :  { %3113 = vmatpush3.msra.mxu1 %v1555_v44  ;;  %v1594_v44 = vld [vmem:[%s4699_s2 + $0x8b0] sm:$0xff] }
 0x8c6   :  { %3114 = vmatprep.subr.mxu1 %v1554_v46 }
 0x8c7   :  { %3115 = vmatpush3.msra.mxu1 %v1554_v46 }
 0x8c8   :  { %3116 = vmatprep.subr.mxu1 %v1553_v48 }
 0x8c9   :  { %3117 = vmatpush3.msra.mxu1 %v1553_v48 }
 0x8ca   :  { %3118 = vmatprep.subr.mxu1 %v1552_v50 }
 0x8cb   :  { %3119 = vmatpush3.msra.mxu1 %v1552_v50 }
 0x8cc   :  { %3120 = vmatprep.subr.mxu1 %v1551_v26 }
 0x8cd   :  { %3121 = vmatpush3.msra.mxu1 %v1551_v26  ;;  %v1593_v26 = vld [vmem:[%s4699_s2 + $0x8a0] sm:$0xff] }
 0x8ce   :  { %1839 = vmatprep.subr.mxu1 %v1578_v52  ;;  %v1592_v52 = vld [vmem:[%s4699_s2 + $0x890] sm:$0xff] }
 0x967   :  { %v3086_v58 = vpop.f32.mrf.mxu0 }
 0x968   :  { %v1509_v62 = vadd.f32 %v3086_v58, %v3048_v54  ;;  %v1591_v58 = vld [vmem:[%s4699_s2 + $0x880] sm:$0xff] }
 0x969   :  { %v1503_v28 = vpop.f32.mrf.mxu0 }
 0x96a   :  { %v1524_v36 = vadd.f32 %v1522_v60, %v1509_v62  ;;  %v1504_v4 = vadd.f32 %v1503_v28, %v1418_v3  ;;  %v1590_v62 = vld [vmem:[%s4699_s2 + $0x870] sm:$0xff]  ;;  %v1589_v28 = vld [vmem:[%s4699_s2 + $0x860] sm:$0xff] }
 0x96c   :  { %v1532_v7 = vmin.f32 %v1524_v36, 0.0  ;;  %v1523_v9 = vadd.f32 %v1522_v60, %v1504_v4  ;;  %vm1528_vm11 = vcmp.gt.f32.partialorder %v1524_v36, 0.0 }
 0x96e   :  { %v1537_v13 = vmul.f32 1.442695, %v1532_v7  ;;  %v1531_v11 = vmin.f32 %v1523_v9, 0.0  ;;  %vm1527_vm1 = vcmp.gt.f32.partialorder %v1523_v9, 0.0  ;;  %v1579_v7 = vld [vmem:[%s4699_s2 + $0x6c0] sm:$0x3f] }
 0x970   :  { %3288 = vpow2.f32 %v1537_v13  ;;  %v1535_v15 = vmul.f32 1.442695, %v1531_v11  ;;  %v1587_v11 = vld [vmem:[%s4699_s2 + $0x840] sm:$0xff] }
 0x972   :  { %3290 = vpow2.f32 %v1535_v15 }
 0x977   :  { %v3089_v12 = vpop.f32.mrf.mxu0 }
 0x978   :  { %v1519_v10 = vadd.f32 %v3089_v12, %v3051_v16  ;;  %v2393_v16 = vld [vmem:[%s4699_s2 + $0x420] sm:$0xff]  ;;  %v1586_v12 = vld [vmem:[%s4699_s2 + $0x830] sm:$0xff] }
 0x979   :  { %v1513_v31 = vpop.f32.mrf.mxu0 }
 0x97a   :  { %v1526_v17 = vadd.f32 %v1522_v60, %v1519_v10  ;;  %v1514_v18 = vadd.f32 %v1513_v31, %v1428_v30  ;;  %v2392_v30 = vld [vmem:[%s4699_s2 + $0x410] sm:$0xff]  ;;  %v1585_v31 = vld [vmem:[%s4699_s2 + $0x820] sm:$0xff] }
 0x97c   :  { %v1534_v39 = vmin.f32 %v1526_v17, 0.0  ;;  %v1525_v19 = vadd.f32 %v1522_v60, %v1514_v18  ;;  %vm1530_vm13 = vcmp.gt.f32.partialorder %v1526_v17, 0.0  ;;  %v2391_v18 = vld [vmem:[%s4699_s2 + $0x400] sm:$0xff] }
 0x97d   :  { %v3289_v27 = vpop.eup %3288 }
 0x97e   :  { %v1541_v41 = vmul.f32 1.442695, %v1534_v39  ;;  %v1533_v43 = vmin.f32 %v1525_v19, 0.0  ;;  %v2603_v45 = vadd.f32 -1.0, %v3289_v27  ;;  %vm1529_vm12 = vcmp.gt.f32.partialorder %v1525_v19, 0.0  ;;  %v1584_v39 = vld [vmem:[%s4699_s2 + $0x810] sm:$0xff] }
 0x97f   :  { %v3291_v20 = vpop.eup %3290  ;;  %v2390_v27 = vld [vmem:[%s4699_s2 + $0x3f0] sm:$0xff] }
 0x980   :  { %3292 = vpow2.f32 %v1541_v41  ;;  %v1539_v21 = vmul.f32 1.442695, %v1533_v43  ;;  %v2602_v47 = vadd.f32 -1.0, %v3291_v20  ;;  %v4173_v56 = vsel %vm1528_vm11, %v1524_v36, %v2603_v45  ;;  %v2394_v36 = vld [vmem:[%s4699_s2 + $0x430] sm:$0xff]  ;;  %v1583_v41 = vld [vmem:[%s4699_s2 + $0x800] sm:$0xff] }
 0x981   :  { %v2389_v20 = vld [vmem:[%s4699_s2 + $0x3e0] sm:$0xff]  ;;  %v1582_v45 = vld [vmem:[%s4699_s2 + $0x7f0] sm:$0xff] }
 0x982   :  { %3294 = vpow2.f32 %v1539_v21  ;;  %v4167_v61 = vsel %vm1527_vm1, %v1523_v9, %v2602_v47  ;;  %v1588_v9 = vld [vmem:[%s4699_s2 + $0x850] sm:$0xff] }
 0x983   :  { %3122 = vmatprep.mubr.f32.mxu1 %v4167_v61  ;;  %v2388_v47 = vld [vmem:[%s4699_s2 + $0x3d0] sm:$0xff] }
 0x984   :  { %3123 = vmatmul.mubr.f32.vlgmr.msra.gmra.mxu1 %v4173_v56 }
 0x985   :  { %1840 = vmatpush1.msra.mxu1 %v1577_v14 }
 0x986   :  { %1841 = vmatprep.subr.mxu1 %v1576_v49  ;;  %v2387_v49 = vld [vmem:[%s4699_s2 + $0x3c0] sm:$0xff] }
 0x987   :  { %1842 = vmatpush1.msra.mxu1 %v1575_v6  ;;  %v1580_v6 = vld [vmem:[%s4699_s2 + $0x7d0] sm:$0xff] }
 0x988   :  { %1843 = vmatprep.subr.mxu1 %v1574_v2 }
 0x989   :  { %1844 = vmatpush1.msra.mxu1 %v1573_v51  ;;  %v2386_v51 = vld [vmem:[%s4699_s2 + $0x3b0] sm:$0xff] }
 0x98a   :  { %1845 = vmatprep.subr.mxu1 %v1572_v23  ;;  %v1603_v23 = vld [vmem:[%s4699_s2 + $0x940] sm:$0xff] }
 0x98b   :  { %1846 = vmatpush1.msra.mxu1 %v1571_v53 }
 0x98c   :  { %1847 = vmatprep.subr.mxu1 %v1570_v33  ;;  %v2385_v33 = vld [vmem:[%s4699_s2 + $0x3a0] sm:$0xff] }
 0x98d   :  { %v3293_v24 = vpop.eup %3292  ;;  %1848 = vmatpush1.msra.mxu1 %v1569_v37 }
 0x98e   :  { %v2605_v25 = vadd.f32 -1.0, %v3293_v24  ;;  %1849 = vmatprep.subr.mxu1 %v1568_v59  ;;  %v1602_v24 = vld [vmem:[%s4699_s2 + $0x930] sm:$0xff]  ;;  %v2383_v59 = vld [vmem:[%s4699_s2 + $0x380] sm:$0xff] }
 0x98f   :  { %v3295_v55 = vpop.eup %3294  ;;  %1850 = vmatpush1.msra.mxu1 %v1567_v32  ;;  %v1600_v32 = vld [vmem:[%s4699_s2 + $0x910] sm:$0xff] }
 0x990   :  { %v2604_v57 = vadd.f32 -1.0, %v3295_v55  ;;  %v4200_v29 = vsel %vm1530_vm13, %v1526_v17, %v2605_v25  ;;  %2288 = vmatprep.subr.mxu1 %v3365_v22  ;;  %v2384_v25 = vld [vmem:[%s4699_s2 + $0x390] sm:$0xff] }
 0x992   :  { %v4197_v35 = vsel %vm1529_vm12, %v1525_v19, %v2604_v57  ;;  %v1601_v57 = vld [vmem:[%s4699_s2 + $0x920] sm:$0xff] }
 0x993   :  { %3125 = vmatprep.mubr.f32.mxu1 %v4197_v35 }
 0x994   :  { %3126 = vmatmul.mubr.f32.gmra.mxu1 %v4200_v29 }
 0x995   :  { %1883 = vmatprep.mubr.f32.mxu1 %v3365_v22 }
 0xa44   :  { %v4214_v34 = vpop.f32.mrf.mxu1 }
 0xa45   :  { %v2265_v54 = vmul.f32 %v4214_v34, %v1593_v26  ;;  %v2261_v13 = vmul.f32 %v4214_v34, %v1589_v28  ;;  %v2257_v19 = vmul.f32 %v4214_v34, %v1585_v31  ;;  %v2381_v26 = vld [vmem:[%s4699_s2 + $0x360] sm:$0xff] }
 0xa46   :  { %v4216_v38 = vpop.f32.mrf.mxu1 }
 0xa47   :  { %2611 = vmatmul.mubr.msk.f32.vlgmr.msra.gmra.mxu1 %vm1689_vm14, %v4216_v38  ;;  %v2264_v60 = vmul.f32 %v4216_v38, %v1592_v52  ;;  %v2260_v15 = vmul.f32 %v4216_v38, %v1588_v9  ;;  %v2256_v43 = vmul.f32 %v4216_v38, %v1584_v39  ;;  %v2252_v53 = vmul.f32 %v4216_v38, %v1580_v6  ;;  %v1598_v52 = vld [vmem:[%s4699_s2 + $0x8f0] sm:$0xff] }
 0xa48   :  { %1889 = vmatprep.mubr.f32.mxu1 %v3365_v22 }
 0xa4b   :  { %2612 = vmatmul.mubr.msk.f32.gmra.mxu1 %vm1689_vm14, %v4214_v34 }
 0xa4c   :  { %1895 = vmatprep.mubr.f32.mxu1 %v3365_v22 }
 0xa54   :  { %v4227_v42 = vpop.f32.mrf.mxu1 }
 0xa55   :  { %3129 = vmatpush3.xpose.msk.msra.mxu0 %vm1689_vm14, %v4227_v42  ;;  %v2267_v46 = vmul.f32 %v4227_v42, %v1595_v40  ;;  %v2263_v3 = vmul.f32 %v4227_v42, %v1591_v58  ;;  %v2259_v10 = vmul.f32 %v4227_v42, %v1587_v11  ;;  %v2255_v21 = vmul.f32 %v4227_v42, %v1583_v41  ;;  %v2380_v58 = vld [vmem:[%s4699_s2 + $0x350] sm:$0xff] }
 0xa56   :  { %v4235_v48 = vpop.f32.mrf.mxu1  ;;  %3130 = vmatprep.subr.mxu0 %v3365_v22  ;;  %v2275_v55 = vmul.f32 %v4227_v42, %v1603_v23  ;;  %v2273_v40 = vmul.f32 %v4214_v34, %v1601_v57 }
 0xa57   :  { %2613 = vmatmul.mubr.msk.f32.gmra.mxu1 %vm1689_vm14, %v4235_v48  ;;  %v2266_v50 = vmul.f32 %v4235_v48, %v1594_v44  ;;  %v2262_v4 = vmul.f32 %v4235_v48, %v1590_v62  ;;  %v2258_v17 = vmul.f32 %v4235_v48, %v1586_v12  ;;  %v2254_v14 = vmul.f32 %v4235_v48, %v1582_v45  ;;  %v2382_v44 = vld [vmem:[%s4699_s2 + $0x370] sm:$0xff] }
 0xa58   :  { %2289 = vmatpush1.msra.mxu1 %v2267_v46  ;;  %1901 = vmatprep.mubr.f32.mxu1 %v3365_v22  ;;  %v2274_v37 = vmul.f32 %v4235_v48, %v1602_v24  ;;  %v1599_v46 = vld [vmem:[%s4699_s2 + $0x900] sm:$0xff]  ;;  %v2270_v62 = vmul.f32 %v4235_v48, %v1598_v52 }
 0xa59   :  { %2290 = vmatprep.subr.mxu1 %v3365_v22  ;;  %3131 = vmatpush3.xpose.msk.msra.mxu0 %vm1689_vm14, %v4235_v48 }
 0xa5a   :  { %2291 = vmatpush1.msra.mxu1 %v2266_v50  ;;  %3132 = vmatprep.subr.mxu0 %v3365_v22  ;;  %v2272_v50 = vmul.f32 %v4216_v38, %v1600_v32 }
 0xa5b   :  { %2292 = vmatprep.subr.mxu1 %v3365_v22  ;;  %2614 = vmatmul.mubr.msk.f32.gmra.mxu1 %vm1689_vm14, %v4227_v42 }
 0xa5c   :  { %2293 = vmatpush1.msra.mxu1 %v2265_v54  ;;  %v2271_v54 = vmul.f32 %v4227_v42, %v1599_v46  ;;  %v1596_v42 = vld [vmem:[%s4699_s2 + $0x8d0] sm:$0xff] }
 0xa5d   :  { %2294 = vmatprep.subr.mxu1 %v3365_v22  ;;  %3133 = vmatpush3.xpose.msk.msra.mxu0 %vm1689_vm14, %v4214_v34  ;;  %v2268_v48 = vmul.f32 %v4216_v38, %v1596_v42 }
 0xa5e   :  { %2295 = vmatpush1.msra.mxu1 %v2264_v60  ;;  %3134 = vmatprep.subr.mxu0 %v3365_v22  ;;  %v1597_v60 = vld [vmem:[%s4699_s2 + $0x8e0] sm:$0xff] }
 0xa5f   :  { %2296 = vmatprep.subr.mxu1 %v3365_v22  ;;  %v2269_v28 = vmul.f32 %v4214_v34, %v1597_v60 }
 0xa60   :  { %2297 = vmatpush1.msra.mxu1 %v2263_v3  ;;  %v2379_v3 = vld [vmem:[%s4699_s2 + $0x340] sm:$0xff] }
 0xa61   :  { %2298 = vmatprep.subr.mxu1 %v3365_v22  ;;  %3135 = vmatpush3.xpose.msk.msra.mxu0 %vm1689_vm14, %v4216_v38 }
 0xa62   :  { %2299 = vmatpush1.msra.mxu1 %v2262_v4  ;;  %3139 = vmatprep.subr.mxu0 %v2394_v36 }
 0xa63   :  { %2300 = vmatprep.subr.mxu1 %v3365_v22 }
 0xa64   :  { %2301 = vmatpush1.msra.mxu1 %v2261_v13  ;;  %3137 = vmatmul.mubr.msk.f32.vlgmr.msra.gmra.mxu0 %vm1689_vm14, %v1579_v7 }
 0xa65   :  { %2302 = vmatprep.subr.mxu1 %v3365_v22  ;;  %3140 = vmatpush3.msra.mxu0 %v2394_v36 }
 0xa66   :  { %2303 = vmatpush1.msra.mxu1 %v2260_v15  ;;  %3171 = vmatprep.mubr.f32.mxu0 %v4167_v61  ;;  %v1581_v61 = vld [vmem:[%s4699_s2 + $0x7e0] sm:$0xff] }
 0xa67   :  { %2304 = vmatprep.subr.mxu1 %v3365_v22  ;;  %3141 = vmatprep.subr.mxu0 %v2393_v16  ;;  %v2253_v2 = vmul.f32 %v4214_v34, %v1581_v61 }
 0xa68   :  { %2305 = vmatpush1.msra.mxu1 %v2259_v10  ;;  %3142 = vmatpush3.msra.mxu0 %v2393_v16 }
 0xa69   :  { %2306 = vmatprep.subr.mxu1 %v3365_v22  ;;  %3143 = vmatprep.subr.mxu0 %v2392_v30 }
 0xa6a   :  { %2307 = vmatpush1.msra.mxu1 %v2258_v17  ;;  %3144 = vmatpush3.msra.mxu0 %v2392_v30 }
 0xa6b   :  { %2308 = vmatprep.subr.mxu1 %v3365_v22  ;;  %3145 = vmatprep.subr.mxu0 %v2391_v18 }
 0xa6c   :  { %2309 = vmatpush1.msra.mxu1 %v2257_v19  ;;  %3146 = vmatpush3.msra.mxu0 %v2391_v18 }
 0xa6d   :  { %2310 = vmatprep.subr.mxu1 %v3365_v22  ;;  %3147 = vmatprep.subr.mxu0 %v2390_v27 }
 0xa6e   :  { %2311 = vmatpush1.msra.mxu1 %v2256_v43  ;;  %3148 = vmatpush3.msra.mxu0 %v2390_v27  ;;  %v19_v43 = vld [vmem:[%s4701_s1 + $0x8] sm:$0xff] }
 0xa6f   :  { %2312 = vmatprep.subr.mxu1 %v3365_v22  ;;  %3149 = vmatprep.subr.mxu0 %v2389_v20 }
 0xa70   :  { %2313 = vmatpush1.msra.mxu1 %v2255_v21  ;;  %3150 = vmatpush3.msra.mxu0 %v2389_v20 }
 0xa71   :  { %2314 = vmatprep.subr.mxu1 %v3365_v22  ;;  %3151 = vmatprep.subr.mxu0 %v2388_v47 }
 0xa72   :  { %2315 = vmatpush1.msra.mxu1 %v2254_v14  ;;  %3152 = vmatpush3.msra.mxu0 %v2388_v47  ;;  %v21_v47 = vld [vmem:[%s4701_s1 + $0x18] sm:$0xff] }
 0xa73   :  { %2316 = vmatprep.subr.mxu1 %v3365_v22  ;;  %3153 = vmatprep.subr.mxu0 %v2387_v49 }
 0xa74   :  { %2317 = vmatpush1.msra.mxu1 %v2253_v2  ;;  %3154 = vmatpush3.msra.mxu0 %v2387_v49 }
 0xa75   :  { %2318 = vmatprep.subr.mxu1 %v3365_v22  ;;  %3155 = vmatprep.subr.mxu0 %v2386_v51 }
 0xa76   :  { %2319 = vmatpush1.msra.mxu1 %v2252_v53  ;;  %3156 = vmatpush3.msra.mxu0 %v2386_v51  ;;  %v23_v53 = vld [vmem:[%s4701_s1 + $0x28] sm:$0xff] }
 0xa77   :  { %2336 = vmatprep.subr.mxu1 %v3365_v22  ;;  %3157 = vmatprep.subr.mxu0 %v2385_v33 }
 0xa78   :  { %2337 = vmatpush2.msra.mxu1 %v2275_v55  ;;  %3158 = vmatpush3.msra.mxu0 %v2385_v33 }
 0xa79   :  { %2338 = vmatprep.subr.mxu1 %v3365_v22  ;;  %3159 = vmatprep.subr.mxu0 %v2384_v25 }
 0xa7a   :  { %2339 = vmatpush2.msra.mxu1 %v2274_v37  ;;  %3160 = vmatpush3.msra.mxu0 %v2384_v25 }
 0xa7b   :  { %2340 = vmatprep.subr.mxu1 %v3365_v22  ;;  %3161 = vmatprep.subr.mxu0 %v2383_v59 }
 0xa7c   :  { %2341 = vmatpush2.msra.mxu1 %v2273_v40  ;;  %3162 = vmatpush3.msra.mxu0 %v2383_v59  ;;  %v3361_v59 = vld [vmem:[%s4701_s1] sm:$0xff] }
 0xa7d   :  { %2342 = vmatprep.subr.mxu1 %v3365_v22  ;;  %3163 = vmatprep.subr.mxu0 %v2382_v44 }
 0xa7e   :  { %2343 = vmatpush2.msra.mxu1 %v2272_v50  ;;  %3164 = vmatpush3.msra.mxu0 %v2382_v44 }
 0xa7f   :  { %2344 = vmatprep.subr.mxu1 %v3365_v22  ;;  %3165 = vmatprep.subr.mxu0 %v2381_v26 }
 0xa80   :  { %2345 = vmatpush2.msra.mxu1 %v2271_v54  ;;  %3166 = vmatpush3.msra.mxu0 %v2381_v26  ;;  %v3362_v26 = vld [vmem:[%s4701_s1 + $0x10] sm:$0xff] }
 0xa81   :  { %2346 = vmatprep.subr.mxu1 %v3365_v22  ;;  %3167 = vmatprep.subr.mxu0 %v2380_v58 }
 0xa82   :  { %2347 = vmatpush2.msra.mxu1 %v2270_v62  ;;  %3168 = vmatpush3.msra.mxu0 %v2380_v58 }
 0xa83   :  { %2348 = vmatprep.subr.mxu1 %v3365_v22  ;;  %3169 = vmatprep.subr.mxu0 %v2379_v3 }
 0xa84   :  { %2349 = vmatpush2.msra.mxu1 %v2269_v28  ;;  %3170 = vmatpush3.msra.mxu0 %v2379_v3 }
 0xa85   :  { %2350 = vmatprep.subr.mxu1 %v3365_v22  ;;  %3172 = vmatmul.mubr.f32.vlgmr.msra.gmra.mxu0 %v4173_v56  ;;  %v1797_v22 = vsub.s32 5, %v3624_v63 }
 0xa86   :  { %2351 = vmatpush2.msra.mxu1 %v2268_v48  ;;  %3174 = vmatprep.mubr.f32.mxu0 %v4197_v35 }
 0xa89   :  { %3175 = vmatmul.mubr.f32.gmra.mxu0 %v4200_v29 }
 0xb07   :  { %v1885_v35 = vpop.f32.mrf.mxu1 }
 0xb09   :  { %v1887_v29 = vpop.f32.mrf.mxu1 }
 0xb0b   :  { %v1891_v9 = vpop.f32.mrf.mxu1 }
 0xb0d   :  { %v1893_v13 = vpop.f32.mrf.mxu1 }
 0xb17   :  { %v1897_v15 = vpop.f32.mrf.mxu1 }
 0xb19   :  { %v1899_v17 = vpop.f32.mrf.mxu1 }
 0xb1b   :  { %v1903_v62 = vpop.f32.mrf.mxu1 }
 0xb24   :  { %v1771_v36 = vpop.f32.mrf.mxu0 }
 0xb25   :  { %v1786_v4 = vrot.slane %v1771_v36, %v3635_v5  ;;  %v1782_v34 = vrot.slane %v1771_v36, %v3630_v1  ;;  %v1790_v38 = vrot.slane %v1771_v36, %v3627_v0  ;;  %v1798_v56 = vrot.slane %v1771_v36, %v1797_v22  ;;  %v1905_v22 = vpop.f32.mrf.mxu1 }
 0xb26   :  { %v3138_v7 = vpop.f32.mrf.mxu0  ;;  %v1793_v1 = vsub.s32 4, %v3624_v63  ;;  %v1778_v16 = vrot.slane %v1771_v36, %v3642_v8 }
 0xb27   :  { %1804 = vrot.lane.b32.xlu0 %v1786_v4, %s3369_s12  ;;  %1800 = vrot.lane.b32.xlu1 %v1782_v34, %s3368_s11 }
 0xb28   :  { %v1794_v12 = vrot.slane %v1771_v36, %v1793_v1  ;;  %v3363_v36 = vld [vmem:[%s4701_s1 + $0x20] sm:$0xff] }
 0xb2b   :  { %1808 = vrot.lane.b32.xlu1 %v1790_v38, %s3367_s10 }
 0xb2f   :  { %1812 = vrot.lane.b32.xlu1 %v1798_v56, %s3368_s11 }
 0xb99   :  { %v1801_v5 = vpop.permute.xlu1 %1800  ;;  %v1805_v0 = vpop.permute.xlu0 %1804 }
 0xb9a   :  { %v1815_v10 = vsel %vm257_vm2, %v1778_v16, %v1801_v5  ;;  %v3364_v5 = vld [vmem:[%s4701_s1 + $0x30] sm:$0xff] }
 0xb9b   :  { %v1816_v63 = vsel %vm259_vm3, %v1815_v10, %v1805_v0  ;;  %v25_v0 = vld [vmem:[%s4701_s1 + $0x38] sm:$0xff] }
 0xb9d   :  { %v1809_v11 = vpop.permute.xlu1 %1808 }
 0xb9e   :  { %v1817_v27 = vsel %vm261_vm4, %v1816_v63, %v1809_v11 }
 0xb9f   :  { %v1886_v20 = vadd.f32 %v1885_v35, %v1817_v27  ;;  %v1892_v51 = vadd.f32 %v1891_v9, %v1817_v27  ;;  %v1898_v46 = vadd.f32 %v1897_v15, %v1817_v27  ;;  %v1904_v28 = vadd.f32 %v1903_v62, %v1817_v27 }
 0xba1   :  { %v1813_v30 = vpop.permute.xlu1 %1812  ;;  %v1916_v23 = vmul.f32 0.2, %v1886_v20  ;;  %vm1908_vm6 = vcmp.gt.f32.partialorder %v1886_v20, 0.0  ;;  %v1918_v57 = vmul.f32 0.2, %v1892_v51  ;;  %vm1910_vm9 = vcmp.gt.f32.partialorder %v1892_v51, 0.0 }
 0xba2   :  { %v4431_v31 = vsel %vm257_vm2, %v1794_v12, %v1813_v30  ;;  %v1920_v60 = vmul.f32 0.2, %v1898_v46  ;;  %vm1912_vm1 = vcmp.gt.f32.partialorder %v1898_v46, 0.0  ;;  %v1922_v38 = vmul.f32 0.2, %v1904_v28 }
 0xba3   :  { %v1888_v18 = vadd.f32 %v1887_v29, %v4431_v31  ;;  %v1894_v39 = vadd.f32 %v1893_v13, %v4431_v31  ;;  %v1900_v19 = vadd.f32 %v1899_v17, %v4431_v31  ;;  %v1924_v37 = vsel %vm1908_vm6, %v1886_v20, %v1916_v23 }
 0xba4   :  { %v4464_v32 = vadd.f32 %v3361_v59, %v1924_v37  ;;  %v1926_v50 = vsel %vm1910_vm9, %v1892_v51, %v1918_v57  ;;  %v1928_v48 = vsel %vm1912_vm1, %v1898_v46, %v1920_v60  ;;  %vm1914_vm11 = vcmp.gt.f32.partialorder %v1904_v28, 0.0 }
 0xba5   :  { %v1917_v8 = vmul.f32 0.2, %v1888_v18  ;;  %v1919_v41 = vmul.f32 0.2, %v1894_v39  ;;  %vm1909_vm15 = vcmp.gt.f32.partialorder %v1888_v18, 0.0  ;;  %vm1911_vm0 = vcmp.gt.f32.partialorder %v1894_v39, 0.0 }
 0xba6   :  { %v1921_v45 = vmul.f32 0.2, %v1900_v19  ;;  %vm1913_vm5 = vcmp.gt.f32.partialorder %v1900_v19, 0.0  ;;  %v4473_v52 = vadd.f32 %v3362_v26, %v1926_v50  ;;  %v1952_v54 = vsel %vm376_vm7, %v4464_v32, -inf }
 0xba7   :  { %v1925_v21 = vsel %vm1909_vm15, %v1888_v18, %v1917_v8  ;;  %v1927_v61 = vsel %vm1911_vm0, %v1894_v39, %v1919_v41  ;;  %v1940_v58 = vsel %vm257_vm2, %v4464_v32, -inf  ;;  %v1964_v42 = vsel %vm389_vm8, %v4464_v32, -inf }
 0xba8   :  { %v4444_v14 = vadd.f32 %v1925_v21, %v19_v43  ;;  %v4450_v2 = vadd.f32 %v1927_v61, %v21_v47  ;;  %v1929_v33 = vsel %vm1913_vm5, %v1900_v19, %v1921_v45  ;;  %v1943_v3 = vsel %vm257_vm2, %v4473_v52, -inf }
 0xba9   :  { %v4459_v25 = vadd.f32 %v1929_v33, %v23_v53  ;;  %v4486_v4 = vadd.f32 %v3363_v36, %v1928_v48  ;;  %v1967_v34 = vsel %vm389_vm8, %v4473_v52, -inf  ;;  %v1976_v7 = vsel %vm402_vm10, %v4464_v32, -inf }
 0xbaa   :  { %v2000_v49 = vsel %vm376_vm7, %v4444_v14, -inf  ;;  %v1988_v6 = vsel %vm257_vm2, %v4444_v14, -inf  ;;  %v2003_v24 = vsel %vm376_vm7, %v4450_v2, -inf  ;;  %v1991_v55 = vsel %vm257_vm2, %v4450_v2, -inf }
 0xbab   :  { %2001 = vmax.xlane.f32.xlu0 %v2000_v49  ;;  %1989 = vmax.xlane.f32.xlu1 %v1988_v6  ;;  %v2006_v40 = vsel %vm376_vm7, %v4459_v25, -inf  ;;  %v1994_v44 = vsel %vm257_vm2, %v4459_v25, -inf  ;;  %v1946_v56 = vsel %vm257_vm2, %v4486_v4, -inf  ;;  %v1955_v35 = vsel %vm376_vm7, %v4473_v52, -inf }
 0xbac   :  { %v1930_v29 = vsel %vm1914_vm11, %v1904_v28, %v1922_v38  ;;  %v1906_v9 = vadd.f32 %v1905_v22, %v4431_v31  ;;  %v1970_v13 = vsel %vm389_vm8, %v4486_v4, -inf  ;;  %v1979_v11 = vsel %vm402_vm10, %v4473_v52, -inf }
 0xbad   :  { %v4500_v1 = vadd.f32 %v3364_v5, %v1930_v29  ;;  %v1958_v12 = vsel %vm376_vm7, %v4486_v4, -inf  ;;  %v1982_v31 = vsel %vm402_vm10, %v4486_v4, -inf }
 0xbae   :  { %v1923_v15 = vmul.f32 0.2, %v1906_v9  ;;  %vm1915_vm12 = vcmp.gt.f32.partialorder %v1906_v9, 0.0 }
 0xbaf   :  { %2004 = vmax.xlane.f32.xlu0 %v2003_v24  ;;  %1992 = vmax.xlane.f32.xlu1 %v1991_v55  ;;  %v1949_v16 = vsel %vm257_vm2, %v4500_v1, -inf  ;;  %v1973_v30 = vsel %vm389_vm8, %v4500_v1, -inf  ;;  %v1961_v39 = vsel %vm376_vm7, %v4500_v1, -inf  ;;  %v1985_v63 = vsel %vm402_vm10, %v4500_v1, -inf }
 0xbb0   :  { %v1931_v10 = vsel %vm1915_vm12, %v1906_v9, %v1923_v15 }
 0xbb1   :  { %v4517_v17 = vadd.f32 %v1931_v10, %v25_v0 }
 0xbb3   :  { %2007 = vmax.xlane.f32.xlu0 %v2006_v40  ;;  %1995 = vmax.xlane.f32.xlu1 %v1994_v44  ;;  %v1997_v18 = vsel %vm257_vm2, %v4517_v17, -inf  ;;  %v2009_v19 = vsel %vm376_vm7, %v4517_v17, -inf }
 0xbb7   :  { %1953 = vmax.xlane.f32.xlu1 %v1952_v54  ;;  %1941 = vmax.xlane.f32.xlu0 %v1940_v58 }
 0xbbb   :  { %1944 = vmax.xlane.f32.xlu1 %v1943_v3  ;;  %1965 = vmax.xlane.f32.xlu0 %v1964_v42 }
 0xbbf   :  { %1968 = vmax.xlane.f32.xlu1 %v1967_v34  ;;  %1977 = vmax.xlane.f32.xlu0 %v1976_v7 }
 0xbc3   :  { %1947 = vmax.xlane.f32.xlu1 %v1946_v56  ;;  %1956 = vmax.xlane.f32.xlu0 %v1955_v35 }
 0xbc7   :  { %1971 = vmax.xlane.f32.xlu1 %v1970_v13  ;;  %1980 = vmax.xlane.f32.xlu0 %v1979_v11 }
 0xbcb   :  { %1950 = vmax.xlane.f32.xlu1 %v1949_v16  ;;  %1959 = vmax.xlane.f32.xlu0 %v1958_v12 }
 0xbcf   :  { %1974 = vmax.xlane.f32.xlu1 %v1973_v30  ;;  %1983 = vmax.xlane.f32.xlu0 %v1982_v31 }
 0xbd3   :  { %1998 = vmax.xlane.f32.xlu1 %v1997_v18  ;;  %1962 = vmax.xlane.f32.xlu0 %v1961_v39 }
 0xbd7   :  { %1986 = vmax.xlane.f32.xlu0 %v1985_v63 }
 0xbdb   :  { %2010 = vmax.xlane.f32.xlu0 %v2009_v19 }
 0xc34   :  { %v2002_v27 = vpop.xlane.xlu0 %2001  ;;  %v1990_v8 = vpop.xlane.xlu1 %1989 }
 0xc35   :  { %v2024_v41 = vsel %vm257_vm2, %v1990_v8, %v2002_v27 }
 0xc36   :  { %v2029_v43 = vsub.f32 %v4444_v14, %v2024_v41 }
 0xc38   :  { %v2038_v20 = vmul.f32 1.442695, %v2029_v43  ;;  %v2005_v45 = vpop.xlane.xlu0 %2004  ;;  %v1993_v21 = vpop.xlane.xlu1 %1992 }
 0xc39   :  { %v2025_v47 = vsel %vm257_vm2, %v1993_v21, %v2005_v45 }
 0xc3a   :  { %3296 = vpow2.f32 %v2038_v20  ;;  %v2031_v61 = vsub.f32 %v4450_v2, %v2025_v47 }
 0xc3c   :  { %v2042_v49 = vmul.f32 1.442695, %v2031_v61  ;;  %v2008_v6 = vpop.xlane.xlu0 %2007  ;;  %v1996_v51 = vpop.xlane.xlu1 %1995 }
 0xc3d   :  { %v2026_v23 = vsel %vm257_vm2, %v1996_v51, %v2008_v6 }
 0xc3e   :  { %3298 = vpow2.f32 %v2042_v49  ;;  %v2033_v53 = vsub.f32 %v4459_v25, %v2026_v23 }
 0xc40   :  { %v2046_v33 = vmul.f32 1.442695, %v2033_v53  ;;  %v1954_v24 = vpop.xlane.xlu1 %1953  ;;  %v1942_v55 = vpop.xlane.xlu0 %1941 }
 0xc41   :  { %v2012_v59 = vsel %vm257_vm2, %v1942_v55, %v1954_v24 }
 0xc42   :  { %3300 = vpow2.f32 %v2046_v33 }
 0xc44   :  { %v1945_v14 = vpop.xlane.xlu1 %1944  ;;  %v1966_v57 = vpop.xlane.xlu0 %1965 }
 0xc45   :  { %v2016_v2 = vsel %vm259_vm3, %v2012_v59, %v1966_v57 }
 0xc47   :  { %v4533_v37 = vpop.eup %3296 }
 0xc48   :  { %2196 = vrot.lane.b32.xlu1 %v4533_v37, %s3367_s10  ;;  %v1969_v40 = vpop.xlane.xlu1 %1968  ;;  %v1978_v44 = vpop.xlane.xlu0 %1977  ;;  %v2172_v43 = vsel %vm257_vm2, %v4533_v37, 0.0 }
 0xc49   :  { %v2020_v46 = vsel %vm261_vm4, %v2016_v2, %v1978_v44 }
 0xc4a   :  { %v2028_v25 = vsub.f32 %v4464_v32, %v2020_v46 }
 0xc4b   :  { %v4541_v50 = vpop.eup %3298 }
 0xc4c   :  { %v2036_v26 = vmul.f32 1.442695, %v2028_v25  ;;  %v1948_v54 = vpop.xlane.xlu1 %1947  ;;  %2198 = vrot.lane.b32.xlu0 %v4541_v50, %s3367_s10  ;;  %v1957_v58 = vpop.xlane.xlu0 %1956  ;;  %v2175_v20 = vsel %vm257_vm2, %v4541_v50, 0.0 }
 0xc4d   :  { %v2013_v60 = vsel %vm257_vm2, %v1945_v14, %v1957_v58 }
 0xc4e   :  { %3302 = vpow2.f32 %v2036_v26  ;;  %v2017_v3 = vsel %vm259_vm3, %v2013_v60, %v1969_v40 }
 0xc4f   :  { %v4546_v62 = vpop.eup %3300 }
 0xc50   :  { %2200 = vrot.lane.b32.xlu0 %v4546_v62, %s3367_s10  ;;  %v1981_v42 = vpop.xlane.xlu0 %1980  ;;  %v1972_v28 = vpop.xlane.xlu1 %1971  ;;  %v2178_v45 = vsel %vm257_vm2, %v4546_v62, 0.0 }
 0xc51   :  { %v2021_v32 = vsel %vm261_vm4, %v2017_v3, %v1981_v42 }
 0xc52   :  { %v2030_v48 = vsub.f32 %v4473_v52, %v2021_v32 }
 0xc54   :  { %v2040_v36 = vmul.f32 1.442695, %v2030_v48  ;;  %v1960_v34 = vpop.xlane.xlu0 %1959  ;;  %v1951_v38 = vpop.xlane.xlu1 %1950 }
 0xc55   :  { %v2014_v7 = vsel %vm257_vm2, %v1948_v54, %v1960_v34 }
 0xc56   :  { %3304 = vpow2.f32 %v2040_v36  ;;  %v2018_v22 = vsel %vm259_vm3, %v2014_v7, %v1972_v28 }
 0xc58   :  { %v1984_v56 = vpop.xlane.xlu0 %1983  ;;  %v1975_v11 = vpop.xlane.xlu1 %1974 }
 0xc59   :  { %v2022_v35 = vsel %vm261_vm4, %v2018_v22, %v1984_v56 }
 0xc5a   :  { %v2032_v29 = vsub.f32 %v4486_v4, %v2022_v35  ;;  %v2378_v35 = vld [vmem:[%s4699_s2 + $0x9a0] sm:$0xff] }
 0xc5b   :  { %v4557_v9 = vpop.eup %3302  ;;  %3177 = vmatprep.subr.mxu0 %v2378_v35 }
 0xc5c   :  { %v2044_v5 = vmul.f32 1.442695, %v2032_v29  ;;  %2076 = vrot.lane.b32.xlu1 %v4557_v9, %s3367_s10  ;;  %v1963_v52 = vpop.xlane.xlu0 %1962  ;;  %v1999_v10 = vpop.xlane.xlu1 %1998  ;;  %v2052_v47 = vsel %vm257_vm2, %v4557_v9, 0.0  ;;  %v2377_v29 = vld [vmem:[%s4699_s2 + $0x990] sm:$0xff]  ;;  %3178 = vmatpush3.msra.mxu0 %v2378_v35 }
 0xc5d   :  { %v2015_v13 = vsel %vm257_vm2, %v1951_v38, %v1963_v52  ;;  %3179 = vmatprep.subr.mxu0 %v2377_v29 }
 0xc5e   :  { %3306 = vpow2.f32 %v2044_v5  ;;  %v2019_v15 = vsel %vm259_vm3, %v2015_v13, %v1975_v11  ;;  %3180 = vmatpush3.msra.mxu0 %v2377_v29 }
 0xc60   :  { %2140 = vrot.lane.b32.xlu1 %v4557_v9, %s3368_s11  ;;  %v1987_v16 = vpop.xlane.xlu0 %1986 }
 0xc61   :  { %v2023_v12 = vsel %vm261_vm4, %v2019_v15, %v1987_v16 }
 0xc62   :  { %v2034_v4 = vsub.f32 %v4500_v1, %v2023_v12 }
 0xc63   :  { %v4567_v0 = vpop.eup %3304 }
 0xc64   :  { %v2048_v30 = vmul.f32 1.442695, %v2034_v4  ;;  %2110 = vrot.lane.b32.xlu1 %v4567_v0, %s3369_s12  ;;  %v2011_v31 = vpop.xlane.xlu0 %2010 }
 0xc65   :  { %v2027_v18 = vsel %vm257_vm2, %v1999_v10, %v2011_v31 }
 0xc66   :  { %3308 = vpow2.f32 %v2048_v30  ;;  %v2035_v39 = vsub.f32 %v4517_v17, %v2027_v18  ;;  %v2055_v17 = vsel %vm257_vm2, %v4567_v0, 0.0 }
 0xc68   :  { %v2050_v63 = vmul.f32 1.442695, %v2035_v39  ;;  %2142 = vrot.lane.b32.xlu1 %v4567_v0, %s3368_s11 }
 0xc6a   :  { %3310 = vpow2.f32 %v2050_v63 }
 0xc6b   :  { %v4575_v19 = vpop.eup %3306 }
 0xc6c   :  { %2112 = vrot.lane.b32.xlu1 %v4575_v19, %s3369_s12  ;;  %v2058_v8 = vsel %vm257_vm2, %v4575_v19, 0.0 }
 0xc70   :  { %2144 = vrot.lane.b32.xlu1 %v4575_v19, %s3368_s11 }
 0xc73   :  { %v4581_v1 = vpop.eup %3308 }
 0xc74   :  { %2114 = vrot.lane.b32.xlu1 %v4581_v1, %s3369_s12  ;;  %v2061_v41 = vsel %vm257_vm2, %v4581_v1, 0.0 }
 0xc77   :  { %v4585_v27 = vpop.eup %3310 }
 0xc78   :  { %2146 = vrot.lane.b32.xlu1 %v4581_v1, %s3368_s11  ;;  %2202 = vrot.lane.b32.xlu0 %v4585_v27, %s3367_s10  ;;  %v2181_v21 = vsel %vm257_vm2, %v4585_v27, 0.0 }
 0xc7c   :  { %2108 = vrot.lane.b32.xlu0 %v4557_v9, %s3369_s12 }
 0xc80   :  { %2078 = vrot.lane.b32.xlu0 %v4567_v0, %s3367_s10 }
 0xc84   :  { %2080 = vrot.lane.b32.xlu0 %v4575_v19, %s3367_s10 }
 0xc88   :  { %2082 = vrot.lane.b32.xlu0 %v4581_v1, %s3367_s10 }
 0xc9c   :  { %2056 = vadd.xlane.f32.xlu1 %v2055_v17 }
 0xca0   :  { %2059 = vadd.xlane.f32.xlu1 %v2058_v8 }
 0xca4   :  { %2062 = vadd.xlane.f32.xlu1 %v2061_v41 }
 0xca7   :  { %2173 = vadd.xlane.f32.xlu0 %v2172_v43 }
 0xcab   :  { %2176 = vadd.xlane.f32.xlu0 %v2175_v20 }
 0xcaf   :  { %2179 = vadd.xlane.f32.xlu0 %v2178_v45 }
 0xcb3   :  { %2182 = vadd.xlane.f32.xlu0 %v2181_v21 }
 0xcb7   :  { %2053 = vadd.xlane.f32.xlu0 %v2052_v47 }
 0xcba   :  { %v2197_v61 = vpop.permute.xlu1 %2196 }
 0xcbb   :  { %v2208_v49 = vsel %vm257_vm2, %v2197_v61, 0.0 }
 0xcbc   :  { %2209 = vadd.xlane.f32.xlu1 %v2208_v49 }
 0xcbe   :  { %v2199_v6 = vpop.permute.xlu0 %2198 }
 0xcbf   :  { %v2211_v51 = vsel %vm257_vm2, %v2199_v6, 0.0 }
 0xcc0   :  { %2212 = vadd.xlane.f32.xlu1 %v2211_v51 }
 0xcc2   :  { %v2201_v23 = vpop.permute.xlu0 %2200 }
 0xcc3   :  { %v2214_v53 = vsel %vm257_vm2, %v2201_v23, 0.0 }
 0xcc4   :  { %2215 = vadd.xlane.f32.xlu1 %v2214_v53 }
 0xcce   :  { %v2077_v33 = vpop.permute.xlu1 %2076 }
 0xccf   :  { %v2088_v24 = vsel %vm257_vm2, %v2077_v33, 0.0 }
 0xcd0   :  { %2089 = vadd.xlane.f32.xlu1 %v2088_v24 }
 0xcd2   :  { %v2141_v55 = vpop.permute.xlu1 %2140 }
 0xcd3   :  { %v2152_v3 = vsel %vm257_vm2, %v2141_v55, 0.0 }
 0xcd6   :  { %v2111_v14 = vpop.permute.xlu1 %2110 }
 0xcd7   :  { %v2123_v57 = vsel %vm257_vm2, %v2111_v14, 0.0 }
 0xcd8   :  { %2124 = vadd.xlane.f32.xlu1 %v2123_v57 }
 0xcda   :  { %v2143_v59 = vpop.permute.xlu1 %2142 }
 0xcdb   :  { %v2155_v28 = vsel %vm257_vm2, %v2143_v59, 0.0 }
 0xcde   :  { %v2113_v2 = vpop.permute.xlu1 %2112 }
 0xcdf   :  { %v2126_v40 = vsel %vm257_vm2, %v2113_v2, 0.0 }
 0xce0   :  { %2127 = vadd.xlane.f32.xlu1 %v2126_v40 }
 0xce2   :  { %v2145_v44 = vpop.permute.xlu1 %2144 }
 0xce3   :  { %v2158_v34 = vsel %vm257_vm2, %v2145_v44, 0.0 }
 0xce6   :  { %v2115_v46 = vpop.permute.xlu1 %2114 }
 0xce7   :  { %v2129_v25 = vsel %vm257_vm2, %v2115_v46, 0.0 }
 0xce8   :  { %2130 = vadd.xlane.f32.xlu1 %v2129_v25 }
 0xcea   :  { %v2203_v26 = vpop.permute.xlu0 %2202  ;;  %v2147_v22 = vpop.permute.xlu1 %2146 }
 0xceb   :  { %v2217_v54 = vsel %vm257_vm2, %v2203_v26, 0.0  ;;  %v2161_v56 = vsel %vm257_vm2, %v2147_v22, 0.0 }
 0xcec   :  { %2218 = vadd.xlane.f32.xlu1 %v2217_v54 }
 0xcee   :  { %v2109_v58 = vpop.permute.xlu0 %2108 }
 0xcef   :  { %v2120_v60 = vsel %vm257_vm2, %v2109_v58, 0.0 }
 0xcf0   :  { %2121 = vadd.xlane.f32.xlu0 %v2120_v60 }
 0xcf2   :  { %v2079_v42 = vpop.permute.xlu0 %2078 }
 0xcf3   :  { %v2091_v32 = vsel %vm257_vm2, %v2079_v42, 0.0 }
 0xcf4   :  { %2153 = vadd.xlane.f32.xlu0 %v2152_v3 }
 0xcf6   :  { %v2081_v48 = vpop.permute.xlu0 %2080 }
 0xcf7   :  { %v2094_v36 = vsel %vm257_vm2, %v2081_v48, 0.0 }
 0xcf8   :  { %2092 = vadd.xlane.f32.xlu0 %v2091_v32 }
 0xcfa   :  { %v2083_v7 = vpop.permute.xlu0 %2082 }
 0xcfb   :  { %v2097_v38 = vsel %vm257_vm2, %v2083_v7, 0.0 }
 0xcfc   :  { %2156 = vadd.xlane.f32.xlu0 %v2155_v28 }
 0xd00   :  { %2095 = vadd.xlane.f32.xlu0 %v2094_v36 }
 0xd04   :  { %2159 = vadd.xlane.f32.xlu0 %v2158_v34 }
 0xd08   :  { %2098 = vadd.xlane.f32.xlu0 %v2097_v38 }
 0xd0c   :  { %2162 = vadd.xlane.f32.xlu0 %v2161_v56 }
 0xd25   :  { %v2057_v5 = vpop.xlane.xlu1 %2056 }
 0xd29   :  { %v2060_v52 = vpop.xlane.xlu1 %2059 }
 0xd2d   :  { %v4637_v13 = vpop.xlane.xlu1 %2062 }
 0xd30   :  { %v2174_v11 = vpop.xlane.xlu0 %2173 }
 0xd31   :  { %3312 = vrcp.f32 %v2174_v11 }
 0xd34   :  { %v2177_v30 = vpop.xlane.xlu0 %2176 }
 0xd38   :  { %v2180_v31 = vpop.xlane.xlu0 %2179 }
 0xd3c   :  { %v2183_v39 = vpop.xlane.xlu0 %2182 }
 0xd3e   :  { %v3313_v16 = vpop.eup %3312 }
 0xd40   :  { %v2054_v17 = vpop.xlane.xlu0 %2053 }
 0xd45   :  { %v2210_v15 = vpop.xlane.xlu1 %2209 }
 0xd46   :  { %3314 = vrcp.f32 %v2210_v15 }
 0xd49   :  { %v2213_v18 = vpop.xlane.xlu1 %2212 }
 0xd4a   :  { %3316 = vrcp.f32 %v2213_v18  ;;  %v2374_v18 = vld [vmem:[%s4699_s2 + $0x960] sm:$0xff] }
 0xd4d   :  { %v2216_v63 = vpop.xlane.xlu1 %2215 }
 0xd53   :  { %v3315_v12 = vpop.eup %3314 }
 0xd54   :  { %v2240_v4 = vsel %vm257_vm2, %v3313_v16, %v3315_v12 }
 0xd55   :  { %v2245_v10 = vmul.f32 %v4533_v37, %v2240_v4 }
 0xd57   :  { %2615 = vmatprep.mubr.msk.f32.mxu1 %vm259_vm3, %v2245_v10  ;;  %v3317_v61 = vpop.eup %3316 }
 0xd59   :  { %v2090_v8 = vpop.xlane.xlu1 %2089 }
 0xd5a   :  { %3318 = vrcp.f32 %v2090_v8 }
 0xd61   :  { %v2125_v43 = vpop.xlane.xlu1 %2124 }
 0xd67   :  { %v3319_v49 = vpop.eup %3318 }
 0xd69   :  { %v2128_v45 = vpop.xlane.xlu1 %2127 }
 0xd71   :  { %v2131_v21 = vpop.xlane.xlu1 %2130 }
 0xd75   :  { %v2219_v51 = vpop.xlane.xlu1 %2218 }
 0xd79   :  { %v2122_v41 = vpop.xlane.xlu0 %2121 }
 0xd7a   :  { %3320 = vrcp.f32 %v2122_v41 }
 0xd7b   :  { %3322 = vrcp.f32 %v2054_v17 }
 0xd7c   :  { %3324 = vrcp.f32 %v2177_v30 }
 0xd7d   :  { %v2154_v20 = vpop.xlane.xlu0 %2153 }
 0xd7e   :  { %3326 = vrcp.f32 %v2154_v20 }
 0xd7f   :  { %3328 = vrcp.f32 %v2057_v5 }
 0xd81   :  { %v2093_v37 = vpop.xlane.xlu0 %2092 }
 0xd82   :  { %3330 = vrcp.f32 %v2093_v37  ;;  %v3173_v37 = vpop.f32.mrf.mxu0 }
 0xd83   :  { %3332 = vrcp.f32 %v2216_v63 }
 0xd84   :  { %3334 = vrcp.f32 %v2180_v31 }
 0xd85   :  { %3336 = vrcp.f32 %v2125_v43  ;;  %v2157_v47 = vpop.xlane.xlu0 %2156 }
 0xd86   :  { %3338 = vrcp.f32 %v2157_v47 }
 0xd87   :  { %v3321_v6 = vpop.eup %3320  ;;  %3340 = vrcp.f32 %v2060_v52 }
 0xd88   :  { %v3323_v23 = vpop.eup %3322 }
 0xd89   :  { %v2096_v53 = vpop.xlane.xlu0 %2095  ;;  %v3325_v33 = vpop.eup %3324  ;;  %v2228_v24 = vsel %vm257_vm2, %v3323_v23, %v3319_v49 }
 0xd8a   :  { %3342 = vrcp.f32 %v2096_v53  ;;  %v2232_v14 = vsel %vm259_vm3, %v2228_v24, %v3321_v6  ;;  %v2241_v57 = vsel %vm257_vm2, %v3325_v33, %v3317_v61  ;;  %v2577_v6 = vld [vmem:[%s4699_s2 + $0x9d0] ss:$0 sm:$0xff] }
 0xd8b   :  { %v3327_v55 = vpop.eup %3326  ;;  %3344 = vrcp.f32 %v2219_v51  ;;  %v2247_v46 = vmul.f32 %v4541_v50, %v2241_v57 }
 0xd8c   :  { %3346 = vrcp.f32 %v2183_v39  ;;  %v2236_v59 = vsel %vm261_vm4, %v2232_v14, %v3327_v55  ;;  %v3329_v44 = vpop.eup %3328 }
 0xd8d   :  { %3348 = vrcp.f32 %v2128_v45  ;;  %v2160_v2 = vpop.xlane.xlu0 %2159  ;;  %v2244_v40 = vmul.f32 %v4557_v9, %v2236_v59 }
 0xd8e   :  { %3350 = vrcp.f32 %v2160_v2 }
 0xd8f   :  { %v3331_v25 = vpop.eup %3330  ;;  %2353 = vmatmul.mubr.f32.vlgmr.msra.gmra.mxu1 %v2244_v40  ;;  %3352 = vrcp.f32 %v4637_v13 }
 0xd90   :  { %v3333_v26 = vpop.eup %3332  ;;  %2616 = vmatprep.mubr.msk.f32.mxu1 %vm259_vm3, %v2247_v46  ;;  %v2229_v54 = vsel %vm257_vm2, %v3329_v44, %v3331_v25 }
 0xd91   :  { %v3335_v58 = vpop.eup %3334  ;;  %v2099_v60 = vpop.xlane.xlu0 %2098 }
 0xd92   :  { %v3337_v3 = vpop.eup %3336  ;;  %3354 = vrcp.f32 %v2099_v60  ;;  %v2242_v32 = vsel %vm257_vm2, %v3335_v58, %v3333_v26 }
 0xd93   :  { %v3339_v42 = vpop.eup %3338  ;;  %v2233_v9 = vsel %vm259_vm3, %v2229_v54, %v3337_v3  ;;  %3356 = vrcp.f32 %v2131_v21  ;;  %v2249_v34 = vmul.f32 %v4546_v62, %v2242_v32  ;;  %v2461_v21 = vpop.f32.mrf.mxu0 }
 0xd94   :  { %v2237_v50 = vsel %vm261_vm4, %v2233_v9, %v3339_v42  ;;  %v3341_v36 = vpop.eup %3340 }
 0xd95   :  { %v2163_v28 = vpop.xlane.xlu0 %2162  ;;  %v2246_v48 = vmul.f32 %v4567_v0, %v2237_v50  ;;  %v3176_v47 = vpop.f32.mrf.mxu0 }
 0xd96   :  { %3358 = vrcp.f32 %v2163_v28 }
 0xd97   :  { %v3343_v7 = vpop.eup %3342  ;;  %2358 = vmatmul.mubr.f32.gmra.mxu1 %v2246_v48  ;;  %v2471_v61 = vpop.f32.mrf.mxu0 }
 0xd98   :  { %v3345_v38 = vpop.eup %3344  ;;  %2617 = vmatprep.mubr.msk.f32.mxu1 %vm259_vm3, %v2249_v34  ;;  %v2230_v22 = vsel %vm257_vm2, %v3341_v36, %v3343_v7 }
 0xd99   :  { %v3347_v56 = vpop.eup %3346 }
 0xd9a   :  { %v3349_v35 = vpop.eup %3348  ;;  %v2243_v52 = vsel %vm257_vm2, %v3347_v56, %v3345_v38 }
 0xd9b   :  { %v3351_v29 = vpop.eup %3350  ;;  %v2234_v5 = vsel %vm259_vm3, %v2230_v22, %v3349_v35  ;;  %v2251_v62 = vmul.f32 %v4585_v27, %v2243_v52  ;;  %v2375_v27 = vld [vmem:[%s4699_s2 + $0x970] sm:$0xff] }
 0xd9c   :  { %v2238_v0 = vsel %vm261_vm4, %v2234_v5, %v3351_v29  ;;  %v3353_v11 = vpop.eup %3352 }
 0xd9d   :  { %v2248_v13 = vmul.f32 %v4575_v19, %v2238_v0  ;;  %v2376_v19 = vld [vmem:[%s4699_s2 + $0x980] sm:$0xff] }
 0xd9e   :  { %3181 = vmatprep.subr.mxu0 %v2376_v19 }
 0xd9f   :  { %v3355_v15 = vpop.eup %3354  ;;  %2363 = vmatmul.mubr.f32.gmra.mxu1 %v2248_v13  ;;  %3182 = vmatpush3.msra.mxu0 %v2376_v19 }
 0xda0   :  { %2618 = vmatprep.mubr.msk.f32.mxu1 %vm259_vm3, %v2251_v62  ;;  %v2231_v16 = vsel %vm257_vm2, %v3353_v11, %v3355_v15  ;;  %v3357_v12 = vpop.eup %3356  ;;  %3183 = vmatprep.subr.mxu0 %v2375_v27 }
 0xda1   :  { %v2235_v10 = vsel %vm259_vm3, %v2231_v16, %v3357_v12  ;;  %3184 = vmatpush3.msra.mxu0 %v2375_v27 }
 0xda2   :  { %3185 = vmatprep.subr.mxu0 %v2374_v18 }
 0xda3   :  { %v3359_v4 = vpop.eup %3358  ;;  %3186 = vmatpush3.msra.mxu0 %v2374_v18 }
 0xda4   :  { %v2239_v30 = vsel %vm261_vm4, %v2235_v10, %v3359_v4 }
 0xda5   :  { %v2250_v31 = vmul.f32 %v4581_v1, %v2239_v30  ;;  %v2373_v1 = vld [vmem:[%s4699_s2 + $0x950] sm:$0xff] }
 0xda6   :  { %3187 = vmatprep.subr.mxu0 %v2373_v1 }
 0xda7   :  { %2368 = vmatmul.mubr.f32.gmra.mxu1 %v2250_v31  ;;  %3188 = vmatpush3.msra.mxu0 %v2373_v1 }
 0xe4f   :  { %v2354_v39 = vpop.f32.mrf.mxu1 }
 0xe50   :  { %3189 = vmatprep.mubr.msk.f32.mxu0 %vm1689_vm14, %v2354_v39 }
 0xe51   :  { %v2356_v63 = vpop.f32.mrf.mxu1 }
 0xe57   :  { %v2359_v17 = vpop.f32.mrf.mxu1 }
 0xe58   :  { %3190 = vmatmul.mubr.msk.f32.vlgmr.msra.gmra.mxu0 %vm1689_vm14, %v2359_v17 }
 0xe59   :  { %v2361_v8 = vpop.f32.mrf.mxu1 }
 0xe5f   :  { %v2364_v41 = vpop.f32.mrf.mxu1 }
 0xe60   :  { %3192 = vmatprep.mubr.msk.f32.mxu0 %vm1689_vm14, %v2364_v41 }
 0xe61   :  { %v2366_v43 = vpop.f32.mrf.mxu1 }
 0xe67   :  { %v2369_v20 = vpop.f32.mrf.mxu1 }
 0xe68   :  { %3193 = vmatmul.mubr.msk.f32.gmra.mxu0 %vm1689_vm14, %v2369_v20 }
 0xe69   :  { %v2371_v45 = vpop.f32.mrf.mxu1 }
 0xf18   :  { %v3191_v49 = vpop.f32.mrf.mxu0 }
 0xf19   :  { %v2564_v51 = vadd.f32 %v3191_v49, %v3173_v37 }
 0xf1a   :  { %v2558_v23 = vpop.f32.mrf.mxu0 }
 0xf1b   :  { %v2579_v53 = vadd.f32 %v2577_v6, %v2564_v51  ;;  %v2559_v33 = vadd.f32 %v2558_v23, %v2461_v21 }
 0xf1d   :  { %2583 = vst [vmem:[%s4702_s3 + $0x8] sm:$0xff] %v2579_v53  ;;  %v2578_v24 = vadd.f32 %v2577_v6, %v2559_v33 }
 0xf1f   :  { %2582 = vst [vmem:[%s4702_s3] sm:$0xff] %v2578_v24 }
 0xf28   :  { %v3194_v55 = vpop.f32.mrf.mxu0 }
 0xf29   :  { %v2574_v14 = vadd.f32 %v3194_v55, %v3176_v47 }
 0xf2a   :  { %v2568_v57 = vpop.f32.mrf.mxu0 }
 0xf2b   :  { %v2581_v59 = vadd.f32 %v2577_v6, %v2574_v14  ;;  %v2569_v2 = vadd.f32 %v2568_v57, %v2471_v61 }
 0xf2d   :  { %2585 = vst [vmem:[%s4702_s3 + $0x18] sm:$0xff] %v2581_v59  ;;  %v2580_v40 = vadd.f32 %v2577_v6, %v2569_v2 }
 0xf2f   :  { %2584 = vst [vmem:[%s4702_s3 + $0x10] sm:$0xff] %v2580_v40 }

</bundles_post_ra>
